<compile_context>
chip_gen: v7x
topology: tpu7x:2x2x1
jax: 0.10.0
libtpu: 0.0.40
codegen_flags: <defaults>
</compile_context>

<pallas_src>
import functools

import jax
import jax.numpy as jnp
from jax.experimental import pallas as pl
from jax.experimental.pallas import tpu as pltpu


# ----------------------------------------------------------------------------
# LSTM cell math on pre-activations.  Gate column order is (i, f, o, g), so
# sigmoid runs only over the contiguous 3H sigmoid gates and tanh only over g.
# ----------------------------------------------------------------------------
def _lstm_cell(gates, c_prev, H):
    sg = jax.nn.sigmoid(gates[:, 0:3 * H])   # i, f, o
    g = jnp.tanh(gates[:, 3 * H:4 * H])      # g
    i = sg[:, 0:H]
    f = sg[:, H:2 * H]
    o = sg[:, 2 * H:3 * H]
    c = f * c_prev + i * g
    h = o * jnp.tanh(c)
    return h, c


# ----------------------------------------------------------------------------
# Single fused kernel: all LSTM layers + dropout + fc head.
# refs = (x, [w_ih, w_hh, b] * n_layers, fc_w, fc_b, drop, out, xp_scratch)
# ----------------------------------------------------------------------------
def _fused_bilstm_kernel(*refs, T, H, n_layers):
    x_ref = refs[0]
    layer_refs = refs[1:1 + 3 * n_layers]
    fcw_ref, fcb_ref, drop_ref = refs[1 + 3 * n_layers:4 + 3 * n_layers]
    out_ref = refs[4 + 3 * n_layers]
    xp_ref = refs[5 + 3 * n_layers]

    BP = x_ref.shape[0] // T          # batch padded to a multiple of 8 sublanes
    H4, H8 = 4 * H, 8 * H

    x_in = x_ref[...]                 # [T*BP, D_l] bf16, time-major
    h_f = h_r = None

    for l in range(n_layers):
        wih_ref, whh_ref, b_ref = layer_refs[3 * l:3 * l + 3]

        # Hoisted input projection for BOTH directions in one MXU matmul,
        # bias folded in; written once to an (8,128)-aligned [T, BP, 8H]
        # scratch so per-step reads are full aligned tiles.
        xp = jnp.dot(x_in, wih_ref[...], preferred_element_type=jnp.float32)
        xp_ref[...] = (xp + b_ref[...]).reshape(T, BP, H8)

        whh = whh_ref[...]            # [2H, 8H] bf16, block-diagonal (fwd|rev)

        h_f = jnp.zeros((BP, H), jnp.float32)
        c_f = jnp.zeros((BP, H), jnp.float32)
        h_r = jnp.zeros((BP, H), jnp.float32)
        c_r = jnp.zeros((BP, H), jnp.float32)

        collect = l < n_layers - 1    # last layer only needs final h
        hf_t = [None] * T
        hr_t = [None] * T

        # T is small and static -> fully unrolled, LLO-visible recurrence.
        # TODO(synk): for realistic T (e.g. 512) switch to lax.fori_loop with
        # time-chunked streaming of xp to bound VMEM (esp. on v7x, 64 MiB).
        for s in range(T):
            tf = s                    # forward time index
            tr = T - 1 - s            # reverse time index
            g_f = xp_ref[tf, :, 0:H4]
            g_r = xp_ref[tr, :, H4:H8]
            if s > 0:
                # One recurrent matmul for both directions via the
                # block-diagonal W_hh: [BP, 2H] @ [2H, 8H].
                h_cat = jnp.concatenate([h_f, h_r], axis=1).astype(jnp.bfloat16)
                hg = jnp.dot(h_cat, whh, preferred_element_type=jnp.float32)
                g_f = g_f + hg[:, 0:H4]
                g_r = g_r + hg[:, H4:H8]
            h_f, c_f = _lstm_cell(g_f, c_f, H)
            h_r, c_r = _lstm_cell(g_r, c_r, H)
            if collect:
                hf_t[tf] = h_f
                hr_t[tr] = h_r

        if collect:
            # Assemble the next layer's time-major input [T*BP, 2H] entirely
            # in registers: no HBM round trip, no masked sub-tile stores.
            x_fwd = jnp.concatenate(hf_t, axis=0)     # [T*BP, H]
            x_rev = jnp.concatenate(hr_t, axis=0)     # [T*BP, H]
            x_in = jnp.concatenate([x_fwd, x_rev], axis=1).astype(jnp.bfloat16)

    # Head: hidden_last[-2] ++ hidden_last[-1]  ->  dropout  ->  fc.
    hidden = jnp.concatenate([h_f, h_r], axis=1)      # [BP, 2H] f32
    hidden = hidden * drop_ref[...]                   # keep-mask * 1/(1-p)
    out_ref[...] = (jnp.dot(hidden.astype(jnp.bfloat16), fcw_ref[...],
                            preferred_element_type=jnp.float32)
                    + fcb_ref[...])


# ----------------------------------------------------------------------------
# Wrapper: layout plumbing + dropout mask + single pallas_call.
# ----------------------------------------------------------------------------
def bert_lstm_forward(x_emb, params, *, drop_prob=0.4, dropout_key=None,
                      training=True):
    """x_emb: BERT sequence output [B, T, 768] f32 -> logits [B, output_size]."""
    B, T, D = x_emb.shape
    H = params["hidden_dim"]
    n_layers = params["n_layers"]
    out_dim = params["output_size"]
    BP = ((B + 7) // 8) * 8            # pad batch to 8 sublanes

    # batch-first -> time-major, zero-pad batch, bf16 for the MXU.
    # TODO(synk): at realistic (B, T) fold this transpose/pad/cast into the
    # kernel (or a time-chunk grid axis) to avoid an extra HBM pass.
    x = jnp.transpose(x_emb, (1, 0, 2))
    x = jnp.pad(x, ((0, 0), (0, BP - B), (0, 0)))
    x = x.reshape(T * BP, D).astype(jnp.bfloat16)

    # Dropout keep-mask, pre-scaled by 1/(1-p).  Generated with jax.random in
    # the wrapper (in-kernel pltpu.prng_* has no CPU/interpret lowering) and
    # keyed per call, so masks are not reused across steps.
    if training and drop_prob > 0.0:
        key = jax.random.PRNGKey(0) if dropout_key is None else dropout_key
        keep = jax.random.bernoulli(key, 1.0 - drop_prob, (BP, 2 * H))
        drop = keep.astype(jnp.float32) * (1.0 / (1.0 - drop_prob))
    else:
        drop = jnp.ones((BP, 2 * H), jnp.float32)

    args = [x]
    for l in range(n_layers):
        p = params["lstm"][l]
        args += [p["w_ih"], p["w_hh"], p["b"]]
    args += [params["fc_w"], params["fc_b"], drop]

    out_pad = params["fc_w"].shape[1]  # fc output lane-padded to 128
    kernel = functools.partial(_fused_bilstm_kernel, T=T, H=H,
                               n_layers=n_layers)

    # TODO(synk): on v7x, split the fwd/rev recurrences across the two
    # TensorCores (pl.core_map over a 2-core mesh) for ~2x on the recurrence.
    out = pl.pallas_call(
        kernel,
        out_shape=jax.ShapeDtypeStruct((BP, out_pad), jnp.float32),
        in_specs=[pl.BlockSpec(memory_space=pltpu.MemorySpace.VMEM)] * len(args),
        out_specs=pl.BlockSpec(memory_space=pltpu.MemorySpace.VMEM),
        scratch_shapes=[pltpu.VMEM((T, BP, 8 * H), jnp.float32)],
        compiler_params=pltpu.CompilerParams(
            vmem_limit_bytes=32 * 1024 * 1024),
    )(*args)
    return out[:B, :out_dim]


# ----------------------------------------------------------------------------
# Parameter init (same shapes/semantics as nn.LSTM / nn.Linear), stored in the
# fused, pre-reordered layout the kernel consumes:
#   w_ih : [D_in, 8H] bf16  -- cols [0:4H) fwd gates (i,f,o,g), [4H:8H) rev
#   w_hh : [2H, 8H]   bf16  -- block-diagonal: rows [0:H) -> fwd cols,
#                              rows [H:2H) -> rev cols, zeros elsewhere
#   b    : [1, 8H]    f32   -- b_ih + b_hh, same column layout
#   fc_w : [2H, 128]  bf16 (real cols [0:out)), fc_b: [1, 128] f32
# NOTE: any PyTorch checkpoint import must apply the SAME transpose + gate
# reorder (i,f,g,o)->(i,f,o,g) to w_ih, w_hh and biases consistently.
# ----------------------------------------------------------------------------
def init_params(key, hidden_dim, output_size, n_layers, input_dim):
    H = hidden_dim
    out_pad = ((output_size + 127) // 128) * 128
    params = {"hidden_dim": H, "output_size": output_size, "n_layers": n_layers}

    def reorder_ifgo_to_ifog(w):
        i, f, g, o = jnp.split(w, 4, axis=-1)
        return jnp.concatenate([i, f, o, g], axis=-1)

    scale = 1.0 / float(H) ** 0.5
    k = key
    layers = []
    for l in range(n_layers):
        d_in = input_dim if l == 0 else 2 * H
        per_dir = {}
        for dname in ("fwd", "rev"):
            k, k1, k2, k3, k4 = jax.random.split(k, 5)
            per_dir[dname] = {
                "w_ih": jax.random.uniform(k1, (d_in, 4 * H), minval=-scale,
                                           maxval=scale, dtype=jnp.float32),
                "w_hh": jax.random.uniform(k2, (H, 4 * H), minval=-scale,
                                           maxval=scale, dtype=jnp.float32),
                "b": (jax.random.uniform(k3, (4 * H,), minval=-scale,
                                         maxval=scale, dtype=jnp.float32)
                      + jax.random.uniform(k4, (4 * H,), minval=-scale,
                                           maxval=scale, dtype=jnp.float32)),
            }
        w_ih = jnp.concatenate(
            [reorder_ifgo_to_ifog(per_dir["fwd"]["w_ih"]),
             reorder_ifgo_to_ifog(per_dir["rev"]["w_ih"])],
            axis=1).astype(jnp.bfloat16)
        w_hh = jnp.zeros((2 * H, 8 * H), jnp.float32)
        w_hh = w_hh.at[0:H, 0:4 * H].set(
            reorder_ifgo_to_ifog(per_dir["fwd"]["w_hh"]))
        w_hh = w_hh.at[H:2 * H, 4 * H:8 * H].set(
            reorder_ifgo_to_ifog(per_dir["rev"]["w_hh"]))
        w_hh = w_hh.astype(jnp.bfloat16)
        b = jnp.concatenate(
            [reorder_ifgo_to_ifog(per_dir["fwd"]["b"]),
             reorder_ifgo_to_ifog(per_dir["rev"]["b"])]).reshape(1, 8 * H)
        layers.append({"w_ih": w_ih, "w_hh": w_hh, "b": b})
    params["lstm"] = layers

    k, kw, kb = jax.random.split(k, 3)
    fscale = 1.0 / float(2 * H) ** 0.5
    fc_w = jax.random.uniform(kw, (2 * H, output_size), minval=-fscale,
                              maxval=fscale, dtype=jnp.float32)
    fc_b = jax.random.uniform(kb, (output_size,), minval=-fscale,
                              maxval=fscale, dtype=jnp.float32)
    params["fc_w"] = (jnp.zeros((2 * H, out_pad), jnp.float32)
                      .at[:, :output_size].set(fc_w).astype(jnp.bfloat16))
    params["fc_b"] = (jnp.zeros((1, out_pad), jnp.float32)
                      .at[0, :output_size].set(fc_b))
    return params


if __name__ == "__main__":
    key = jax.random.PRNGKey(0)
    k_param, k_x, k_drop = jax.random.split(key, 3)

    B, T, D = 2, 8, 768            # small batch / seq; 768 = BERT hidden width
    hidden_dim, output_size, n_layers = 32, 2, 2

    params = init_params(k_param, hidden_dim, output_size, n_layers, D)

    # Stand-in for self.bert(x)[0]: BERT sequence output embeddings.
    x_emb = jax.random.normal(k_x, (B, T, D), dtype=jnp.float32)

    out = bert_lstm_forward(x_emb, params, drop_prob=0.4, dropout_key=k_drop,
                            training=True)
    out = jax.block_until_ready(out)
    assert out.shape == (B, output_size), out.shape
    assert bool(jnp.all(jnp.isfinite(out)))
    print("KERNEL_OK")
</pallas_src>

<mosaic_0001>
module attributes {stable_mosaic.version = 11 : i64} {
  func.func @_fused_bilstm_kernel(%arg0: memref<64x768xbf16, #tpu.memory_space<vmem>>, %arg1: memref<768x256xbf16, #tpu.memory_space<vmem>>, %arg2: memref<64x256xbf16, #tpu.memory_space<vmem>>, %arg3: memref<1x256xf32, #tpu.memory_space<vmem>>, %arg4: memref<64x256xbf16, #tpu.memory_space<vmem>>, %arg5: memref<64x256xbf16, #tpu.memory_space<vmem>>, %arg6: memref<1x256xf32, #tpu.memory_space<vmem>>, %arg7: memref<64x128xbf16, #tpu.memory_space<vmem>>, %arg8: memref<1x128xf32, #tpu.memory_space<vmem>>, %arg9: memref<8x64xf32, #tpu.memory_space<vmem>>, %arg10: memref<8x128xf32, #tpu.memory_space<vmem>>, %arg11: memref<8x8x256xf32, #tpu.memory_space<vmem>>) attributes {dimension_semantics = [], scalar_prefetch = 0 : i64, scratch_operands = 1 : i64, tpu.core_type = #tpu.core_type<tc>} {
    %c0 = arith.constant 0 : index
    %c0_0 = arith.constant 0 : index
    %0 = vector.load %arg0[%c0, %c0_0] : memref<64x768xbf16, #tpu.memory_space<vmem>>, vector<64x768xbf16>
    %c0_1 = arith.constant 0 : index
    %c0_2 = arith.constant 0 : index
    %1 = vector.load %arg1[%c0_1, %c0_2] : memref<768x256xbf16, #tpu.memory_space<vmem>>, vector<768x256xbf16>
    %cst = arith.constant dense<0.000000e+00> : vector<64x256xf32>
    %2 = tpu.matmul %0, %1, %cst {dimension_numbers = #tpu.dot_dimension_numbers<[1], [0], [0], [1], [0, 0, 1, 1], [], []>} : vector<64x768xbf16>, vector<768x256xbf16>, vector<64x256xf32> -> vector<64x256xf32>
    %c0_3 = arith.constant 0 : index
    %c0_4 = arith.constant 0 : index
    %3 = vector.load %arg3[%c0_3, %c0_4] : memref<1x256xf32, #tpu.memory_space<vmem>>, vector<1x256xf32>
    %4 = vector.broadcast %3 : vector<1x256xf32> to vector<64x256xf32>
    %5 = arith.addf %2, %4 : vector<64x256xf32>
    %6 = vector.shape_cast %5 : vector<64x256xf32> to vector<8x8x256xf32>
    %c0_5 = arith.constant 0 : index
    %c0_6 = arith.constant 0 : index
    %c0_7 = arith.constant 0 : index
    %7 = vector.load %arg11[%c0_5, %c0_6, %c0_7] : memref<8x8x256xf32, #tpu.memory_space<vmem>>, vector<8x8x256xf32>
    tpu.vector_store %arg11[%c0_5, %c0_6, %c0_7], %6 {strides = array<i32>} : memref<8x8x256xf32, #tpu.memory_space<vmem>>, vector<8x8x256xf32>,
    %c0_8 = arith.constant 0 : index
    %c0_9 = arith.constant 0 : index
    %8 = vector.load %arg2[%c0_8, %c0_9] : memref<64x256xbf16, #tpu.memory_space<vmem>>, vector<64x256xbf16>
    %cst_10 = arith.constant 0.000000e+00 : f32
    %9 = vector.broadcast %cst_10 : f32 to vector<8x32xf32>
    %cst_11 = arith.constant 0.000000e+00 : f32
    %10 = vector.broadcast %cst_11 : f32 to vector<8x32xf32>
    %c0_12 = arith.constant 0 : index
    %c0_13 = arith.constant 0 : index
    %c0_14 = arith.constant 0 : index
    %11 = vector.load %arg11[%c0_12, %c0_13, %c0_14] : memref<8x8x256xf32, #tpu.memory_space<vmem>>, vector<1x8x128xf32>
    %12 = vector.shape_cast %11 : vector<1x8x128xf32> to vector<8x128xf32>
    %c7 = arith.constant 7 : index
    %c0_15 = arith.constant 0 : index
    %c128 = arith.constant 128 : index
    %13 = vector.load %arg11[%c7, %c0_15, %c128] : memref<8x8x256xf32, #tpu.memory_space<vmem>>, vector<1x8x128xf32>
    %14 = vector.shape_cast %13 : vector<1x8x128xf32> to vector<8x128xf32>
    %15 = vector.extract_strided_slice %12 {offsets = [0, 0], sizes = [8, 96], strides = [1, 1]} : vector<8x128xf32> to vector<8x96xf32>
    %16 = arith.negf %15 : vector<8x96xf32>
    %17 = math.exp %16 : vector<8x96xf32>
    %cst_16 = arith.constant 1.000000e+00 : f32
    %18 = vector.broadcast %cst_16 : f32 to vector<8x96xf32>
    %19 = arith.addf %18, %17 : vector<8x96xf32>
    %20 = arith.divf %18, %19 : vector<8x96xf32>
    %21 = vector.extract_strided_slice %12 {offsets = [0, 96], sizes = [8, 32], strides = [1, 1]} : vector<8x128xf32> to vector<8x32xf32>
    %22 = math.tanh %21 : vector<8x32xf32>
    %23 = vector.extract_strided_slice %20 {offsets = [0, 0], sizes = [8, 32], strides = [1, 1]} : vector<8x96xf32> to vector<8x32xf32>
    %24 = vector.extract_strided_slice %20 {offsets = [0, 32], sizes = [8, 32], strides = [1, 1]} : vector<8x96xf32> to vector<8x32xf32>
    %25 = vector.extract_strided_slice %20 {offsets = [0, 64], sizes = [8, 32], strides = [1, 1]} : vector<8x96xf32> to vector<8x32xf32>
    %26 = arith.mulf %24, %9 : vector<8x32xf32>
    %27 = arith.mulf %23, %22 : vector<8x32xf32>
    %28 = arith.addf %26, %27 : vector<8x32xf32>
    %29 = math.tanh %28 : vector<8x32xf32>
    %30 = arith.mulf %25, %29 : vector<8x32xf32>
    %31 = vector.extract_strided_slice %14 {offsets = [0, 0], sizes = [8, 96], strides = [1, 1]} : vector<8x128xf32> to vector<8x96xf32>
    %32 = arith.negf %31 : vector<8x96xf32>
    %33 = math.exp %32 : vector<8x96xf32>
    %cst_17 = arith.constant 1.000000e+00 : f32
    %34 = vector.broadcast %cst_17 : f32 to vector<8x96xf32>
    %35 = arith.addf %34, %33 : vector<8x96xf32>
    %36 = arith.divf %34, %35 : vector<8x96xf32>
    %37 = vector.extract_strided_slice %14 {offsets = [0, 96], sizes = [8, 32], strides = [1, 1]} : vector<8x128xf32> to vector<8x32xf32>
    %38 = math.tanh %37 : vector<8x32xf32>
    %39 = vector.extract_strided_slice %36 {offsets = [0, 0], sizes = [8, 32], strides = [1, 1]} : vector<8x96xf32> to vector<8x32xf32>
    %40 = vector.extract_strided_slice %36 {offsets = [0, 32], sizes = [8, 32], strides = [1, 1]} : vector<8x96xf32> to vector<8x32xf32>
    %41 = vector.extract_strided_slice %36 {offsets = [0, 64], sizes = [8, 32], strides = [1, 1]} : vector<8x96xf32> to vector<8x32xf32>
    %42 = arith.mulf %40, %10 : vector<8x32xf32>
    %43 = arith.mulf %39, %38 : vector<8x32xf32>
    %44 = arith.addf %42, %43 : vector<8x32xf32>
    %45 = math.tanh %44 : vector<8x32xf32>
    %46 = arith.mulf %41, %45 : vector<8x32xf32>
    %c1 = arith.constant 1 : index
    %c0_18 = arith.constant 0 : index
    %c0_19 = arith.constant 0 : index
    %47 = vector.load %arg11[%c1, %c0_18, %c0_19] : memref<8x8x256xf32, #tpu.memory_space<vmem>>, vector<1x8x128xf32>
    %48 = vector.shape_cast %47 : vector<1x8x128xf32> to vector<8x128xf32>
    %c6 = arith.constant 6 : index
    %c0_20 = arith.constant 0 : index
    %c128_21 = arith.constant 128 : index
    %49 = vector.load %arg11[%c6, %c0_20, %c128_21] : memref<8x8x256xf32, #tpu.memory_space<vmem>>, vector<1x8x128xf32>
    %50 = vector.shape_cast %49 : vector<1x8x128xf32> to vector<8x128xf32>
    %51 = tpu.concatenate %30, %46 in 1 : vector<8x32xf32>, vector<8x32xf32> -> vector<8x64xf32>
    %52 = arith.truncf %51 : vector<8x64xf32> to vector<8x64xbf16>
    %cst_22 = arith.constant dense<0.000000e+00> : vector<8x256xf32>
    %53 = tpu.matmul %52, %8, %cst_22 {dimension_numbers = #tpu.dot_dimension_numbers<[1], [0], [0], [1], [0, 0, 1, 1], [], []>} : vector<8x64xbf16>, vector<64x256xbf16>, vector<8x256xf32> -> vector<8x256xf32>
    %54 = vector.extract_strided_slice %53 {offsets = [0, 0], sizes = [8, 128], strides = [1, 1]} : vector<8x256xf32> to vector<8x128xf32>
    %55 = arith.addf %48, %54 : vector<8x128xf32>
    %56 = vector.extract_strided_slice %53 {offsets = [0, 128], sizes = [8, 128], strides = [1, 1]} : vector<8x256xf32> to vector<8x128xf32>
    %57 = arith.addf %50, %56 : vector<8x128xf32>
    %58 = vector.extract_strided_slice %55 {offsets = [0, 0], sizes = [8, 96], strides = [1, 1]} : vector<8x128xf32> to vector<8x96xf32>
    %59 = arith.negf %58 : vector<8x96xf32>
    %60 = math.exp %59 : vector<8x96xf32>
    %cst_23 = arith.constant 1.000000e+00 : f32
    %61 = vector.broadcast %cst_23 : f32 to vector<8x96xf32>
    %62 = arith.addf %61, %60 : vector<8x96xf32>
    %63 = arith.divf %61, %62 : vector<8x96xf32>
    %64 = vector.extract_strided_slice %55 {offsets = [0, 96], sizes = [8, 32], strides = [1, 1]} : vector<8x128xf32> to vector<8x32xf32>
    %65 = math.tanh %64 : vector<8x32xf32>
    %66 = vector.extract_strided_slice %63 {offsets = [0, 0], sizes = [8, 32], strides = [1, 1]} : vector<8x96xf32> to vector<8x32xf32>
    %67 = vector.extract_strided_slice %63 {offsets = [0, 32], sizes = [8, 32], strides = [1, 1]} : vector<8x96xf32> to vector<8x32xf32>
    %68 = vector.extract_strided_slice %63 {offsets = [0, 64], sizes = [8, 32], strides = [1, 1]} : vector<8x96xf32> to vector<8x32xf32>
    %69 = arith.mulf %67, %28 : vector<8x32xf32>
    %70 = arith.mulf %66, %65 : vector<8x32xf32>
    %71 = arith.addf %69, %70 : vector<8x32xf32>
    %72 = math.tanh %71 : vector<8x32xf32>
    %73 = arith.mulf %68, %72 : vector<8x32xf32>
    %74 = vector.extract_strided_slice %57 {offsets = [0, 0], sizes = [8, 96], strides = [1, 1]} : vector<8x128xf32> to vector<8x96xf32>
    %75 = arith.negf %74 : vector<8x96xf32>
    %76 = math.exp %75 : vector<8x96xf32>
    %cst_24 = arith.constant 1.000000e+00 : f32
    %77 = vector.broadcast %cst_24 : f32 to vector<8x96xf32>
    %78 = arith.addf %77, %76 : vector<8x96xf32>
    %79 = arith.divf %77, %78 : vector<8x96xf32>
    %80 = vector.extract_strided_slice %57 {offsets = [0, 96], sizes = [8, 32], strides = [1, 1]} : vector<8x128xf32> to vector<8x32xf32>
    %81 = math.tanh %80 : vector<8x32xf32>
    %82 = vector.extract_strided_slice %79 {offsets = [0, 0], sizes = [8, 32], strides = [1, 1]} : vector<8x96xf32> to vector<8x32xf32>
    %83 = vector.extract_strided_slice %79 {offsets = [0, 32], sizes = [8, 32], strides = [1, 1]} : vector<8x96xf32> to vector<8x32xf32>
    %84 = vector.extract_strided_slice %79 {offsets = [0, 64], sizes = [8, 32], strides = [1, 1]} : vector<8x96xf32> to vector<8x32xf32>
    %85 = arith.mulf %83, %44 : vector<8x32xf32>
    %86 = arith.mulf %82, %81 : vector<8x32xf32>
    %87 = arith.addf %85, %86 : vector<8x32xf32>
    %88 = math.tanh %87 : vector<8x32xf32>
    %89 = arith.mulf %84, %88 : vector<8x32xf32>
    %c2 = arith.constant 2 : index
    %c0_25 = arith.constant 0 : index
    %c0_26 = arith.constant 0 : index
    %90 = vector.load %arg11[%c2, %c0_25, %c0_26] : memref<8x8x256xf32, #tpu.memory_space<vmem>>, vector<1x8x128xf32>
    %91 = vector.shape_cast %90 : vector<1x8x128xf32> to vector<8x128xf32>
    %c5 = arith.constant 5 : index
    %c0_27 = arith.constant 0 : index
    %c128_28 = arith.constant 128 : index
    %92 = vector.load %arg11[%c5, %c0_27, %c128_28] : memref<8x8x256xf32, #tpu.memory_space<vmem>>, vector<1x8x128xf32>
    %93 = vector.shape_cast %92 : vector<1x8x128xf32> to vector<8x128xf32>
    %94 = tpu.concatenate %73, %89 in 1 : vector<8x32xf32>, vector<8x32xf32> -> vector<8x64xf32>
    %95 = arith.truncf %94 : vector<8x64xf32> to vector<8x64xbf16>
    %cst_29 = arith.constant dense<0.000000e+00> : vector<8x256xf32>
    %96 = tpu.matmul %95, %8, %cst_29 {dimension_numbers = #tpu.dot_dimension_numbers<[1], [0], [0], [1], [0, 0, 1, 1], [], []>} : vector<8x64xbf16>, vector<64x256xbf16>, vector<8x256xf32> -> vector<8x256xf32>
    %97 = vector.extract_strided_slice %96 {offsets = [0, 0], sizes = [8, 128], strides = [1, 1]} : vector<8x256xf32> to vector<8x128xf32>
    %98 = arith.addf %91, %97 : vector<8x128xf32>
    %99 = vector.extract_strided_slice %96 {offsets = [0, 128], sizes = [8, 128], strides = [1, 1]} : vector<8x256xf32> to vector<8x128xf32>
    %100 = arith.addf %93, %99 : vector<8x128xf32>
    %101 = vector.extract_strided_slice %98 {offsets = [0, 0], sizes = [8, 96], strides = [1, 1]} : vector<8x128xf32> to vector<8x96xf32>
    %102 = arith.negf %101 : vector<8x96xf32>
    %103 = math.exp %102 : vector<8x96xf32>
    %cst_30 = arith.constant 1.000000e+00 : f32
    %104 = vector.broadcast %cst_30 : f32 to vector<8x96xf32>
    %105 = arith.addf %104, %103 : vector<8x96xf32>
    %106 = arith.divf %104, %105 : vector<8x96xf32>
    %107 = vector.extract_strided_slice %98 {offsets = [0, 96], sizes = [8, 32], strides = [1, 1]} : vector<8x128xf32> to vector<8x32xf32>
    %108 = math.tanh %107 : vector<8x32xf32>
    %109 = vector.extract_strided_slice %106 {offsets = [0, 0], sizes = [8, 32], strides = [1, 1]} : vector<8x96xf32> to vector<8x32xf32>
    %110 = vector.extract_strided_slice %106 {offsets = [0, 32], sizes = [8, 32], strides = [1, 1]} : vector<8x96xf32> to vector<8x32xf32>
    %111 = vector.extract_strided_slice %106 {offsets = [0, 64], sizes = [8, 32], strides = [1, 1]} : vector<8x96xf32> to vector<8x32xf32>
    %112 = arith.mulf %110, %71 : vector<8x32xf32>
    %113 = arith.mulf %109, %108 : vector<8x32xf32>
    %114 = arith.addf %112, %113 : vector<8x32xf32>
    %115 = math.tanh %114 : vector<8x32xf32>
    %116 = arith.mulf %111, %115 : vector<8x32xf32>
    %117 = vector.extract_strided_slice %100 {offsets = [0, 0], sizes = [8, 96], strides = [1, 1]} : vector<8x128xf32> to vector<8x96xf32>
    %118 = arith.negf %117 : vector<8x96xf32>
    %119 = math.exp %118 : vector<8x96xf32>
    %cst_31 = arith.constant 1.000000e+00 : f32
    %120 = vector.broadcast %cst_31 : f32 to vector<8x96xf32>
    %121 = arith.addf %120, %119 : vector<8x96xf32>
    %122 = arith.divf %120, %121 : vector<8x96xf32>
    %123 = vector.extract_strided_slice %100 {offsets = [0, 96], sizes = [8, 32], strides = [1, 1]} : vector<8x128xf32> to vector<8x32xf32>
    %124 = math.tanh %123 : vector<8x32xf32>
    %125 = vector.extract_strided_slice %122 {offsets = [0, 0], sizes = [8, 32], strides = [1, 1]} : vector<8x96xf32> to vector<8x32xf32>
    %126 = vector.extract_strided_slice %122 {offsets = [0, 32], sizes = [8, 32], strides = [1, 1]} : vector<8x96xf32> to vector<8x32xf32>
    %127 = vector.extract_strided_slice %122 {offsets = [0, 64], sizes = [8, 32], strides = [1, 1]} : vector<8x96xf32> to vector<8x32xf32>
    %128 = arith.mulf %126, %87 : vector<8x32xf32>
    %129 = arith.mulf %125, %124 : vector<8x32xf32>
    %130 = arith.addf %128, %129 : vector<8x32xf32>
    %131 = math.tanh %130 : vector<8x32xf32>
    %132 = arith.mulf %127, %131 : vector<8x32xf32>
    %c3 = arith.constant 3 : index
    %c0_32 = arith.constant 0 : index
    %c0_33 = arith.constant 0 : index
    %133 = vector.load %arg11[%c3, %c0_32, %c0_33] : memref<8x8x256xf32, #tpu.memory_space<vmem>>, vector<1x8x128xf32>
    %134 = vector.shape_cast %133 : vector<1x8x128xf32> to vector<8x128xf32>
    %c4 = arith.constant 4 : index
    %c0_34 = arith.constant 0 : index
    %c128_35 = arith.constant 128 : index
    %135 = vector.load %arg11[%c4, %c0_34, %c128_35] : memref<8x8x256xf32, #tpu.memory_space<vmem>>, vector<1x8x128xf32>
    %136 = vector.shape_cast %135 : vector<1x8x128xf32> to vector<8x128xf32>
    %137 = tpu.concatenate %116, %132 in 1 : vector<8x32xf32>, vector<8x32xf32> -> vector<8x64xf32>
    %138 = arith.truncf %137 : vector<8x64xf32> to vector<8x64xbf16>
    %cst_36 = arith.constant dense<0.000000e+00> : vector<8x256xf32>
    %139 = tpu.matmul %138, %8, %cst_36 {dimension_numbers = #tpu.dot_dimension_numbers<[1], [0], [0], [1], [0, 0, 1, 1], [], []>} : vector<8x64xbf16>, vector<64x256xbf16>, vector<8x256xf32> -> vector<8x256xf32>
    %140 = vector.extract_strided_slice %139 {offsets = [0, 0], sizes = [8, 128], strides = [1, 1]} : vector<8x256xf32> to vector<8x128xf32>
    %141 = arith.addf %134, %140 : vector<8x128xf32>
    %142 = vector.extract_strided_slice %139 {offsets = [0, 128], sizes = [8, 128], strides = [1, 1]} : vector<8x256xf32> to vector<8x128xf32>
    %143 = arith.addf %136, %142 : vector<8x128xf32>
    %144 = vector.extract_strided_slice %141 {offsets = [0, 0], sizes = [8, 96], strides = [1, 1]} : vector<8x128xf32> to vector<8x96xf32>
    %145 = arith.negf %144 : vector<8x96xf32>
    %146 = math.exp %145 : vector<8x96xf32>
    %cst_37 = arith.constant 1.000000e+00 : f32
    %147 = vector.broadcast %cst_37 : f32 to vector<8x96xf32>
    %148 = arith.addf %147, %146 : vector<8x96xf32>
    %149 = arith.divf %147, %148 : vector<8x96xf32>
    %150 = vector.extract_strided_slice %141 {offsets = [0, 96], sizes = [8, 32], strides = [1, 1]} : vector<8x128xf32> to vector<8x32xf32>
    %151 = math.tanh %150 : vector<8x32xf32>
    %152 = vector.extract_strided_slice %149 {offsets = [0, 0], sizes = [8, 32], strides = [1, 1]} : vector<8x96xf32> to vector<8x32xf32>
    %153 = vector.extract_strided_slice %149 {offsets = [0, 32], sizes = [8, 32], strides = [1, 1]} : vector<8x96xf32> to vector<8x32xf32>
    %154 = vector.extract_strided_slice %149 {offsets = [0, 64], sizes = [8, 32], strides = [1, 1]} : vector<8x96xf32> to vector<8x32xf32>
    %155 = arith.mulf %153, %114 : vector<8x32xf32>
    %156 = arith.mulf %152, %151 : vector<8x32xf32>
    %157 = arith.addf %155, %156 : vector<8x32xf32>
    %158 = math.tanh %157 : vector<8x32xf32>
    %159 = arith.mulf %154, %158 : vector<8x32xf32>
    %160 = vector.extract_strided_slice %143 {offsets = [0, 0], sizes = [8, 96], strides = [1, 1]} : vector<8x128xf32> to vector<8x96xf32>
    %161 = arith.negf %160 : vector<8x96xf32>
    %162 = math.exp %161 : vector<8x96xf32>
    %cst_38 = arith.constant 1.000000e+00 : f32
    %163 = vector.broadcast %cst_38 : f32 to vector<8x96xf32>
    %164 = arith.addf %163, %162 : vector<8x96xf32>
    %165 = arith.divf %163, %164 : vector<8x96xf32>
    %166 = vector.extract_strided_slice %143 {offsets = [0, 96], sizes = [8, 32], strides = [1, 1]} : vector<8x128xf32> to vector<8x32xf32>
    %167 = math.tanh %166 : vector<8x32xf32>
    %168 = vector.extract_strided_slice %165 {offsets = [0, 0], sizes = [8, 32], strides = [1, 1]} : vector<8x96xf32> to vector<8x32xf32>
    %169 = vector.extract_strided_slice %165 {offsets = [0, 32], sizes = [8, 32], strides = [1, 1]} : vector<8x96xf32> to vector<8x32xf32>
    %170 = vector.extract_strided_slice %165 {offsets = [0, 64], sizes = [8, 32], strides = [1, 1]} : vector<8x96xf32> to vector<8x32xf32>
    %171 = arith.mulf %169, %130 : vector<8x32xf32>
    %172 = arith.mulf %168, %167 : vector<8x32xf32>
    %173 = arith.addf %171, %172 : vector<8x32xf32>
    %174 = math.tanh %173 : vector<8x32xf32>
    %175 = arith.mulf %170, %174 : vector<8x32xf32>
    %c4_39 = arith.constant 4 : index
    %c0_40 = arith.constant 0 : index
    %c0_41 = arith.constant 0 : index
    %176 = vector.load %arg11[%c4_39, %c0_40, %c0_41] : memref<8x8x256xf32, #tpu.memory_space<vmem>>, vector<1x8x128xf32>
    %177 = vector.shape_cast %176 : vector<1x8x128xf32> to vector<8x128xf32>
    %c3_42 = arith.constant 3 : index
    %c0_43 = arith.constant 0 : index
    %c128_44 = arith.constant 128 : index
    %178 = vector.load %arg11[%c3_42, %c0_43, %c128_44] : memref<8x8x256xf32, #tpu.memory_space<vmem>>, vector<1x8x128xf32>
    %179 = vector.shape_cast %178 : vector<1x8x128xf32> to vector<8x128xf32>
    %180 = tpu.concatenate %159, %175 in 1 : vector<8x32xf32>, vector<8x32xf32> -> vector<8x64xf32>
    %181 = arith.truncf %180 : vector<8x64xf32> to vector<8x64xbf16>
    %cst_45 = arith.constant dense<0.000000e+00> : vector<8x256xf32>
    %182 = tpu.matmul %181, %8, %cst_45 {dimension_numbers = #tpu.dot_dimension_numbers<[1], [0], [0], [1], [0, 0, 1, 1], [], []>} : vector<8x64xbf16>, vector<64x256xbf16>, vector<8x256xf32> -> vector<8x256xf32>
    %183 = vector.extract_strided_slice %182 {offsets = [0, 0], sizes = [8, 128], strides = [1, 1]} : vector<8x256xf32> to vector<8x128xf32>
    %184 = arith.addf %177, %183 : vector<8x128xf32>
    %185 = vector.extract_strided_slice %182 {offsets = [0, 128], sizes = [8, 128], strides = [1, 1]} : vector<8x256xf32> to vector<8x128xf32>
    %186 = arith.addf %179, %185 : vector<8x128xf32>
    %187 = vector.extract_strided_slice %184 {offsets = [0, 0], sizes = [8, 96], strides = [1, 1]} : vector<8x128xf32> to vector<8x96xf32>
    %188 = arith.negf %187 : vector<8x96xf32>
    %189 = math.exp %188 : vector<8x96xf32>
    %cst_46 = arith.constant 1.000000e+00 : f32
    %190 = vector.broadcast %cst_46 : f32 to vector<8x96xf32>
    %191 = arith.addf %190, %189 : vector<8x96xf32>
    %192 = arith.divf %190, %191 : vector<8x96xf32>
    %193 = vector.extract_strided_slice %184 {offsets = [0, 96], sizes = [8, 32], strides = [1, 1]} : vector<8x128xf32> to vector<8x32xf32>
    %194 = math.tanh %193 : vector<8x32xf32>
    %195 = vector.extract_strided_slice %192 {offsets = [0, 0], sizes = [8, 32], strides = [1, 1]} : vector<8x96xf32> to vector<8x32xf32>
    %196 = vector.extract_strided_slice %192 {offsets = [0, 32], sizes = [8, 32], strides = [1, 1]} : vector<8x96xf32> to vector<8x32xf32>
    %197 = vector.extract_strided_slice %192 {offsets = [0, 64], sizes = [8, 32], strides = [1, 1]} : vector<8x96xf32> to vector<8x32xf32>
    %198 = arith.mulf %196, %157 : vector<8x32xf32>
    %199 = arith.mulf %195, %194 : vector<8x32xf32>
    %200 = arith.addf %198, %199 : vector<8x32xf32>
    %201 = math.tanh %200 : vector<8x32xf32>
    %202 = arith.mulf %197, %201 : vector<8x32xf32>
    %203 = vector.extract_strided_slice %186 {offsets = [0, 0], sizes = [8, 96], strides = [1, 1]} : vector<8x128xf32> to vector<8x96xf32>
    %204 = arith.negf %203 : vector<8x96xf32>
    %205 = math.exp %204 : vector<8x96xf32>
    %cst_47 = arith.constant 1.000000e+00 : f32
    %206 = vector.broadcast %cst_47 : f32 to vector<8x96xf32>
    %207 = arith.addf %206, %205 : vector<8x96xf32>
    %208 = arith.divf %206, %207 : vector<8x96xf32>
    %209 = vector.extract_strided_slice %186 {offsets = [0, 96], sizes = [8, 32], strides = [1, 1]} : vector<8x128xf32> to vector<8x32xf32>
    %210 = math.tanh %209 : vector<8x32xf32>
    %211 = vector.extract_strided_slice %208 {offsets = [0, 0], sizes = [8, 32], strides = [1, 1]} : vector<8x96xf32> to vector<8x32xf32>
    %212 = vector.extract_strided_slice %208 {offsets = [0, 32], sizes = [8, 32], strides = [1, 1]} : vector<8x96xf32> to vector<8x32xf32>
    %213 = vector.extract_strided_slice %208 {offsets = [0, 64], sizes = [8, 32], strides = [1, 1]} : vector<8x96xf32> to vector<8x32xf32>
    %214 = arith.mulf %212, %173 : vector<8x32xf32>
    %215 = arith.mulf %211, %210 : vector<8x32xf32>
    %216 = arith.addf %214, %215 : vector<8x32xf32>
    %217 = math.tanh %216 : vector<8x32xf32>
    %218 = arith.mulf %213, %217 : vector<8x32xf32>
    %c5_48 = arith.constant 5 : index
    %c0_49 = arith.constant 0 : index
    %c0_50 = arith.constant 0 : index
    %219 = vector.load %arg11[%c5_48, %c0_49, %c0_50] : memref<8x8x256xf32, #tpu.memory_space<vmem>>, vector<1x8x128xf32>
    %220 = vector.shape_cast %219 : vector<1x8x128xf32> to vector<8x128xf32>
    %c2_51 = arith.constant 2 : index
    %c0_52 = arith.constant 0 : index
    %c128_53 = arith.constant 128 : index
    %221 = vector.load %arg11[%c2_51, %c0_52, %c128_53] : memref<8x8x256xf32, #tpu.memory_space<vmem>>, vector<1x8x128xf32>
    %222 = vector.shape_cast %221 : vector<1x8x128xf32> to vector<8x128xf32>
    %223 = tpu.concatenate %202, %218 in 1 : vector<8x32xf32>, vector<8x32xf32> -> vector<8x64xf32>
    %224 = arith.truncf %223 : vector<8x64xf32> to vector<8x64xbf16>
    %cst_54 = arith.constant dense<0.000000e+00> : vector<8x256xf32>
    %225 = tpu.matmul %224, %8, %cst_54 {dimension_numbers = #tpu.dot_dimension_numbers<[1], [0], [0], [1], [0, 0, 1, 1], [], []>} : vector<8x64xbf16>, vector<64x256xbf16>, vector<8x256xf32> -> vector<8x256xf32>
    %226 = vector.extract_strided_slice %225 {offsets = [0, 0], sizes = [8, 128], strides = [1, 1]} : vector<8x256xf32> to vector<8x128xf32>
    %227 = arith.addf %220, %226 : vector<8x128xf32>
    %228 = vector.extract_strided_slice %225 {offsets = [0, 128], sizes = [8, 128], strides = [1, 1]} : vector<8x256xf32> to vector<8x128xf32>
    %229 = arith.addf %222, %228 : vector<8x128xf32>
    %230 = vector.extract_strided_slice %227 {offsets = [0, 0], sizes = [8, 96], strides = [1, 1]} : vector<8x128xf32> to vector<8x96xf32>
    %231 = arith.negf %230 : vector<8x96xf32>
    %232 = math.exp %231 : vector<8x96xf32>
    %cst_55 = arith.constant 1.000000e+00 : f32
    %233 = vector.broadcast %cst_55 : f32 to vector<8x96xf32>
    %234 = arith.addf %233, %232 : vector<8x96xf32>
    %235 = arith.divf %233, %234 : vector<8x96xf32>
    %236 = vector.extract_strided_slice %227 {offsets = [0, 96], sizes = [8, 32], strides = [1, 1]} : vector<8x128xf32> to vector<8x32xf32>
    %237 = math.tanh %236 : vector<8x32xf32>
    %238 = vector.extract_strided_slice %235 {offsets = [0, 0], sizes = [8, 32], strides = [1, 1]} : vector<8x96xf32> to vector<8x32xf32>
    %239 = vector.extract_strided_slice %235 {offsets = [0, 32], sizes = [8, 32], strides = [1, 1]} : vector<8x96xf32> to vector<8x32xf32>
    %240 = vector.extract_strided_slice %235 {offsets = [0, 64], sizes = [8, 32], strides = [1, 1]} : vector<8x96xf32> to vector<8x32xf32>
    %241 = arith.mulf %239, %200 : vector<8x32xf32>
    %242 = arith.mulf %238, %237 : vector<8x32xf32>
    %243 = arith.addf %241, %242 : vector<8x32xf32>
    %244 = math.tanh %243 : vector<8x32xf32>
    %245 = arith.mulf %240, %244 : vector<8x32xf32>
    %246 = vector.extract_strided_slice %229 {offsets = [0, 0], sizes = [8, 96], strides = [1, 1]} : vector<8x128xf32> to vector<8x96xf32>
    %247 = arith.negf %246 : vector<8x96xf32>
    %248 = math.exp %247 : vector<8x96xf32>
    %cst_56 = arith.constant 1.000000e+00 : f32
    %249 = vector.broadcast %cst_56 : f32 to vector<8x96xf32>
    %250 = arith.addf %249, %248 : vector<8x96xf32>
    %251 = arith.divf %249, %250 : vector<8x96xf32>
    %252 = vector.extract_strided_slice %229 {offsets = [0, 96], sizes = [8, 32], strides = [1, 1]} : vector<8x128xf32> to vector<8x32xf32>
    %253 = math.tanh %252 : vector<8x32xf32>
    %254 = vector.extract_strided_slice %251 {offsets = [0, 0], sizes = [8, 32], strides = [1, 1]} : vector<8x96xf32> to vector<8x32xf32>
    %255 = vector.extract_strided_slice %251 {offsets = [0, 32], sizes = [8, 32], strides = [1, 1]} : vector<8x96xf32> to vector<8x32xf32>
    %256 = vector.extract_strided_slice %251 {offsets = [0, 64], sizes = [8, 32], strides = [1, 1]} : vector<8x96xf32> to vector<8x32xf32>
    %257 = arith.mulf %255, %216 : vector<8x32xf32>
    %258 = arith.mulf %254, %253 : vector<8x32xf32>
    %259 = arith.addf %257, %258 : vector<8x32xf32>
    %260 = math.tanh %259 : vector<8x32xf32>
    %261 = arith.mulf %256, %260 : vector<8x32xf32>
    %c6_57 = arith.constant 6 : index
    %c0_58 = arith.constant 0 : index
    %c0_59 = arith.constant 0 : index
    %262 = vector.load %arg11[%c6_57, %c0_58, %c0_59] : memref<8x8x256xf32, #tpu.memory_space<vmem>>, vector<1x8x128xf32>
    %263 = vector.shape_cast %262 : vector<1x8x128xf32> to vector<8x128xf32>
    %c1_60 = arith.constant 1 : index
    %c0_61 = arith.constant 0 : index
    %c128_62 = arith.constant 128 : index
    %264 = vector.load %arg11[%c1_60, %c0_61, %c128_62] : memref<8x8x256xf32, #tpu.memory_space<vmem>>, vector<1x8x128xf32>
    %265 = vector.shape_cast %264 : vector<1x8x128xf32> to vector<8x128xf32>
    %266 = tpu.concatenate %245, %261 in 1 : vector<8x32xf32>, vector<8x32xf32> -> vector<8x64xf32>
    %267 = arith.truncf %266 : vector<8x64xf32> to vector<8x64xbf16>
    %cst_63 = arith.constant dense<0.000000e+00> : vector<8x256xf32>
    %268 = tpu.matmul %267, %8, %cst_63 {dimension_numbers = #tpu.dot_dimension_numbers<[1], [0], [0], [1], [0, 0, 1, 1], [], []>} : vector<8x64xbf16>, vector<64x256xbf16>, vector<8x256xf32> -> vector<8x256xf32>
    %269 = vector.extract_strided_slice %268 {offsets = [0, 0], sizes = [8, 128], strides = [1, 1]} : vector<8x256xf32> to vector<8x128xf32>
    %270 = arith.addf %263, %269 : vector<8x128xf32>
    %271 = vector.extract_strided_slice %268 {offsets = [0, 128], sizes = [8, 128], strides = [1, 1]} : vector<8x256xf32> to vector<8x128xf32>
    %272 = arith.addf %265, %271 : vector<8x128xf32>
    %273 = vector.extract_strided_slice %270 {offsets = [0, 0], sizes = [8, 96], strides = [1, 1]} : vector<8x128xf32> to vector<8x96xf32>
    %274 = arith.negf %273 : vector<8x96xf32>
    %275 = math.exp %274 : vector<8x96xf32>
    %cst_64 = arith.constant 1.000000e+00 : f32
    %276 = vector.broadcast %cst_64 : f32 to vector<8x96xf32>
    %277 = arith.addf %276, %275 : vector<8x96xf32>
    %278 = arith.divf %276, %277 : vector<8x96xf32>
    %279 = vector.extract_strided_slice %270 {offsets = [0, 96], sizes = [8, 32], strides = [1, 1]} : vector<8x128xf32> to vector<8x32xf32>
    %280 = math.tanh %279 : vector<8x32xf32>
    %281 = vector.extract_strided_slice %278 {offsets = [0, 0], sizes = [8, 32], strides = [1, 1]} : vector<8x96xf32> to vector<8x32xf32>
    %282 = vector.extract_strided_slice %278 {offsets = [0, 32], sizes = [8, 32], strides = [1, 1]} : vector<8x96xf32> to vector<8x32xf32>
    %283 = vector.extract_strided_slice %278 {offsets = [0, 64], sizes = [8, 32], strides = [1, 1]} : vector<8x96xf32> to vector<8x32xf32>
    %284 = arith.mulf %282, %243 : vector<8x32xf32>
    %285 = arith.mulf %281, %280 : vector<8x32xf32>
    %286 = arith.addf %284, %285 : vector<8x32xf32>
    %287 = math.tanh %286 : vector<8x32xf32>
    %288 = arith.mulf %283, %287 : vector<8x32xf32>
    %289 = vector.extract_strided_slice %272 {offsets = [0, 0], sizes = [8, 96], strides = [1, 1]} : vector<8x128xf32> to vector<8x96xf32>
    %290 = arith.negf %289 : vector<8x96xf32>
    %291 = math.exp %290 : vector<8x96xf32>
    %cst_65 = arith.constant 1.000000e+00 : f32
    %292 = vector.broadcast %cst_65 : f32 to vector<8x96xf32>
    %293 = arith.addf %292, %291 : vector<8x96xf32>
    %294 = arith.divf %292, %293 : vector<8x96xf32>
    %295 = vector.extract_strided_slice %272 {offsets = [0, 96], sizes = [8, 32], strides = [1, 1]} : vector<8x128xf32> to vector<8x32xf32>
    %296 = math.tanh %295 : vector<8x32xf32>
    %297 = vector.extract_strided_slice %294 {offsets = [0, 0], sizes = [8, 32], strides = [1, 1]} : vector<8x96xf32> to vector<8x32xf32>
    %298 = vector.extract_strided_slice %294 {offsets = [0, 32], sizes = [8, 32], strides = [1, 1]} : vector<8x96xf32> to vector<8x32xf32>
    %299 = vector.extract_strided_slice %294 {offsets = [0, 64], sizes = [8, 32], strides = [1, 1]} : vector<8x96xf32> to vector<8x32xf32>
    %300 = arith.mulf %298, %259 : vector<8x32xf32>
    %301 = arith.mulf %297, %296 : vector<8x32xf32>
    %302 = arith.addf %300, %301 : vector<8x32xf32>
    %303 = math.tanh %302 : vector<8x32xf32>
    %304 = arith.mulf %299, %303 : vector<8x32xf32>
    %c7_66 = arith.constant 7 : index
    %c0_67 = arith.constant 0 : index
    %c0_68 = arith.constant 0 : index
    %305 = vector.load %arg11[%c7_66, %c0_67, %c0_68] : memref<8x8x256xf32, #tpu.memory_space<vmem>>, vector<1x8x128xf32>
    %306 = vector.shape_cast %305 : vector<1x8x128xf32> to vector<8x128xf32>
    %c0_69 = arith.constant 0 : index
    %c0_70 = arith.constant 0 : index
    %c128_71 = arith.constant 128 : index
    %307 = vector.load %arg11[%c0_69, %c0_70, %c128_71] : memref<8x8x256xf32, #tpu.memory_space<vmem>>, vector<1x8x128xf32>
    %308 = vector.shape_cast %307 : vector<1x8x128xf32> to vector<8x128xf32>
    %309 = tpu.concatenate %288, %304 in 1 : vector<8x32xf32>, vector<8x32xf32> -> vector<8x64xf32>
    %310 = arith.truncf %309 : vector<8x64xf32> to vector<8x64xbf16>
    %cst_72 = arith.constant dense<0.000000e+00> : vector<8x256xf32>
    %311 = tpu.matmul %310, %8, %cst_72 {dimension_numbers = #tpu.dot_dimension_numbers<[1], [0], [0], [1], [0, 0, 1, 1], [], []>} : vector<8x64xbf16>, vector<64x256xbf16>, vector<8x256xf32> -> vector<8x256xf32>
    %312 = vector.extract_strided_slice %311 {offsets = [0, 0], sizes = [8, 128], strides = [1, 1]} : vector<8x256xf32> to vector<8x128xf32>
    %313 = arith.addf %306, %312 : vector<8x128xf32>
    %314 = vector.extract_strided_slice %311 {offsets = [0, 128], sizes = [8, 128], strides = [1, 1]} : vector<8x256xf32> to vector<8x128xf32>
    %315 = arith.addf %308, %314 : vector<8x128xf32>
    %316 = vector.extract_strided_slice %313 {offsets = [0, 0], sizes = [8, 96], strides = [1, 1]} : vector<8x128xf32> to vector<8x96xf32>
    %317 = arith.negf %316 : vector<8x96xf32>
    %318 = math.exp %317 : vector<8x96xf32>
    %cst_73 = arith.constant 1.000000e+00 : f32
    %319 = vector.broadcast %cst_73 : f32 to vector<8x96xf32>
    %320 = arith.addf %319, %318 : vector<8x96xf32>
    %321 = arith.divf %319, %320 : vector<8x96xf32>
    %322 = vector.extract_strided_slice %313 {offsets = [0, 96], sizes = [8, 32], strides = [1, 1]} : vector<8x128xf32> to vector<8x32xf32>
    %323 = math.tanh %322 : vector<8x32xf32>
    %324 = vector.extract_strided_slice %321 {offsets = [0, 0], sizes = [8, 32], strides = [1, 1]} : vector<8x96xf32> to vector<8x32xf32>
    %325 = vector.extract_strided_slice %321 {offsets = [0, 32], sizes = [8, 32], strides = [1, 1]} : vector<8x96xf32> to vector<8x32xf32>
    %326 = vector.extract_strided_slice %321 {offsets = [0, 64], sizes = [8, 32], strides = [1, 1]} : vector<8x96xf32> to vector<8x32xf32>
    %327 = arith.mulf %325, %286 : vector<8x32xf32>
    %328 = arith.mulf %324, %323 : vector<8x32xf32>
    %329 = arith.addf %327, %328 : vector<8x32xf32>
    %330 = math.tanh %329 : vector<8x32xf32>
    %331 = arith.mulf %326, %330 : vector<8x32xf32>
    %332 = vector.extract_strided_slice %315 {offsets = [0, 0], sizes = [8, 96], strides = [1, 1]} : vector<8x128xf32> to vector<8x96xf32>
    %333 = arith.negf %332 : vector<8x96xf32>
    %334 = math.exp %333 : vector<8x96xf32>
    %cst_74 = arith.constant 1.000000e+00 : f32
    %335 = vector.broadcast %cst_74 : f32 to vector<8x96xf32>
    %336 = arith.addf %335, %334 : vector<8x96xf32>
    %337 = arith.divf %335, %336 : vector<8x96xf32>
    %338 = vector.extract_strided_slice %315 {offsets = [0, 96], sizes = [8, 32], strides = [1, 1]} : vector<8x128xf32> to vector<8x32xf32>
    %339 = math.tanh %338 : vector<8x32xf32>
    %340 = vector.extract_strided_slice %337 {offsets = [0, 0], sizes = [8, 32], strides = [1, 1]} : vector<8x96xf32> to vector<8x32xf32>
    %341 = vector.extract_strided_slice %337 {offsets = [0, 32], sizes = [8, 32], strides = [1, 1]} : vector<8x96xf32> to vector<8x32xf32>
    %342 = vector.extract_strided_slice %337 {offsets = [0, 64], sizes = [8, 32], strides = [1, 1]} : vector<8x96xf32> to vector<8x32xf32>
    %343 = arith.mulf %341, %302 : vector<8x32xf32>
    %344 = arith.mulf %340, %339 : vector<8x32xf32>
    %345 = arith.addf %343, %344 : vector<8x32xf32>
    %346 = math.tanh %345 : vector<8x32xf32>
    %347 = arith.mulf %342, %346 : vector<8x32xf32>
    %348 = tpu.concatenate %30, %73, %116, %159, %202, %245, %288, %331 in 0 : vector<8x32xf32>, vector<8x32xf32>, vector<8x32xf32>, vector<8x32xf32>, vector<8x32xf32>, vector<8x32xf32>, vector<8x32xf32>, vector<8x32xf32> -> vector<64x32xf32>
    %349 = tpu.concatenate %347, %304, %261, %218, %175, %132, %89, %46 in 0 : vector<8x32xf32>, vector<8x32xf32>, vector<8x32xf32>, vector<8x32xf32>, vector<8x32xf32>, vector<8x32xf32>, vector<8x32xf32>, vector<8x32xf32> -> vector<64x32xf32>
    %350 = tpu.concatenate %348, %349 in 1 : vector<64x32xf32>, vector<64x32xf32> -> vector<64x64xf32>
    %351 = arith.truncf %350 : vector<64x64xf32> to vector<64x64xbf16>
    %c0_75 = arith.constant 0 : index
    %c0_76 = arith.constant 0 : index
    %352 = vector.load %arg4[%c0_75, %c0_76] : memref<64x256xbf16, #tpu.memory_space<vmem>>, vector<64x256xbf16>
    %cst_77 = arith.constant dense<0.000000e+00> : vector<64x256xf32>
    %353 = tpu.matmul %351, %352, %cst_77 {dimension_numbers = #tpu.dot_dimension_numbers<[1], [0], [0], [1], [0, 0, 1, 1], [], []>} : vector<64x64xbf16>, vector<64x256xbf16>, vector<64x256xf32> -> vector<64x256xf32>
    %c0_78 = arith.constant 0 : index
    %c0_79 = arith.constant 0 : index
    %354 = vector.load %arg6[%c0_78, %c0_79] : memref<1x256xf32, #tpu.memory_space<vmem>>, vector<1x256xf32>
    %355 = vector.broadcast %354 : vector<1x256xf32> to vector<64x256xf32>
    %356 = arith.addf %353, %355 : vector<64x256xf32>
    %357 = vector.shape_cast %356 : vector<64x256xf32> to vector<8x8x256xf32>
    %c0_80 = arith.constant 0 : index
    %c0_81 = arith.constant 0 : index
    %c0_82 = arith.constant 0 : index
    %358 = vector.load %arg11[%c0_80, %c0_81, %c0_82] : memref<8x8x256xf32, #tpu.memory_space<vmem>>, vector<8x8x256xf32>
    tpu.vector_store %arg11[%c0_80, %c0_81, %c0_82], %357 {strides = array<i32>} : memref<8x8x256xf32, #tpu.memory_space<vmem>>, vector<8x8x256xf32>,
    %c0_83 = arith.constant 0 : index
    %c0_84 = arith.constant 0 : index
    %359 = vector.load %arg5[%c0_83, %c0_84] : memref<64x256xbf16, #tpu.memory_space<vmem>>, vector<64x256xbf16>
    %cst_85 = arith.constant 0.000000e+00 : f32
    %360 = vector.broadcast %cst_85 : f32 to vector<8x32xf32>
    %cst_86 = arith.constant 0.000000e+00 : f32
    %361 = vector.broadcast %cst_86 : f32 to vector<8x32xf32>
    %c0_87 = arith.constant 0 : index
    %c0_88 = arith.constant 0 : index
    %c0_89 = arith.constant 0 : index
    %362 = vector.load %arg11[%c0_87, %c0_88, %c0_89] : memref<8x8x256xf32, #tpu.memory_space<vmem>>, vector<1x8x128xf32>
    %363 = vector.shape_cast %362 : vector<1x8x128xf32> to vector<8x128xf32>
    %c7_90 = arith.constant 7 : index
    %c0_91 = arith.constant 0 : index
    %c128_92 = arith.constant 128 : index
    %364 = vector.load %arg11[%c7_90, %c0_91, %c128_92] : memref<8x8x256xf32, #tpu.memory_space<vmem>>, vector<1x8x128xf32>
    %365 = vector.shape_cast %364 : vector<1x8x128xf32> to vector<8x128xf32>
    %366 = vector.extract_strided_slice %363 {offsets = [0, 0], sizes = [8, 96], strides = [1, 1]} : vector<8x128xf32> to vector<8x96xf32>
    %367 = arith.negf %366 : vector<8x96xf32>
    %368 = math.exp %367 : vector<8x96xf32>
    %cst_93 = arith.constant 1.000000e+00 : f32
    %369 = vector.broadcast %cst_93 : f32 to vector<8x96xf32>
    %370 = arith.addf %369, %368 : vector<8x96xf32>
    %371 = arith.divf %369, %370 : vector<8x96xf32>
    %372 = vector.extract_strided_slice %363 {offsets = [0, 96], sizes = [8, 32], strides = [1, 1]} : vector<8x128xf32> to vector<8x32xf32>
    %373 = math.tanh %372 : vector<8x32xf32>
    %374 = vector.extract_strided_slice %371 {offsets = [0, 0], sizes = [8, 32], strides = [1, 1]} : vector<8x96xf32> to vector<8x32xf32>
    %375 = vector.extract_strided_slice %371 {offsets = [0, 32], sizes = [8, 32], strides = [1, 1]} : vector<8x96xf32> to vector<8x32xf32>
    %376 = vector.extract_strided_slice %371 {offsets = [0, 64], sizes = [8, 32], strides = [1, 1]} : vector<8x96xf32> to vector<8x32xf32>
    %377 = arith.mulf %375, %360 : vector<8x32xf32>
    %378 = arith.mulf %374, %373 : vector<8x32xf32>
    %379 = arith.addf %377, %378 : vector<8x32xf32>
    %380 = math.tanh %379 : vector<8x32xf32>
    %381 = arith.mulf %376, %380 : vector<8x32xf32>
    %382 = vector.extract_strided_slice %365 {offsets = [0, 0], sizes = [8, 96], strides = [1, 1]} : vector<8x128xf32> to vector<8x96xf32>
    %383 = arith.negf %382 : vector<8x96xf32>
    %384 = math.exp %383 : vector<8x96xf32>
    %cst_94 = arith.constant 1.000000e+00 : f32
    %385 = vector.broadcast %cst_94 : f32 to vector<8x96xf32>
    %386 = arith.addf %385, %384 : vector<8x96xf32>
    %387 = arith.divf %385, %386 : vector<8x96xf32>
    %388 = vector.extract_strided_slice %365 {offsets = [0, 96], sizes = [8, 32], strides = [1, 1]} : vector<8x128xf32> to vector<8x32xf32>
    %389 = math.tanh %388 : vector<8x32xf32>
    %390 = vector.extract_strided_slice %387 {offsets = [0, 0], sizes = [8, 32], strides = [1, 1]} : vector<8x96xf32> to vector<8x32xf32>
    %391 = vector.extract_strided_slice %387 {offsets = [0, 32], sizes = [8, 32], strides = [1, 1]} : vector<8x96xf32> to vector<8x32xf32>
    %392 = vector.extract_strided_slice %387 {offsets = [0, 64], sizes = [8, 32], strides = [1, 1]} : vector<8x96xf32> to vector<8x32xf32>
    %393 = arith.mulf %391, %361 : vector<8x32xf32>
    %394 = arith.mulf %390, %389 : vector<8x32xf32>
    %395 = arith.addf %393, %394 : vector<8x32xf32>
    %396 = math.tanh %395 : vector<8x32xf32>
    %397 = arith.mulf %392, %396 : vector<8x32xf32>
    %c1_95 = arith.constant 1 : index
    %c0_96 = arith.constant 0 : index
    %c0_97 = arith.constant 0 : index
    %398 = vector.load %arg11[%c1_95, %c0_96, %c0_97] : memref<8x8x256xf32, #tpu.memory_space<vmem>>, vector<1x8x128xf32>
    %399 = vector.shape_cast %398 : vector<1x8x128xf32> to vector<8x128xf32>
    %c6_98 = arith.constant 6 : index
    %c0_99 = arith.constant 0 : index
    %c128_100 = arith.constant 128 : index
    %400 = vector.load %arg11[%c6_98, %c0_99, %c128_100] : memref<8x8x256xf32, #tpu.memory_space<vmem>>, vector<1x8x128xf32>
    %401 = vector.shape_cast %400 : vector<1x8x128xf32> to vector<8x128xf32>
    %402 = tpu.concatenate %381, %397 in 1 : vector<8x32xf32>, vector<8x32xf32> -> vector<8x64xf32>
    %403 = arith.truncf %402 : vector<8x64xf32> to vector<8x64xbf16>
    %cst_101 = arith.constant dense<0.000000e+00> : vector<8x256xf32>
    %404 = tpu.matmul %403, %359, %cst_101 {dimension_numbers = #tpu.dot_dimension_numbers<[1], [0], [0], [1], [0, 0, 1, 1], [], []>} : vector<8x64xbf16>, vector<64x256xbf16>, vector<8x256xf32> -> vector<8x256xf32>
    %405 = vector.extract_strided_slice %404 {offsets = [0, 0], sizes = [8, 128], strides = [1, 1]} : vector<8x256xf32> to vector<8x128xf32>
    %406 = arith.addf %399, %405 : vector<8x128xf32>
    %407 = vector.extract_strided_slice %404 {offsets = [0, 128], sizes = [8, 128], strides = [1, 1]} : vector<8x256xf32> to vector<8x128xf32>
    %408 = arith.addf %401, %407 : vector<8x128xf32>
    %409 = vector.extract_strided_slice %406 {offsets = [0, 0], sizes = [8, 96], strides = [1, 1]} : vector<8x128xf32> to vector<8x96xf32>
    %410 = arith.negf %409 : vector<8x96xf32>
    %411 = math.exp %410 : vector<8x96xf32>
    %cst_102 = arith.constant 1.000000e+00 : f32
    %412 = vector.broadcast %cst_102 : f32 to vector<8x96xf32>
    %413 = arith.addf %412, %411 : vector<8x96xf32>
    %414 = arith.divf %412, %413 : vector<8x96xf32>
    %415 = vector.extract_strided_slice %406 {offsets = [0, 96], sizes = [8, 32], strides = [1, 1]} : vector<8x128xf32> to vector<8x32xf32>
    %416 = math.tanh %415 : vector<8x32xf32>
    %417 = vector.extract_strided_slice %414 {offsets = [0, 0], sizes = [8, 32], strides = [1, 1]} : vector<8x96xf32> to vector<8x32xf32>
    %418 = vector.extract_strided_slice %414 {offsets = [0, 32], sizes = [8, 32], strides = [1, 1]} : vector<8x96xf32> to vector<8x32xf32>
    %419 = vector.extract_strided_slice %414 {offsets = [0, 64], sizes = [8, 32], strides = [1, 1]} : vector<8x96xf32> to vector<8x32xf32>
    %420 = arith.mulf %418, %379 : vector<8x32xf32>
    %421 = arith.mulf %417, %416 : vector<8x32xf32>
    %422 = arith.addf %420, %421 : vector<8x32xf32>
    %423 = math.tanh %422 : vector<8x32xf32>
    %424 = arith.mulf %419, %423 : vector<8x32xf32>
    %425 = vector.extract_strided_slice %408 {offsets = [0, 0], sizes = [8, 96], strides = [1, 1]} : vector<8x128xf32> to vector<8x96xf32>
    %426 = arith.negf %425 : vector<8x96xf32>
    %427 = math.exp %426 : vector<8x96xf32>
    %cst_103 = arith.constant 1.000000e+00 : f32
    %428 = vector.broadcast %cst_103 : f32 to vector<8x96xf32>
    %429 = arith.addf %428, %427 : vector<8x96xf32>
    %430 = arith.divf %428, %429 : vector<8x96xf32>
    %431 = vector.extract_strided_slice %408 {offsets = [0, 96], sizes = [8, 32], strides = [1, 1]} : vector<8x128xf32> to vector<8x32xf32>
    %432 = math.tanh %431 : vector<8x32xf32>
    %433 = vector.extract_strided_slice %430 {offsets = [0, 0], sizes = [8, 32], strides = [1, 1]} : vector<8x96xf32> to vector<8x32xf32>
    %434 = vector.extract_strided_slice %430 {offsets = [0, 32], sizes = [8, 32], strides = [1, 1]} : vector<8x96xf32> to vector<8x32xf32>
    %435 = vector.extract_strided_slice %430 {offsets = [0, 64], sizes = [8, 32], strides = [1, 1]} : vector<8x96xf32> to vector<8x32xf32>
    %436 = arith.mulf %434, %395 : vector<8x32xf32>
    %437 = arith.mulf %433, %432 : vector<8x32xf32>
    %438 = arith.addf %436, %437 : vector<8x32xf32>
    %439 = math.tanh %438 : vector<8x32xf32>
    %440 = arith.mulf %435, %439 : vector<8x32xf32>
    %c2_104 = arith.constant 2 : index
    %c0_105 = arith.constant 0 : index
    %c0_106 = arith.constant 0 : index
    %441 = vector.load %arg11[%c2_104, %c0_105, %c0_106] : memref<8x8x256xf32, #tpu.memory_space<vmem>>, vector<1x8x128xf32>
    %442 = vector.shape_cast %441 : vector<1x8x128xf32> to vector<8x128xf32>
    %c5_107 = arith.constant 5 : index
    %c0_108 = arith.constant 0 : index
    %c128_109 = arith.constant 128 : index
    %443 = vector.load %arg11[%c5_107, %c0_108, %c128_109] : memref<8x8x256xf32, #tpu.memory_space<vmem>>, vector<1x8x128xf32>
    %444 = vector.shape_cast %443 : vector<1x8x128xf32> to vector<8x128xf32>
    %445 = tpu.concatenate %424, %440 in 1 : vector<8x32xf32>, vector<8x32xf32> -> vector<8x64xf32>
    %446 = arith.truncf %445 : vector<8x64xf32> to vector<8x64xbf16>
    %cst_110 = arith.constant dense<0.000000e+00> : vector<8x256xf32>
    %447 = tpu.matmul %446, %359, %cst_110 {dimension_numbers = #tpu.dot_dimension_numbers<[1], [0], [0], [1], [0, 0, 1, 1], [], []>} : vector<8x64xbf16>, vector<64x256xbf16>, vector<8x256xf32> -> vector<8x256xf32>
    %448 = vector.extract_strided_slice %447 {offsets = [0, 0], sizes = [8, 128], strides = [1, 1]} : vector<8x256xf32> to vector<8x128xf32>
    %449 = arith.addf %442, %448 : vector<8x128xf32>
    %450 = vector.extract_strided_slice %447 {offsets = [0, 128], sizes = [8, 128], strides = [1, 1]} : vector<8x256xf32> to vector<8x128xf32>
    %451 = arith.addf %444, %450 : vector<8x128xf32>
    %452 = vector.extract_strided_slice %449 {offsets = [0, 0], sizes = [8, 96], strides = [1, 1]} : vector<8x128xf32> to vector<8x96xf32>
    %453 = arith.negf %452 : vector<8x96xf32>
    %454 = math.exp %453 : vector<8x96xf32>
    %cst_111 = arith.constant 1.000000e+00 : f32
    %455 = vector.broadcast %cst_111 : f32 to vector<8x96xf32>
    %456 = arith.addf %455, %454 : vector<8x96xf32>
    %457 = arith.divf %455, %456 : vector<8x96xf32>
    %458 = vector.extract_strided_slice %449 {offsets = [0, 96], sizes = [8, 32], strides = [1, 1]} : vector<8x128xf32> to vector<8x32xf32>
    %459 = math.tanh %458 : vector<8x32xf32>
    %460 = vector.extract_strided_slice %457 {offsets = [0, 0], sizes = [8, 32], strides = [1, 1]} : vector<8x96xf32> to vector<8x32xf32>
    %461 = vector.extract_strided_slice %457 {offsets = [0, 32], sizes = [8, 32], strides = [1, 1]} : vector<8x96xf32> to vector<8x32xf32>
    %462 = vector.extract_strided_slice %457 {offsets = [0, 64], sizes = [8, 32], strides = [1, 1]} : vector<8x96xf32> to vector<8x32xf32>
    %463 = arith.mulf %461, %422 : vector<8x32xf32>
    %464 = arith.mulf %460, %459 : vector<8x32xf32>
    %465 = arith.addf %463, %464 : vector<8x32xf32>
    %466 = math.tanh %465 : vector<8x32xf32>
    %467 = arith.mulf %462, %466 : vector<8x32xf32>
    %468 = vector.extract_strided_slice %451 {offsets = [0, 0], sizes = [8, 96], strides = [1, 1]} : vector<8x128xf32> to vector<8x96xf32>
    %469 = arith.negf %468 : vector<8x96xf32>
    %470 = math.exp %469 : vector<8x96xf32>
    %cst_112 = arith.constant 1.000000e+00 : f32
    %471 = vector.broadcast %cst_112 : f32 to vector<8x96xf32>
    %472 = arith.addf %471, %470 : vector<8x96xf32>
    %473 = arith.divf %471, %472 : vector<8x96xf32>
    %474 = vector.extract_strided_slice %451 {offsets = [0, 96], sizes = [8, 32], strides = [1, 1]} : vector<8x128xf32> to vector<8x32xf32>
    %475 = math.tanh %474 : vector<8x32xf32>
    %476 = vector.extract_strided_slice %473 {offsets = [0, 0], sizes = [8, 32], strides = [1, 1]} : vector<8x96xf32> to vector<8x32xf32>
    %477 = vector.extract_strided_slice %473 {offsets = [0, 32], sizes = [8, 32], strides = [1, 1]} : vector<8x96xf32> to vector<8x32xf32>
    %478 = vector.extract_strided_slice %473 {offsets = [0, 64], sizes = [8, 32], strides = [1, 1]} : vector<8x96xf32> to vector<8x32xf32>
    %479 = arith.mulf %477, %438 : vector<8x32xf32>
    %480 = arith.mulf %476, %475 : vector<8x32xf32>
    %481 = arith.addf %479, %480 : vector<8x32xf32>
    %482 = math.tanh %481 : vector<8x32xf32>
    %483 = arith.mulf %478, %482 : vector<8x32xf32>
    %c3_113 = arith.constant 3 : index
    %c0_114 = arith.constant 0 : index
    %c0_115 = arith.constant 0 : index
    %484 = vector.load %arg11[%c3_113, %c0_114, %c0_115] : memref<8x8x256xf32, #tpu.memory_space<vmem>>, vector<1x8x128xf32>
    %485 = vector.shape_cast %484 : vector<1x8x128xf32> to vector<8x128xf32>
    %c4_116 = arith.constant 4 : index
    %c0_117 = arith.constant 0 : index
    %c128_118 = arith.constant 128 : index
    %486 = vector.load %arg11[%c4_116, %c0_117, %c128_118] : memref<8x8x256xf32, #tpu.memory_space<vmem>>, vector<1x8x128xf32>
    %487 = vector.shape_cast %486 : vector<1x8x128xf32> to vector<8x128xf32>
    %488 = tpu.concatenate %467, %483 in 1 : vector<8x32xf32>, vector<8x32xf32> -> vector<8x64xf32>
    %489 = arith.truncf %488 : vector<8x64xf32> to vector<8x64xbf16>
    %cst_119 = arith.constant dense<0.000000e+00> : vector<8x256xf32>
    %490 = tpu.matmul %489, %359, %cst_119 {dimension_numbers = #tpu.dot_dimension_numbers<[1], [0], [0], [1], [0, 0, 1, 1], [], []>} : vector<8x64xbf16>, vector<64x256xbf16>, vector<8x256xf32> -> vector<8x256xf32>
    %491 = vector.extract_strided_slice %490 {offsets = [0, 0], sizes = [8, 128], strides = [1, 1]} : vector<8x256xf32> to vector<8x128xf32>
    %492 = arith.addf %485, %491 : vector<8x128xf32>
    %493 = vector.extract_strided_slice %490 {offsets = [0, 128], sizes = [8, 128], strides = [1, 1]} : vector<8x256xf32> to vector<8x128xf32>
    %494 = arith.addf %487, %493 : vector<8x128xf32>
    %495 = vector.extract_strided_slice %492 {offsets = [0, 0], sizes = [8, 96], strides = [1, 1]} : vector<8x128xf32> to vector<8x96xf32>
    %496 = arith.negf %495 : vector<8x96xf32>
    %497 = math.exp %496 : vector<8x96xf32>
    %cst_120 = arith.constant 1.000000e+00 : f32
    %498 = vector.broadcast %cst_120 : f32 to vector<8x96xf32>
    %499 = arith.addf %498, %497 : vector<8x96xf32>
    %500 = arith.divf %498, %499 : vector<8x96xf32>
    %501 = vector.extract_strided_slice %492 {offsets = [0, 96], sizes = [8, 32], strides = [1, 1]} : vector<8x128xf32> to vector<8x32xf32>
    %502 = math.tanh %501 : vector<8x32xf32>
    %503 = vector.extract_strided_slice %500 {offsets = [0, 0], sizes = [8, 32], strides = [1, 1]} : vector<8x96xf32> to vector<8x32xf32>
    %504 = vector.extract_strided_slice %500 {offsets = [0, 32], sizes = [8, 32], strides = [1, 1]} : vector<8x96xf32> to vector<8x32xf32>
    %505 = vector.extract_strided_slice %500 {offsets = [0, 64], sizes = [8, 32], strides = [1, 1]} : vector<8x96xf32> to vector<8x32xf32>
    %506 = arith.mulf %504, %465 : vector<8x32xf32>
    %507 = arith.mulf %503, %502 : vector<8x32xf32>
    %508 = arith.addf %506, %507 : vector<8x32xf32>
    %509 = math.tanh %508 : vector<8x32xf32>
    %510 = arith.mulf %505, %509 : vector<8x32xf32>
    %511 = vector.extract_strided_slice %494 {offsets = [0, 0], sizes = [8, 96], strides = [1, 1]} : vector<8x128xf32> to vector<8x96xf32>
    %512 = arith.negf %511 : vector<8x96xf32>
    %513 = math.exp %512 : vector<8x96xf32>
    %cst_121 = arith.constant 1.000000e+00 : f32
    %514 = vector.broadcast %cst_121 : f32 to vector<8x96xf32>
    %515 = arith.addf %514, %513 : vector<8x96xf32>
    %516 = arith.divf %514, %515 : vector<8x96xf32>
    %517 = vector.extract_strided_slice %494 {offsets = [0, 96], sizes = [8, 32], strides = [1, 1]} : vector<8x128xf32> to vector<8x32xf32>
    %518 = math.tanh %517 : vector<8x32xf32>
    %519 = vector.extract_strided_slice %516 {offsets = [0, 0], sizes = [8, 32], strides = [1, 1]} : vector<8x96xf32> to vector<8x32xf32>
    %520 = vector.extract_strided_slice %516 {offsets = [0, 32], sizes = [8, 32], strides = [1, 1]} : vector<8x96xf32> to vector<8x32xf32>
    %521 = vector.extract_strided_slice %516 {offsets = [0, 64], sizes = [8, 32], strides = [1, 1]} : vector<8x96xf32> to vector<8x32xf32>
    %522 = arith.mulf %520, %481 : vector<8x32xf32>
    %523 = arith.mulf %519, %518 : vector<8x32xf32>
    %524 = arith.addf %522, %523 : vector<8x32xf32>
    %525 = math.tanh %524 : vector<8x32xf32>
    %526 = arith.mulf %521, %525 : vector<8x32xf32>
    %c4_122 = arith.constant 4 : index
    %c0_123 = arith.constant 0 : index
    %c0_124 = arith.constant 0 : index
    %527 = vector.load %arg11[%c4_122, %c0_123, %c0_124] : memref<8x8x256xf32, #tpu.memory_space<vmem>>, vector<1x8x128xf32>
    %528 = vector.shape_cast %527 : vector<1x8x128xf32> to vector<8x128xf32>
    %c3_125 = arith.constant 3 : index
    %c0_126 = arith.constant 0 : index
    %c128_127 = arith.constant 128 : index
    %529 = vector.load %arg11[%c3_125, %c0_126, %c128_127] : memref<8x8x256xf32, #tpu.memory_space<vmem>>, vector<1x8x128xf32>
    %530 = vector.shape_cast %529 : vector<1x8x128xf32> to vector<8x128xf32>
    %531 = tpu.concatenate %510, %526 in 1 : vector<8x32xf32>, vector<8x32xf32> -> vector<8x64xf32>
    %532 = arith.truncf %531 : vector<8x64xf32> to vector<8x64xbf16>
    %cst_128 = arith.constant dense<0.000000e+00> : vector<8x256xf32>
    %533 = tpu.matmul %532, %359, %cst_128 {dimension_numbers = #tpu.dot_dimension_numbers<[1], [0], [0], [1], [0, 0, 1, 1], [], []>} : vector<8x64xbf16>, vector<64x256xbf16>, vector<8x256xf32> -> vector<8x256xf32>
    %534 = vector.extract_strided_slice %533 {offsets = [0, 0], sizes = [8, 128], strides = [1, 1]} : vector<8x256xf32> to vector<8x128xf32>
    %535 = arith.addf %528, %534 : vector<8x128xf32>
    %536 = vector.extract_strided_slice %533 {offsets = [0, 128], sizes = [8, 128], strides = [1, 1]} : vector<8x256xf32> to vector<8x128xf32>
    %537 = arith.addf %530, %536 : vector<8x128xf32>
    %538 = vector.extract_strided_slice %535 {offsets = [0, 0], sizes = [8, 96], strides = [1, 1]} : vector<8x128xf32> to vector<8x96xf32>
    %539 = arith.negf %538 : vector<8x96xf32>
    %540 = math.exp %539 : vector<8x96xf32>
    %cst_129 = arith.constant 1.000000e+00 : f32
    %541 = vector.broadcast %cst_129 : f32 to vector<8x96xf32>
    %542 = arith.addf %541, %540 : vector<8x96xf32>
    %543 = arith.divf %541, %542 : vector<8x96xf32>
    %544 = vector.extract_strided_slice %535 {offsets = [0, 96], sizes = [8, 32], strides = [1, 1]} : vector<8x128xf32> to vector<8x32xf32>
    %545 = math.tanh %544 : vector<8x32xf32>
    %546 = vector.extract_strided_slice %543 {offsets = [0, 0], sizes = [8, 32], strides = [1, 1]} : vector<8x96xf32> to vector<8x32xf32>
    %547 = vector.extract_strided_slice %543 {offsets = [0, 32], sizes = [8, 32], strides = [1, 1]} : vector<8x96xf32> to vector<8x32xf32>
    %548 = vector.extract_strided_slice %543 {offsets = [0, 64], sizes = [8, 32], strides = [1, 1]} : vector<8x96xf32> to vector<8x32xf32>
    %549 = arith.mulf %547, %508 : vector<8x32xf32>
    %550 = arith.mulf %546, %545 : vector<8x32xf32>
    %551 = arith.addf %549, %550 : vector<8x32xf32>
    %552 = math.tanh %551 : vector<8x32xf32>
    %553 = arith.mulf %548, %552 : vector<8x32xf32>
    %554 = vector.extract_strided_slice %537 {offsets = [0, 0], sizes = [8, 96], strides = [1, 1]} : vector<8x128xf32> to vector<8x96xf32>
    %555 = arith.negf %554 : vector<8x96xf32>
    %556 = math.exp %555 : vector<8x96xf32>
    %cst_130 = arith.constant 1.000000e+00 : f32
    %557 = vector.broadcast %cst_130 : f32 to vector<8x96xf32>
    %558 = arith.addf %557, %556 : vector<8x96xf32>
    %559 = arith.divf %557, %558 : vector<8x96xf32>
    %560 = vector.extract_strided_slice %537 {offsets = [0, 96], sizes = [8, 32], strides = [1, 1]} : vector<8x128xf32> to vector<8x32xf32>
    %561 = math.tanh %560 : vector<8x32xf32>
    %562 = vector.extract_strided_slice %559 {offsets = [0, 0], sizes = [8, 32], strides = [1, 1]} : vector<8x96xf32> to vector<8x32xf32>
    %563 = vector.extract_strided_slice %559 {offsets = [0, 32], sizes = [8, 32], strides = [1, 1]} : vector<8x96xf32> to vector<8x32xf32>
    %564 = vector.extract_strided_slice %559 {offsets = [0, 64], sizes = [8, 32], strides = [1, 1]} : vector<8x96xf32> to vector<8x32xf32>
    %565 = arith.mulf %563, %524 : vector<8x32xf32>
    %566 = arith.mulf %562, %561 : vector<8x32xf32>
    %567 = arith.addf %565, %566 : vector<8x32xf32>
    %568 = math.tanh %567 : vector<8x32xf32>
    %569 = arith.mulf %564, %568 : vector<8x32xf32>
    %c5_131 = arith.constant 5 : index
    %c0_132 = arith.constant 0 : index
    %c0_133 = arith.constant 0 : index
    %570 = vector.load %arg11[%c5_131, %c0_132, %c0_133] : memref<8x8x256xf32, #tpu.memory_space<vmem>>, vector<1x8x128xf32>
    %571 = vector.shape_cast %570 : vector<1x8x128xf32> to vector<8x128xf32>
    %c2_134 = arith.constant 2 : index
    %c0_135 = arith.constant 0 : index
    %c128_136 = arith.constant 128 : index
    %572 = vector.load %arg11[%c2_134, %c0_135, %c128_136] : memref<8x8x256xf32, #tpu.memory_space<vmem>>, vector<1x8x128xf32>
    %573 = vector.shape_cast %572 : vector<1x8x128xf32> to vector<8x128xf32>
    %574 = tpu.concatenate %553, %569 in 1 : vector<8x32xf32>, vector<8x32xf32> -> vector<8x64xf32>
    %575 = arith.truncf %574 : vector<8x64xf32> to vector<8x64xbf16>
    %cst_137 = arith.constant dense<0.000000e+00> : vector<8x256xf32>
    %576 = tpu.matmul %575, %359, %cst_137 {dimension_numbers = #tpu.dot_dimension_numbers<[1], [0], [0], [1], [0, 0, 1, 1], [], []>} : vector<8x64xbf16>, vector<64x256xbf16>, vector<8x256xf32> -> vector<8x256xf32>
    %577 = vector.extract_strided_slice %576 {offsets = [0, 0], sizes = [8, 128], strides = [1, 1]} : vector<8x256xf32> to vector<8x128xf32>
    %578 = arith.addf %571, %577 : vector<8x128xf32>
    %579 = vector.extract_strided_slice %576 {offsets = [0, 128], sizes = [8, 128], strides = [1, 1]} : vector<8x256xf32> to vector<8x128xf32>
    %580 = arith.addf %573, %579 : vector<8x128xf32>
    %581 = vector.extract_strided_slice %578 {offsets = [0, 0], sizes = [8, 96], strides = [1, 1]} : vector<8x128xf32> to vector<8x96xf32>
    %582 = arith.negf %581 : vector<8x96xf32>
    %583 = math.exp %582 : vector<8x96xf32>
    %cst_138 = arith.constant 1.000000e+00 : f32
    %584 = vector.broadcast %cst_138 : f32 to vector<8x96xf32>
    %585 = arith.addf %584, %583 : vector<8x96xf32>
    %586 = arith.divf %584, %585 : vector<8x96xf32>
    %587 = vector.extract_strided_slice %578 {offsets = [0, 96], sizes = [8, 32], strides = [1, 1]} : vector<8x128xf32> to vector<8x32xf32>
    %588 = math.tanh %587 : vector<8x32xf32>
    %589 = vector.extract_strided_slice %586 {offsets = [0, 0], sizes = [8, 32], strides = [1, 1]} : vector<8x96xf32> to vector<8x32xf32>
    %590 = vector.extract_strided_slice %586 {offsets = [0, 32], sizes = [8, 32], strides = [1, 1]} : vector<8x96xf32> to vector<8x32xf32>
    %591 = vector.extract_strided_slice %586 {offsets = [0, 64], sizes = [8, 32], strides = [1, 1]} : vector<8x96xf32> to vector<8x32xf32>
    %592 = arith.mulf %590, %551 : vector<8x32xf32>
    %593 = arith.mulf %589, %588 : vector<8x32xf32>
    %594 = arith.addf %592, %593 : vector<8x32xf32>
    %595 = math.tanh %594 : vector<8x32xf32>
    %596 = arith.mulf %591, %595 : vector<8x32xf32>
    %597 = vector.extract_strided_slice %580 {offsets = [0, 0], sizes = [8, 96], strides = [1, 1]} : vector<8x128xf32> to vector<8x96xf32>
    %598 = arith.negf %597 : vector<8x96xf32>
    %599 = math.exp %598 : vector<8x96xf32>
    %cst_139 = arith.constant 1.000000e+00 : f32
    %600 = vector.broadcast %cst_139 : f32 to vector<8x96xf32>
    %601 = arith.addf %600, %599 : vector<8x96xf32>
    %602 = arith.divf %600, %601 : vector<8x96xf32>
    %603 = vector.extract_strided_slice %580 {offsets = [0, 96], sizes = [8, 32], strides = [1, 1]} : vector<8x128xf32> to vector<8x32xf32>
    %604 = math.tanh %603 : vector<8x32xf32>
    %605 = vector.extract_strided_slice %602 {offsets = [0, 0], sizes = [8, 32], strides = [1, 1]} : vector<8x96xf32> to vector<8x32xf32>
    %606 = vector.extract_strided_slice %602 {offsets = [0, 32], sizes = [8, 32], strides = [1, 1]} : vector<8x96xf32> to vector<8x32xf32>
    %607 = vector.extract_strided_slice %602 {offsets = [0, 64], sizes = [8, 32], strides = [1, 1]} : vector<8x96xf32> to vector<8x32xf32>
    %608 = arith.mulf %606, %567 : vector<8x32xf32>
    %609 = arith.mulf %605, %604 : vector<8x32xf32>
    %610 = arith.addf %608, %609 : vector<8x32xf32>
    %611 = math.tanh %610 : vector<8x32xf32>
    %612 = arith.mulf %607, %611 : vector<8x32xf32>
    %c6_140 = arith.constant 6 : index
    %c0_141 = arith.constant 0 : index
    %c0_142 = arith.constant 0 : index
    %613 = vector.load %arg11[%c6_140, %c0_141, %c0_142] : memref<8x8x256xf32, #tpu.memory_space<vmem>>, vector<1x8x128xf32>
    %614 = vector.shape_cast %613 : vector<1x8x128xf32> to vector<8x128xf32>
    %c1_143 = arith.constant 1 : index
    %c0_144 = arith.constant 0 : index
    %c128_145 = arith.constant 128 : index
    %615 = vector.load %arg11[%c1_143, %c0_144, %c128_145] : memref<8x8x256xf32, #tpu.memory_space<vmem>>, vector<1x8x128xf32>
    %616 = vector.shape_cast %615 : vector<1x8x128xf32> to vector<8x128xf32>
    %617 = tpu.concatenate %596, %612 in 1 : vector<8x32xf32>, vector<8x32xf32> -> vector<8x64xf32>
    %618 = arith.truncf %617 : vector<8x64xf32> to vector<8x64xbf16>
    %cst_146 = arith.constant dense<0.000000e+00> : vector<8x256xf32>
    %619 = tpu.matmul %618, %359, %cst_146 {dimension_numbers = #tpu.dot_dimension_numbers<[1], [0], [0], [1], [0, 0, 1, 1], [], []>} : vector<8x64xbf16>, vector<64x256xbf16>, vector<8x256xf32> -> vector<8x256xf32>
    %620 = vector.extract_strided_slice %619 {offsets = [0, 0], sizes = [8, 128], strides = [1, 1]} : vector<8x256xf32> to vector<8x128xf32>
    %621 = arith.addf %614, %620 : vector<8x128xf32>
    %622 = vector.extract_strided_slice %619 {offsets = [0, 128], sizes = [8, 128], strides = [1, 1]} : vector<8x256xf32> to vector<8x128xf32>
    %623 = arith.addf %616, %622 : vector<8x128xf32>
    %624 = vector.extract_strided_slice %621 {offsets = [0, 0], sizes = [8, 96], strides = [1, 1]} : vector<8x128xf32> to vector<8x96xf32>
    %625 = arith.negf %624 : vector<8x96xf32>
    %626 = math.exp %625 : vector<8x96xf32>
    %cst_147 = arith.constant 1.000000e+00 : f32
    %627 = vector.broadcast %cst_147 : f32 to vector<8x96xf32>
    %628 = arith.addf %627, %626 : vector<8x96xf32>
    %629 = arith.divf %627, %628 : vector<8x96xf32>
    %630 = vector.extract_strided_slice %621 {offsets = [0, 96], sizes = [8, 32], strides = [1, 1]} : vector<8x128xf32> to vector<8x32xf32>
    %631 = math.tanh %630 : vector<8x32xf32>
    %632 = vector.extract_strided_slice %629 {offsets = [0, 0], sizes = [8, 32], strides = [1, 1]} : vector<8x96xf32> to vector<8x32xf32>
    %633 = vector.extract_strided_slice %629 {offsets = [0, 32], sizes = [8, 32], strides = [1, 1]} : vector<8x96xf32> to vector<8x32xf32>
    %634 = vector.extract_strided_slice %629 {offsets = [0, 64], sizes = [8, 32], strides = [1, 1]} : vector<8x96xf32> to vector<8x32xf32>
    %635 = arith.mulf %633, %594 : vector<8x32xf32>
    %636 = arith.mulf %632, %631 : vector<8x32xf32>
    %637 = arith.addf %635, %636 : vector<8x32xf32>
    %638 = math.tanh %637 : vector<8x32xf32>
    %639 = arith.mulf %634, %638 : vector<8x32xf32>
    %640 = vector.extract_strided_slice %623 {offsets = [0, 0], sizes = [8, 96], strides = [1, 1]} : vector<8x128xf32> to vector<8x96xf32>
    %641 = arith.negf %640 : vector<8x96xf32>
    %642 = math.exp %641 : vector<8x96xf32>
    %cst_148 = arith.constant 1.000000e+00 : f32
    %643 = vector.broadcast %cst_148 : f32 to vector<8x96xf32>
    %644 = arith.addf %643, %642 : vector<8x96xf32>
    %645 = arith.divf %643, %644 : vector<8x96xf32>
    %646 = vector.extract_strided_slice %623 {offsets = [0, 96], sizes = [8, 32], strides = [1, 1]} : vector<8x128xf32> to vector<8x32xf32>
    %647 = math.tanh %646 : vector<8x32xf32>
    %648 = vector.extract_strided_slice %645 {offsets = [0, 0], sizes = [8, 32], strides = [1, 1]} : vector<8x96xf32> to vector<8x32xf32>
    %649 = vector.extract_strided_slice %645 {offsets = [0, 32], sizes = [8, 32], strides = [1, 1]} : vector<8x96xf32> to vector<8x32xf32>
    %650 = vector.extract_strided_slice %645 {offsets = [0, 64], sizes = [8, 32], strides = [1, 1]} : vector<8x96xf32> to vector<8x32xf32>
    %651 = arith.mulf %649, %610 : vector<8x32xf32>
    %652 = arith.mulf %648, %647 : vector<8x32xf32>
    %653 = arith.addf %651, %652 : vector<8x32xf32>
    %654 = math.tanh %653 : vector<8x32xf32>
    %655 = arith.mulf %650, %654 : vector<8x32xf32>
    %c7_149 = arith.constant 7 : index
    %c0_150 = arith.constant 0 : index
    %c0_151 = arith.constant 0 : index
    %656 = vector.load %arg11[%c7_149, %c0_150, %c0_151] : memref<8x8x256xf32, #tpu.memory_space<vmem>>, vector<1x8x128xf32>
    %657 = vector.shape_cast %656 : vector<1x8x128xf32> to vector<8x128xf32>
    %c0_152 = arith.constant 0 : index
    %c0_153 = arith.constant 0 : index
    %c128_154 = arith.constant 128 : index
    %658 = vector.load %arg11[%c0_152, %c0_153, %c128_154] : memref<8x8x256xf32, #tpu.memory_space<vmem>>, vector<1x8x128xf32>
    %659 = vector.shape_cast %658 : vector<1x8x128xf32> to vector<8x128xf32>
    %660 = tpu.concatenate %639, %655 in 1 : vector<8x32xf32>, vector<8x32xf32> -> vector<8x64xf32>
    %661 = arith.truncf %660 : vector<8x64xf32> to vector<8x64xbf16>
    %cst_155 = arith.constant dense<0.000000e+00> : vector<8x256xf32>
    %662 = tpu.matmul %661, %359, %cst_155 {dimension_numbers = #tpu.dot_dimension_numbers<[1], [0], [0], [1], [0, 0, 1, 1], [], []>} : vector<8x64xbf16>, vector<64x256xbf16>, vector<8x256xf32> -> vector<8x256xf32>
    %663 = vector.extract_strided_slice %662 {offsets = [0, 0], sizes = [8, 128], strides = [1, 1]} : vector<8x256xf32> to vector<8x128xf32>
    %664 = arith.addf %657, %663 : vector<8x128xf32>
    %665 = vector.extract_strided_slice %662 {offsets = [0, 128], sizes = [8, 128], strides = [1, 1]} : vector<8x256xf32> to vector<8x128xf32>
    %666 = arith.addf %659, %665 : vector<8x128xf32>
    %667 = vector.extract_strided_slice %664 {offsets = [0, 0], sizes = [8, 96], strides = [1, 1]} : vector<8x128xf32> to vector<8x96xf32>
    %668 = arith.negf %667 : vector<8x96xf32>
    %669 = math.exp %668 : vector<8x96xf32>
    %cst_156 = arith.constant 1.000000e+00 : f32
    %670 = vector.broadcast %cst_156 : f32 to vector<8x96xf32>
    %671 = arith.addf %670, %669 : vector<8x96xf32>
    %672 = arith.divf %670, %671 : vector<8x96xf32>
    %673 = vector.extract_strided_slice %664 {offsets = [0, 96], sizes = [8, 32], strides = [1, 1]} : vector<8x128xf32> to vector<8x32xf32>
    %674 = math.tanh %673 : vector<8x32xf32>
    %675 = vector.extract_strided_slice %672 {offsets = [0, 0], sizes = [8, 32], strides = [1, 1]} : vector<8x96xf32> to vector<8x32xf32>
    %676 = vector.extract_strided_slice %672 {offsets = [0, 32], sizes = [8, 32], strides = [1, 1]} : vector<8x96xf32> to vector<8x32xf32>
    %677 = vector.extract_strided_slice %672 {offsets = [0, 64], sizes = [8, 32], strides = [1, 1]} : vector<8x96xf32> to vector<8x32xf32>
    %678 = arith.mulf %676, %637 : vector<8x32xf32>
    %679 = arith.mulf %675, %674 : vector<8x32xf32>
    %680 = arith.addf %678, %679 : vector<8x32xf32>
    %681 = math.tanh %680 : vector<8x32xf32>
    %682 = arith.mulf %677, %681 : vector<8x32xf32>
    %683 = vector.extract_strided_slice %666 {offsets = [0, 0], sizes = [8, 96], strides = [1, 1]} : vector<8x128xf32> to vector<8x96xf32>
    %684 = arith.negf %683 : vector<8x96xf32>
    %685 = math.exp %684 : vector<8x96xf32>
    %cst_157 = arith.constant 1.000000e+00 : f32
    %686 = vector.broadcast %cst_157 : f32 to vector<8x96xf32>
    %687 = arith.addf %686, %685 : vector<8x96xf32>
    %688 = arith.divf %686, %687 : vector<8x96xf32>
    %689 = vector.extract_strided_slice %666 {offsets = [0, 96], sizes = [8, 32], strides = [1, 1]} : vector<8x128xf32> to vector<8x32xf32>
    %690 = math.tanh %689 : vector<8x32xf32>
    %691 = vector.extract_strided_slice %688 {offsets = [0, 0], sizes = [8, 32], strides = [1, 1]} : vector<8x96xf32> to vector<8x32xf32>
    %692 = vector.extract_strided_slice %688 {offsets = [0, 32], sizes = [8, 32], strides = [1, 1]} : vector<8x96xf32> to vector<8x32xf32>
    %693 = vector.extract_strided_slice %688 {offsets = [0, 64], sizes = [8, 32], strides = [1, 1]} : vector<8x96xf32> to vector<8x32xf32>
    %694 = arith.mulf %692, %653 : vector<8x32xf32>
    %695 = arith.mulf %691, %690 : vector<8x32xf32>
    %696 = arith.addf %694, %695 : vector<8x32xf32>
    %697 = math.tanh %696 : vector<8x32xf32>
    %698 = arith.mulf %693, %697 : vector<8x32xf32>
    %699 = tpu.concatenate %682, %698 in 1 : vector<8x32xf32>, vector<8x32xf32> -> vector<8x64xf32>
    %c0_158 = arith.constant 0 : index
    %c0_159 = arith.constant 0 : index
    %700 = vector.load %arg9[%c0_158, %c0_159] : memref<8x64xf32, #tpu.memory_space<vmem>>, vector<8x64xf32>
    %701 = arith.mulf %699, %700 : vector<8x64xf32>
    %702 = arith.truncf %701 : vector<8x64xf32> to vector<8x64xbf16>
    %c0_160 = arith.constant 0 : index
    %c0_161 = arith.constant 0 : index
    %703 = vector.load %arg7[%c0_160, %c0_161] : memref<64x128xbf16, #tpu.memory_space<vmem>>, vector<64x128xbf16>
    %cst_162 = arith.constant dense<0.000000e+00> : vector<8x128xf32>
    %704 = tpu.matmul %702, %703, %cst_162 {dimension_numbers = #tpu.dot_dimension_numbers<[1], [0], [0], [1], [0, 0, 1, 1], [], []>} : vector<8x64xbf16>, vector<64x128xbf16>, vector<8x128xf32> -> vector<8x128xf32>
    %c0_163 = arith.constant 0 : index
    %c0_164 = arith.constant 0 : index
    %705 = vector.load %arg8[%c0_163, %c0_164] : memref<1x128xf32, #tpu.memory_space<vmem>>, vector<1x128xf32>
    %706 = vector.broadcast %705 : vector<1x128xf32> to vector<8x128xf32>
    %707 = arith.addf %704, %706 : vector<8x128xf32>
    %c0_165 = arith.constant 0 : index
    %c0_166 = arith.constant 0 : index
    %708 = vector.load %arg10[%c0_165, %c0_166] : memref<8x128xf32, #tpu.memory_space<vmem>>, vector<8x128xf32>
    tpu.vector_store %arg10[%c0_165, %c0_166], %707 {strides = array<i32>} : memref<8x128xf32, #tpu.memory_space<vmem>>, vector<8x128xf32>,
    return
  }
}

</mosaic_0001>

<bundles_post_ra>
// kernel: tpu_custom_call.1
= control target key start
LH: loop header
LB: loop body
LE: loop exit
PB: predicated region body
PF: predicated region fallthrough
CT: control target
= control target key end

     0   :  { %15 = vsyncpa [#allocation4], 0  ;;  %s4675_s0 = inlined_call_operand.hbm [shape: bf16[64,768], index: 0, kind: input, shape index: {}]   ;;  %s4676_s1 = inlined_call_operand.hbm [shape: bf16[768,256], index: 1, kind: input, shape index: {}]   ;;  %s4677_s2 = inlined_call_operand.hbm [shape: bf16[64,256], index: 2, kind: input, shape index: {}]   ;;  %s4678_s3 = inlined_call_operand.vmem [shape: f32[1,256], index: 3, kind: input, shape index: {}]   ;;  %s4679_s4 = inlined_call_operand.hbm [shape: bf16[64,256], index: 4, kind: input, shape index: {}]   ;;  %s4680_s5 = inlined_call_operand.hbm [shape: bf16[64,256], index: 5, kind: input, shape index: {}]   ;;  %s4681_s6 = inlined_call_operand.vmem [shape: f32[1,256], index: 6, kind: input, shape index: {}]   ;;  %s4682_s7 = inlined_call_operand.hbm [shape: bf16[64,128], index: 7, kind: input, shape index: {}]   ;;  %s4683_s8 = inlined_call_operand.vmem [shape: f32[1,128], index: 8, kind: input, shape index: {}]   ;;  %s4684_s9 = inlined_call_operand.vmem [shape: f32[8,64], index: 9, kind: input, shape index: {}]   ;;  %s4685_s10 = inlined_call_operand.hbm [shape: f32[8,128], index: 10, kind: output, shape index: {}]  }
   0x1   :  { %16 = vsyncpa [#allocation7], 0 }
   0x2   :  { %17 = vsyncpa [#allocation10], 0 }
   0x3   :  { %18 = vsyncpa [#allocation13], 0 }
   0x4   :  { %19 = vsyncpa [#allocation5], 0  ;;  %s3992_s13 = smov [#allocation6]   ;;  %s3828_s17 = scalar_lea.hbm %s4676_s1, 12288 }
   0x5   :  { %s37_s14 = sshll.u32 %s3992_s13, 4  ;;  %p3829_p0 = scmp.ne.s32.totalorder %s4676_s1, %s3828_s17  ;;  %s38_s14 = int_to_ptr.vmem [resolvable:$true] %s37_s14 }
   0x6   :  { %p3832_p1 = scmp.lt.u32.totalorder %s3828_s17, %s4676_s1 }
   0x8   :  { %p3834_p2 = pnand %p3832_p1, %p3829_p0 }
   0xa   :  { %3837 = shalt.err (!%p3834_p2)
}
   0xb   :  { %s3838_s22 = scalar_lea.vmem %s38_s14, 12288  ;;  %p3843_p4 = scmp.lt.s32.totalorder %s38_s14, %s38_s14 }
   0xc   :  { %p3839_p3 = scmp.ne.s32.totalorder %s38_s14, %s3838_s22  ;;  %p3844_p5 = scmp.lt.s32.totalorder %s3838_s22, %s3838_s22 }
   0xe   :  { %p3845_p6 = por %p3844_p5, %p3843_p4 }
  0x10   :  { %p3846_p7 = pnand %p3845_p6, %p3839_p3 }
  0x12   :  { %3849 = shalt.err (!%p3846_p7)
}
  0x13   :  { %s3993_s23 = smov 128   ;;  %s3994_s24 = smov 8  }
  0x14   :  { %43 = dma.hbm_to_vmem [thread:$0]  %s4676_s1, 12288, %s38_s14, [#allocation7], %s3993_s23, %s3993_s23, %s3994_s24  }
  0x15   :  { %s3995_s27 = smov [#allocation9]   ;;  %s3996_s29 = smov [#allocation3]  }
  0x16   :  { %s63_s28 = sshll.u32 %s3995_s27, 4  ;;  %s25_s30 = sshll.u32 %s3996_s29, 4  ;;  %s64_s28 = int_to_ptr.vmem [resolvable:$true] %s63_s28  ;;  %s26_s30 = int_to_ptr.vmem [resolvable:$true] %s25_s30 }
  0x17   :  { %s3850_s13 = scalar_lea.hbm %s4679_s4, 1024 }
  0x18   :  { %p3851_p8 = scmp.ne.s32.totalorder %s4679_s4, %s3850_s13  ;;  %p3854_p9 = scmp.lt.u32.totalorder %s3850_s13, %s4679_s4 }
  0x1a   :  { %p3856_p10 = pnand %p3854_p9, %p3851_p8 }
  0x1c   :  { %3859 = shalt.err (!%p3856_p10)
}
  0x1d   :  { %s3860_s1 = scalar_lea.vmem %s64_s28, 1024  ;;  %p3865_p12 = scmp.lt.s32.totalorder %s64_s28, %s64_s28 }
  0x1e   :  { %p3861_p11 = scmp.ne.s32.totalorder %s64_s28, %s3860_s1  ;;  %p3866_p13 = scmp.lt.s32.totalorder %s3860_s1, %s3860_s1 }
  0x20   :  { %p3867_p0 = por %p3866_p13, %p3865_p12 }
  0x22   :  { %p3868_p1 = pnand %p3867_p0, %p3861_p11 }
  0x24   :  { %3871 = shalt.err (!%p3868_p1)
}
  0x25   :  { %69 = dma.hbm_to_vmem [thread:$0]  %s4679_s4, 1024, %s64_s28, [#allocation10], %s3993_s23, %s3993_s23, %s3994_s24  }
  0x26   :  { %s3872_s22 = scalar_lea.hbm %s4675_s0, 3072 }
  0x27   :  { %p3873_p2 = scmp.ne.s32.totalorder %s4675_s0, %s3872_s22  ;;  %p3876_p3 = scmp.lt.u32.totalorder %s3872_s22, %s4675_s0 }
  0x29   :  { %p3878_p4 = pnand %p3876_p3, %p3873_p2 }
  0x2b   :  { %3881 = shalt.err (!%p3878_p4)
}
  0x2c   :  { %s3882_s11 = scalar_lea.vmem %s26_s30, 3072  ;;  %p3887_p6 = scmp.lt.s32.totalorder %s26_s30, %s26_s30 }
  0x2d   :  { %p3883_p5 = scmp.ne.s32.totalorder %s26_s30, %s3882_s11  ;;  %p3888_p7 = scmp.lt.s32.totalorder %s3882_s11, %s3882_s11 }
  0x2f   :  { %p3889_p8 = por %p3888_p7, %p3887_p6 }
  0x31   :  { %p3890_p9 = pnand %p3889_p8, %p3883_p5 }
  0x33   :  { %3893 = shalt.err (!%p3890_p9)
}
  0x34   :  { %s3997_s4 = smov 384   ;;  %s3998_s28 = smov 24  }
  0x35   :  { %31 = dma.hbm_to_vmem [thread:$0]  %s4675_s0, 3072, %s26_s30, [#allocation4], %s3997_s4, %s3997_s4, %s3998_s28  }
  0x36   :  { %s3999_s15 = smov [#allocation8]   ;;  %s4000_s17 = smov [#allocation11]  }
  0x37   :  { %s49_s16 = sshll.u32 %s3999_s15, 4  ;;  %s75_s18 = sshll.u32 %s4000_s17, 4  ;;  %s50_s16 = int_to_ptr.vmem [resolvable:$true] %s49_s16  ;;  %s76_s18 = int_to_ptr.vmem [resolvable:$true] %s75_s18 }
  0x38   :  { %s3894_s19 = scalar_lea.hbm %s4677_s2, 1024 }
  0x39   :  { %p3895_p10 = scmp.ne.s32.totalorder %s4677_s2, %s3894_s19  ;;  %p3898_p11 = scmp.lt.u32.totalorder %s3894_s19, %s4677_s2 }
  0x3b   :  { %p3900_p12 = pnand %p3898_p11, %p3895_p10 }
  0x3d   :  { %3903 = shalt.err (!%p3900_p12)
}
  0x3e   :  { %s3904_s0 = scalar_lea.vmem %s50_s16, 1024  ;;  %p3909_p0 = scmp.lt.s32.totalorder %s50_s16, %s50_s16 }
  0x3f   :  { %p3905_p13 = scmp.ne.s32.totalorder %s50_s16, %s3904_s0  ;;  %p3910_p1 = scmp.lt.s32.totalorder %s3904_s0, %s3904_s0 }
  0x41   :  { %p3911_p2 = por %p3910_p1, %p3909_p0 }
  0x43   :  { %p3912_p3 = pnand %p3911_p2, %p3905_p13 }
  0x45   :  { %3915 = shalt.err (!%p3912_p3)
}
  0x46   :  { %55 = dma.hbm_to_vmem [thread:$0]  %s4677_s2, 1024, %s50_s16, [#allocation7], %s3993_s23, %s3993_s23, %s3994_s24  }
  0x47   :  { %s3916_s11 = scalar_lea.hbm %s4680_s5, 1024 }
  0x48   :  { %p3917_p4 = scmp.ne.s32.totalorder %s4680_s5, %s3916_s11  ;;  %p3920_p5 = scmp.lt.u32.totalorder %s3916_s11, %s4680_s5 }
  0x4a   :  { %p3922_p6 = pnand %p3920_p5, %p3917_p4 }
  0x4c   :  { %3925 = shalt.err (!%p3922_p6)
}
  0x4d   :  { %s3926_s15 = scalar_lea.vmem %s76_s18, 1024  ;;  %p3931_p8 = scmp.lt.s32.totalorder %s76_s18, %s76_s18 }
  0x4e   :  { %p3927_p7 = scmp.ne.s32.totalorder %s76_s18, %s3926_s15  ;;  %p3932_p9 = scmp.lt.s32.totalorder %s3926_s15, %s3926_s15 }
  0x50   :  { %p3933_p10 = por %p3932_p9, %p3931_p8 }
  0x52   :  { %p3934_p11 = pnand %p3933_p10, %p3927_p7 }
  0x54   :  { %3937 = shalt.err (!%p3934_p11)
}
  0x55   :  { %81 = dma.hbm_to_vmem [thread:$0]  %s4680_s5, 1024, %s76_s18, [#allocation10], %s3993_s23, %s3993_s23, %s3994_s24  }
  0x56   :  { %s4001_s17 = smov [#allocation12]   ;;  %s3938_s20 = scalar_lea.hbm %s4682_s7, 512 }
  0x57   :  { %s89_s1 = sshll.u32 %s4001_s17, 4  ;;  %p3939_p12 = scmp.ne.s32.totalorder %s4682_s7, %s3938_s20  ;;  %s90_s1 = int_to_ptr.vmem [resolvable:$true] %s89_s1 }
  0x58   :  { %p3942_p13 = scmp.lt.u32.totalorder %s3938_s20, %s4682_s7 }
  0x5a   :  { %p3944_p0 = pnand %p3942_p13, %p3939_p12 }
  0x5c   :  { %3947 = shalt.err (!%p3944_p0)
}
  0x5d   :  { %s3948_s30 = scalar_lea.vmem %s90_s1, 512  ;;  %p3953_p2 = scmp.lt.s32.totalorder %s90_s1, %s90_s1 }
  0x5e   :  { %p3949_p1 = scmp.ne.s32.totalorder %s90_s1, %s3948_s30  ;;  %p3954_p3 = scmp.lt.s32.totalorder %s3948_s30, %s3948_s30 }
  0x60   :  { %p3955_p4 = por %p3954_p3, %p3953_p2 }
  0x62   :  { %p3956_p5 = pnand %p3955_p4, %p3949_p1 }
  0x64   :  { %3959 = shalt.err (!%p3956_p5)
}
  0x65   :  { %s4002_s5 = smov 64   ;;  %s4003_s23 = smov 4  }
  0x66   :  { %95 = dma.hbm_to_vmem [thread:$0]  %s4682_s7, 512, %s90_s1, [#allocation13], %s4002_s5, %s4002_s5, %s4003_s23  }
  0x67   :  { %3982 = dma.done.wait [#allocation4], 3072  }
  0x68   :  { %3983 = vsyncadd [#allocation4], 4294964224 }
  0x69   :  { %3984 = dma.done.wait [#allocation7], 13312  }
  0x6a   :  { %3985 = vsyncadd [#allocation7], 4294953984 }
  0x6b   :  { %3986 = dma.done.wait [#allocation10], 2048  }
  0x6c   :  { %3987 = vsyncadd [#allocation10], 4294965248 }
  0x6d   :  { %3988 = dma.done.wait [#allocation13], 512  }
  0x6e   :  { %3989 = vsyncadd [#allocation13], 4294966784  ;;  %v3352_v0 = vld [vmem:[#allocation6 + $0x4] ss:$8 sps:$4 sm:$0xff]   ;;  %v3354_v1 = vld [vmem:[#allocation6] ss:$8 sps:$4 sm:$0xff]  }
  0x6f   :  { %851 = vmatprep.subr.bf16.mxu0 %v3352_v0  ;;  %v3355_v2 = vld [vmem:[#allocation6 + $0x14] ss:$8 sps:$4 sm:$0xff]   ;;  %v3357_v3 = vld [vmem:[#allocation6 + $0x10] ss:$8 sps:$4 sm:$0xff]   ;;  %v3358_v4 = vld [vmem:[#allocation6 + $0x24] ss:$8 sps:$4 sm:$0xff]  }
  0x70   :  { %852 = vmatpush1.bf16.msra.mxu0 %v3354_v1  ;;  %v3360_v5 = vld [vmem:[#allocation6 + $0x20] ss:$8 sps:$4 sm:$0xff]   ;;  %v3361_v6 = vld [vmem:[#allocation6 + $0x34] ss:$8 sps:$4 sm:$0xff]   ;;  %v3363_v7 = vld [vmem:[#allocation6 + $0x30] ss:$8 sps:$4 sm:$0xff]  }
  0x71   :  { %853 = vmatprep.subr.bf16.mxu0 %v3355_v2  ;;  %v3364_v8 = vld [vmem:[#allocation6 + $0x44] ss:$8 sps:$4 sm:$0xff]   ;;  %v3366_v9 = vld [vmem:[#allocation6 + $0x40] ss:$8 sps:$4 sm:$0xff]   ;;  %v3367_v10 = vld [vmem:[#allocation6 + $0x54] ss:$8 sps:$4 sm:$0xff]  }
  0x72   :  { %v3369_v11 = vld [vmem:[#allocation6 + $0x50] ss:$8 sps:$4 sm:$0xff]   ;;  %v3370_v12 = vld [vmem:[#allocation6 + $0x64] ss:$8 sps:$4 sm:$0xff]   ;;  %v3372_v14 = vld [vmem:[#allocation6 + $0x60] ss:$8 sps:$4 sm:$0xff]  }
  0x73   :  { %v3402_v13 = vld [vmem:[#allocation3 + $0x4] ss:$24 sps:$4 sm:$0xff]   ;;  %v3375_v16 = vld [vmem:[#allocation6 + $0x70] ss:$8 sps:$4 sm:$0xff]   ;;  %v3378_v18 = vld [vmem:[#allocation6 + $0x80] ss:$8 sps:$4 sm:$0xff]  }
  0x74   :  { %854 = vmatpush1.bf16.msra.mxu0 %v3357_v3  ;;  %v3373_v15 = vld [vmem:[#allocation6 + $0x74] ss:$8 sps:$4 sm:$0xff]   ;;  %883 = vmatprep.mubr.bf16.mxu0 %v3402_v13  ;;  %v3376_v17 = vld [vmem:[#allocation6 + $0x84] ss:$8 sps:$4 sm:$0xff]   ;;  %v3381_v20 = vld [vmem:[#allocation6 + $0x90] ss:$8 sps:$4 sm:$0xff]  }
  0x75   :  { %855 = vmatprep.subr.bf16.mxu0 %v3358_v4  ;;  %v3379_v19 = vld [vmem:[#allocation6 + $0x94] ss:$8 sps:$4 sm:$0xff]   ;;  %v3382_v21 = vld [vmem:[#allocation6 + $0xa4] ss:$8 sps:$4 sm:$0xff]   ;;  %v3384_v22 = vld [vmem:[#allocation6 + $0xa0] ss:$8 sps:$4 sm:$0xff]  }
  0x76   :  { %v3385_v23 = vld [vmem:[#allocation6 + $0xb4] ss:$8 sps:$4 sm:$0xff]   ;;  %v3387_v24 = vld [vmem:[#allocation6 + $0xb0] ss:$8 sps:$4 sm:$0xff]   ;;  %v3388_v25 = vld [vmem:[#allocation6 + $0xc4] ss:$8 sps:$4 sm:$0xff]  }
  0x77   :  { %v3390_v26 = vld [vmem:[#allocation6 + $0xc0] ss:$8 sps:$4 sm:$0xff]   ;;  %v3391_v27 = vld [vmem:[#allocation6 + $0xd4] ss:$8 sps:$4 sm:$0xff]   ;;  %v3393_v28 = vld [vmem:[#allocation6 + $0xd0] ss:$8 sps:$4 sm:$0xff]  }
  0x78   :  { %856 = vmatpush1.bf16.msra.mxu0 %v3360_v5  ;;  %v3394_v29 = vld [vmem:[#allocation6 + $0xe4] ss:$8 sps:$4 sm:$0xff]   ;;  %v3396_v30 = vld [vmem:[#allocation6 + $0xe0] ss:$8 sps:$4 sm:$0xff]   ;;  %v3397_v31 = vld [vmem:[#allocation6 + $0xf4] ss:$8 sps:$4 sm:$0xff]  }
  0x79   :  { %857 = vmatprep.subr.bf16.mxu0 %v3361_v6  ;;  %v3399_v32 = vld [vmem:[#allocation6 + $0xf0] ss:$8 sps:$4 sm:$0xff]   ;;  %v3405_v33 = vld [vmem:[#allocation6 + $0x104] ss:$8 sps:$4 sm:$0xff]   ;;  %v3403_v35 = vld [vmem:[#allocation6 + $0x100] ss:$8 sps:$4 sm:$0xff]  }
  0x7a   :  { %v3400_v34 = vld [vmem:[#allocation3] ss:$24 sps:$4 sm:$0xff]   ;;  %v3433_v36 = vld [vmem:[#allocation3 + $0x34] ss:$24 sps:$4 sm:$0xff]   ;;  %v3438_v40 = vld [vmem:[#allocation3 + $0x30] ss:$24 sps:$4 sm:$0xff]  }
  0x7b   :  { %v3408_v37 = vld [vmem:[#allocation6 + $0x114] ss:$8 sps:$4 sm:$0xff]   ;;  %v3406_v38 = vld [vmem:[#allocation6 + $0x110] ss:$8 sps:$4 sm:$0xff]   ;;  %v3411_v39 = vld [vmem:[#allocation6 + $0x124] ss:$8 sps:$4 sm:$0xff]  }
  0x7c   :  { %858 = vmatpush1.bf16.msra.mxu0 %v3363_v7  ;;  %v3409_v41 = vld [vmem:[#allocation6 + $0x120] ss:$8 sps:$4 sm:$0xff]   ;;  %v3442_v42 = vld [vmem:[#allocation3 + $0x64] ss:$24 sps:$4 sm:$0xff]   ;;  %v3412_v44 = vld [vmem:[#allocation6 + $0x130] ss:$8 sps:$4 sm:$0xff]  }
  0x7d   :  { %859 = vmatprep.subr.bf16.mxu0 %v3364_v8  ;;  %v3414_v43 = vld [vmem:[#allocation6 + $0x134] ss:$8 sps:$4 sm:$0xff]   ;;  %v3417_v45 = vld [vmem:[#allocation6 + $0x144] ss:$8 sps:$4 sm:$0xff]   ;;  %v3415_v46 = vld [vmem:[#allocation6 + $0x140] ss:$8 sps:$4 sm:$0xff]  }
  0x7e   :  { %v3420_v47 = vld [vmem:[#allocation6 + $0x154] ss:$8 sps:$4 sm:$0xff]   ;;  %v3447_v48 = vld [vmem:[#allocation3 + $0x60] ss:$24 sps:$4 sm:$0xff]   ;;  %v3423_v51 = vld [vmem:[#allocation6 + $0x164] ss:$8 sps:$4 sm:$0xff]  }
  0x7f   :  { %v3451_v49 = vld [vmem:[#allocation3 + $0x94] ss:$24 sps:$4 sm:$0xff]   ;;  %v3418_v50 = vld [vmem:[#allocation6 + $0x150] ss:$8 sps:$4 sm:$0xff]   ;;  %v3421_v53 = vld [vmem:[#allocation6 + $0x160] ss:$8 sps:$4 sm:$0xff]  }
  0x80   :  { %860 = vmatpush1.bf16.msra.mxu0 %v3366_v9  ;;  %v3456_v52 = vld [vmem:[#allocation3 + $0x90] ss:$24 sps:$4 sm:$0xff]   ;;  %v3462_v54 = vld [vmem:[#allocation3 + $0xc] ss:$24 sps:$4 sm:$0xff]   ;;  %v3426_v55 = vld [vmem:[#allocation6 + $0x174] ss:$8 sps:$4 sm:$0xff]  }
  0x81   :  { %861 = vmatprep.subr.bf16.mxu0 %v3367_v10  ;;  %v3424_v56 = vld [vmem:[#allocation6 + $0x170] ss:$8 sps:$4 sm:$0xff]   ;;  %v3429_v57 = vld [vmem:[#allocation6 + $0x184] ss:$8 sps:$4 sm:$0xff]   ;;  %v3427_v58 = vld [vmem:[#allocation6 + $0x180] ss:$8 sps:$4 sm:$0xff]  }
  0x82   :  { %v3432_v59 = vld [vmem:[#allocation6 + $0x194] ss:$8 sps:$4 sm:$0xff]   ;;  %v3430_v60 = vld [vmem:[#allocation6 + $0x190] ss:$8 sps:$4 sm:$0xff]   ;;  %v3437_v61 = vld [vmem:[#allocation6 + $0x1a4] ss:$8 sps:$4 sm:$0xff]  }
  0x83   :  { %v3435_v62 = vld [vmem:[#allocation6 + $0x1a0] ss:$8 sps:$4 sm:$0xff]   ;;  %v3441_v63 = vld [vmem:[#allocation6 + $0x1b4] ss:$8 sps:$4 sm:$0xff]   ;;  %v3439_v0 = vld [vmem:[#allocation6 + $0x1b0] ss:$8 sps:$4 sm:$0xff]  }
  0x84   :  { %862 = vmatpush1.bf16.msra.mxu0 %v3369_v11  ;;  %v3446_v1 = vld [vmem:[#allocation6 + $0x1c4] ss:$8 sps:$4 sm:$0xff]   ;;  %v3444_v2 = vld [vmem:[#allocation6 + $0x1c0] ss:$8 sps:$4 sm:$0xff]   ;;  %v3450_v3 = vld [vmem:[#allocation6 + $0x1d4] ss:$8 sps:$4 sm:$0xff]  }
  0x85   :  { %863 = vmatprep.subr.bf16.mxu0 %v3370_v12  ;;  %v3448_v4 = vld [vmem:[#allocation6 + $0x1d0] ss:$8 sps:$4 sm:$0xff]   ;;  %v3455_v5 = vld [vmem:[#allocation6 + $0x1e4] ss:$8 sps:$4 sm:$0xff]   ;;  %v3453_v6 = vld [vmem:[#allocation6 + $0x1e0] ss:$8 sps:$4 sm:$0xff]  }
  0x86   :  { %v3459_v7 = vld [vmem:[#allocation6 + $0x1f4] ss:$8 sps:$4 sm:$0xff]   ;;  %v3457_v8 = vld [vmem:[#allocation6 + $0x1f0] ss:$8 sps:$4 sm:$0xff]   ;;  %v3465_v9 = vld [vmem:[#allocation6 + $0x204] ss:$8 sps:$4 sm:$0xff]  }
  0x87   :  { %v3460_v10 = vld [vmem:[#allocation3 + $0x8] ss:$24 sps:$4 sm:$0xff]   ;;  %v3493_v12 = vld [vmem:[#allocation3 + $0x3c] ss:$24 sps:$4 sm:$0xff]   ;;  %s4006_s27 = smov 96   ;;  %vm1157_vm0 = vcmask 261120  }
  0x88   :  { %864 = vmatpush1.bf16.msra.mxu0 %v3372_v14  ;;  %v3463_v11 = vld [vmem:[#allocation6 + $0x200] ss:$8 sps:$4 sm:$0xff]   ;;  %v3468_v13 = vld [vmem:[#allocation6 + $0x214] ss:$8 sps:$4 sm:$0xff]   ;;  %v3466_v14 = vld [vmem:[#allocation6 + $0x210] ss:$8 sps:$4 sm:$0xff]  }
  0x89   :  { %865 = vmatprep.subr.bf16.mxu0 %v3373_v15  ;;  %v3471_v15 = vld [vmem:[#allocation6 + $0x224] ss:$8 sps:$4 sm:$0xff]   ;;  %vm1200_vm1 = vcmask 523264   ;;  %vm4008_vm2 = vmmov 0   ;;  %s4009_s13 = smov [#allocation14]  }
  0x8a   :  { %s3057_s15 = sshll.u32 %s4009_s13, 4  ;;  %s3058_s15 = int_to_ptr.vmem [resolvable:$true] %s3057_s15 }
  0x8b   :  { %p3965_p7 = scmp.lt.s32.totalorder %s3058_s15, %s3058_s15 }
  0x8c   :  { %866 = vmatpush1.bf16.msra.mxu0 %v3375_v16  ;;  %v3495_v16 = vld [vmem:[#allocation3 + $0x38] ss:$24 sps:$4 sm:$0xff]  }
  0x8d   :  { %867 = vmatprep.subr.bf16.mxu0 %v3376_v17  ;;  %v3469_v17 = vld [vmem:[#allocation6 + $0x220] ss:$8 sps:$4 sm:$0xff]  }
  0x90   :  { %868 = vmatpush1.bf16.msra.mxu0 %v3378_v18  ;;  %v3502_v18 = vld [vmem:[#allocation3 + $0x6c] ss:$24 sps:$4 sm:$0xff]  }
  0x91   :  { %869 = vmatprep.subr.bf16.mxu0 %v3379_v19  ;;  %v3474_v19 = vld [vmem:[#allocation6 + $0x234] ss:$8 sps:$4 sm:$0xff]  }
  0x94   :  { %870 = vmatpush1.bf16.msra.mxu0 %v3381_v20  ;;  %v3472_v20 = vld [vmem:[#allocation6 + $0x230] ss:$8 sps:$4 sm:$0xff]  }
  0x95   :  { %871 = vmatprep.subr.bf16.mxu0 %v3382_v21  ;;  %v3477_v21 = vld [vmem:[#allocation6 + $0x244] ss:$8 sps:$4 sm:$0xff]  }
  0x98   :  { %872 = vmatpush1.bf16.msra.mxu0 %v3384_v22  ;;  %v3504_v22 = vld [vmem:[#allocation3 + $0x68] ss:$24 sps:$4 sm:$0xff]  }
  0x99   :  { %873 = vmatprep.subr.bf16.mxu0 %v3385_v23  ;;  %v3475_v23 = vld [vmem:[#allocation6 + $0x240] ss:$8 sps:$4 sm:$0xff]  }
  0x9c   :  { %874 = vmatpush1.bf16.msra.mxu0 %v3387_v24  ;;  %v3511_v24 = vld [vmem:[#allocation3 + $0x9c] ss:$24 sps:$4 sm:$0xff]  }
  0x9d   :  { %875 = vmatprep.subr.bf16.mxu0 %v3388_v25  ;;  %v3480_v25 = vld [vmem:[#allocation6 + $0x254] ss:$8 sps:$4 sm:$0xff]  }
  0xa0   :  { %876 = vmatpush1.bf16.msra.mxu0 %v3390_v26  ;;  %v3478_v26 = vld [vmem:[#allocation6 + $0x250] ss:$8 sps:$4 sm:$0xff]  }
  0xa1   :  { %877 = vmatprep.subr.bf16.mxu0 %v3391_v27  ;;  %v3483_v27 = vld [vmem:[#allocation6 + $0x264] ss:$8 sps:$4 sm:$0xff]  }
  0xa4   :  { %878 = vmatpush1.bf16.msra.mxu0 %v3393_v28  ;;  %v3513_v28 = vld [vmem:[#allocation3 + $0x98] ss:$24 sps:$4 sm:$0xff]  }
  0xa5   :  { %879 = vmatprep.subr.bf16.mxu0 %v3394_v29  ;;  %v3481_v29 = vld [vmem:[#allocation6 + $0x260] ss:$8 sps:$4 sm:$0xff]  }
  0xa8   :  { %880 = vmatpush1.bf16.msra.mxu0 %v3396_v30  ;;  %v3522_v30 = vld [vmem:[#allocation3 + $0x14] ss:$24 sps:$4 sm:$0xff]  }
  0xa9   :  { %881 = vmatprep.subr.bf16.mxu0 %v3397_v31  ;;  %v3486_v31 = vld [vmem:[#allocation6 + $0x274] ss:$8 sps:$4 sm:$0xff]  }
  0xac   :  { %882 = vmatpush1.bf16.msra.mxu0 %v3399_v32  ;;  %v3484_v32 = vld [vmem:[#allocation6 + $0x270] ss:$8 sps:$4 sm:$0xff]  }
  0xad   :  { %924 = vmatprep.subr.bf16.mxu0 %v3405_v33  ;;  %v3489_v33 = vld [vmem:[#allocation6 + $0x284] ss:$8 sps:$4 sm:$0xff]  }
  0xaf   :  { %884 = vmatmul.mubr.bf16.vlgmr.msra.gmra.mrb[0].mxu0 %v3400_v34  ;;  %v3487_v34 = vld [vmem:[#allocation6 + $0x280] ss:$8 sps:$4 sm:$0xff]  }
  0xb0   :  { %925 = vmatpush1.bf16.msra.mxu0 %v3403_v35  ;;  %893 = vmatprep.mubr.bf16.mxu0 %v3433_v36  ;;  %v3492_v35 = vld [vmem:[#allocation6 + $0x294] ss:$8 sps:$4 sm:$0xff]   ;;  %v3490_v36 = vld [vmem:[#allocation6 + $0x290] ss:$8 sps:$4 sm:$0xff]  }
  0xb1   :  { %926 = vmatprep.subr.bf16.mxu0 %v3408_v37  ;;  %v3498_v37 = vld [vmem:[#allocation6 + $0x2a4] ss:$8 sps:$4 sm:$0xff]  }
  0xb4   :  { %927 = vmatpush1.bf16.msra.mxu0 %v3406_v38  ;;  %v3496_v38 = vld [vmem:[#allocation6 + $0x2a0] ss:$8 sps:$4 sm:$0xff]  }
  0xb5   :  { %928 = vmatprep.subr.bf16.mxu0 %v3411_v39  ;;  %v3501_v39 = vld [vmem:[#allocation6 + $0x2b4] ss:$8 sps:$4 sm:$0xff]  }
  0xb7   :  { %894 = vmatmul.mubr.bf16.gmra.mrb[4].mxu0 %v3438_v40  ;;  %v3499_v40 = vld [vmem:[#allocation6 + $0x2b0] ss:$8 sps:$4 sm:$0xff]  }
  0xb8   :  { %929 = vmatpush1.bf16.msra.mxu0 %v3409_v41  ;;  %903 = vmatprep.mubr.bf16.mxu0 %v3442_v42  ;;  %v3507_v41 = vld [vmem:[#allocation6 + $0x2c4] ss:$8 sps:$4 sm:$0xff]   ;;  %v3505_v42 = vld [vmem:[#allocation6 + $0x2c0] ss:$8 sps:$4 sm:$0xff]  }
  0xb9   :  { %930 = vmatprep.subr.bf16.mxu0 %v3414_v43  ;;  %v3510_v43 = vld [vmem:[#allocation6 + $0x2d4] ss:$8 sps:$4 sm:$0xff]  }
  0xbc   :  { %931 = vmatpush1.bf16.msra.mxu0 %v3412_v44  ;;  %v3508_v44 = vld [vmem:[#allocation6 + $0x2d0] ss:$8 sps:$4 sm:$0xff]  }
  0xbd   :  { %932 = vmatprep.subr.bf16.mxu0 %v3417_v45  ;;  %v3516_v45 = vld [vmem:[#allocation6 + $0x2e4] ss:$8 sps:$4 sm:$0xff]  }
  0xbf   :  { %904 = vmatmul.mubr.bf16.gmra.mrb[8].mxu0 %v3447_v48  ;;  %v3517_v48 = vld [vmem:[#allocation6 + $0x2f0] ss:$8 sps:$4 sm:$0xff]  }
  0xc0   :  { %933 = vmatpush1.bf16.msra.mxu0 %v3415_v46  ;;  %913 = vmatprep.mubr.bf16.mxu0 %v3451_v49  ;;  %v3514_v46 = vld [vmem:[#allocation6 + $0x2e0] ss:$8 sps:$4 sm:$0xff]  }
  0xc1   :  { %934 = vmatprep.subr.bf16.mxu0 %v3420_v47  ;;  %v3519_v47 = vld [vmem:[#allocation6 + $0x2f4] ss:$8 sps:$4 sm:$0xff]   ;;  %v3520_v49 = vld [vmem:[#allocation3 + $0x10] ss:$24 sps:$4 sm:$0xff]  }
  0xc4   :  { %935 = vmatpush1.bf16.msra.mxu0 %v3418_v50  ;;  %v3523_v50 = vld [vmem:[#allocation3 + $0x44] ss:$24 sps:$4 sm:$0xff]  }
  0xc5   :  { %936 = vmatprep.subr.bf16.mxu0 %v3423_v51  ;;  %v3525_v51 = vld [vmem:[#allocation3 + $0x40] ss:$24 sps:$4 sm:$0xff]  }
  0xc7   :  { %914 = vmatmul.mubr.bf16.gmra.mrb[12].mxu0 %v3456_v52  ;;  %v3526_v52 = vld [vmem:[#allocation3 + $0x74] ss:$24 sps:$4 sm:$0xff]  }
  0xc8   :  { %937 = vmatpush1.bf16.msra.mxu0 %v3421_v53  ;;  %956 = vmatprep.mubr.bf16.mxu0 %v3462_v54  ;;  %v3528_v53 = vld [vmem:[#allocation3 + $0x70] ss:$24 sps:$4 sm:$0xff]   ;;  %v3529_v54 = vld [vmem:[#allocation3 + $0xa4] ss:$24 sps:$4 sm:$0xff]  }
  0xc9   :  { %938 = vmatprep.subr.bf16.mxu0 %v3426_v55  ;;  %v3531_v55 = vld [vmem:[#allocation3 + $0xa0] ss:$24 sps:$4 sm:$0xff]  }
  0xcc   :  { %939 = vmatpush1.bf16.msra.mxu0 %v3424_v56  ;;  %v241_v56 = vlaneseq }
  0xcd   :  { %940 = vmatprep.subr.bf16.mxu0 %v3429_v57 }
  0xce   :  { %v4151_v57 = vshrl.u32 %v241_v56, 7  ;;  %v4210_v56 = vld [vmem:[#allocation8 + $0x10] ss:$8 sps:$4 sm:$0xff]  }
  0xd0   :  { %941 = vmatpush1.bf16.msra.mxu0 %v3427_v58  ;;  %v243_v58 = vsub.s32 0, %v4151_v57 }
  0xd1   :  { %942 = vmatprep.subr.bf16.mxu0 %v3432_v59  ;;  %v239_v59 = vld [vmem:[%s4678_s3] sm:$0x3]  ;;  %s4004_s3 = smov 32  }
  0xd4   :  { %943 = vmatpush1.bf16.msra.mxu0 %v3430_v60  ;;  %v247_v60 = vsub.s32 1, %v4151_v57 }
  0xd5   :  { %944 = vmatprep.subr.bf16.mxu0 %v3437_v61  ;;  %v244_v61 = vrot.slane %v239_v59, %v243_v58 }
  0xd8   :  { %945 = vmatpush1.bf16.msra.mxu0 %v3435_v62  ;;  %v248_v62 = vrot.slane %v239_v59, %v247_v60  ;;  %v4213_v59 = vld [vmem:[#allocation8 + $0x24] ss:$8 sps:$4 sm:$0xff]  }
  0xd9   :  { %946 = vmatprep.subr.bf16.mxu0 %v3441_v63 }
  0xdc   :  { %947 = vmatpush1.bf16.msra.mxu0 %v3439_v0 }
  0xdd   :  { %948 = vmatprep.subr.bf16.mxu0 %v3446_v1 }
  0xe0   :  { %949 = vmatpush1.bf16.msra.mxu0 %v3444_v2 }
  0xe1   :  { %950 = vmatprep.subr.bf16.mxu0 %v3450_v3 }
  0xe4   :  { %951 = vmatpush1.bf16.msra.mxu0 %v3448_v4 }
  0xe5   :  { %952 = vmatprep.subr.bf16.mxu0 %v3455_v5 }
  0xe8   :  { %953 = vmatpush1.bf16.msra.mxu0 %v3453_v6 }
  0xe9   :  { %954 = vmatprep.subr.bf16.mxu0 %v3459_v7 }
  0xec   :  { %955 = vmatpush1.bf16.msra.mxu0 %v3457_v8 }
  0xed   :  { %997 = vmatprep.subr.bf16.mxu0 %v3465_v9 }
  0xef   :  { %957 = vmatmul.mubr.bf16.vlgmr.msra.gmra.mrb[0].mxu0 %v3460_v10 }
  0xf0   :  { %998 = vmatpush1.bf16.msra.mxu0 %v3463_v11  ;;  %966 = vmatprep.mubr.bf16.mxu0 %v3493_v12 }
  0xf1   :  { %999 = vmatprep.subr.bf16.mxu0 %v3468_v13 }
  0xf4   :  { %1000 = vmatpush1.bf16.msra.mxu0 %v3466_v14 }
  0xf5   :  { %1001 = vmatprep.subr.bf16.mxu0 %v3471_v15 }
  0xf7   :  { %967 = vmatmul.mubr.bf16.gmra.mrb[4].mxu0 %v3495_v16 }
  0xf8   :  { %1002 = vmatpush1.bf16.msra.mxu0 %v3469_v17  ;;  %976 = vmatprep.mubr.bf16.mxu0 %v3502_v18 }
  0xf9   :  { %1003 = vmatprep.subr.bf16.mxu0 %v3474_v19 }
  0xfc   :  { %1004 = vmatpush1.bf16.msra.mxu0 %v3472_v20 }
  0xfd   :  { %1005 = vmatprep.subr.bf16.mxu0 %v3477_v21 }
  0xff   :  { %977 = vmatmul.mubr.bf16.gmra.mrb[8].mxu0 %v3504_v22 }
 0x100   :  { %1006 = vmatpush1.bf16.msra.mxu0 %v3475_v23  ;;  %986 = vmatprep.mubr.bf16.mxu0 %v3511_v24 }
 0x101   :  { %1007 = vmatprep.subr.bf16.mxu0 %v3480_v25 }
 0x104   :  { %1008 = vmatpush1.bf16.msra.mxu0 %v3478_v26 }
 0x105   :  { %1009 = vmatprep.subr.bf16.mxu0 %v3483_v27 }
 0x107   :  { %987 = vmatmul.mubr.bf16.gmra.mrb[12].mxu0 %v3513_v28 }
 0x108   :  { %1010 = vmatpush1.bf16.msra.mxu0 %v3481_v29  ;;  %1029 = vmatprep.mubr.bf16.mxu0 %v3522_v30 }
 0x109   :  { %1011 = vmatprep.subr.bf16.mxu0 %v3486_v31 }
 0x10c   :  { %1012 = vmatpush1.bf16.msra.mxu0 %v3484_v32 }
 0x10d   :  { %1013 = vmatprep.subr.bf16.mxu0 %v3489_v33 }
 0x110   :  { %1014 = vmatpush1.bf16.msra.mxu0 %v3487_v34 }
 0x111   :  { %1015 = vmatprep.subr.bf16.mxu0 %v3492_v35 }
 0x114   :  { %1016 = vmatpush1.bf16.msra.mxu0 %v3490_v36 }
 0x115   :  { %1017 = vmatprep.subr.bf16.mxu0 %v3498_v37 }
 0x118   :  { %1018 = vmatpush1.bf16.msra.mxu0 %v3496_v38 }
 0x119   :  { %1019 = vmatprep.subr.bf16.mxu0 %v3501_v39 }
 0x11c   :  { %1020 = vmatpush1.bf16.msra.mxu0 %v3499_v40 }
 0x11d   :  { %1021 = vmatprep.subr.bf16.mxu0 %v3507_v41 }
 0x120   :  { %1022 = vmatpush1.bf16.msra.mxu0 %v3505_v42 }
 0x121   :  { %1023 = vmatprep.subr.bf16.mxu0 %v3510_v43 }
 0x124   :  { %1024 = vmatpush1.bf16.msra.mxu0 %v3508_v44 }
 0x125   :  { %1025 = vmatprep.subr.bf16.mxu0 %v3516_v45 }
 0x128   :  { %1026 = vmatpush1.bf16.msra.mxu0 %v3514_v46 }
 0x129   :  { %1027 = vmatprep.subr.bf16.mxu0 %v3519_v47 }
 0x12c   :  { %1028 = vmatpush1.bf16.msra.mxu0 %v3517_v48 }
 0x12f   :  { %1030 = vmatmul.mubr.bf16.vlgmr.msra.gmra.mrb[0].mxu0 %v3520_v49 }
 0x130   :  { %1039 = vmatprep.mubr.bf16.mxu0 %v3523_v50 }
 0x137   :  { %1040 = vmatmul.mubr.bf16.gmra.mrb[4].mxu0 %v3525_v51 }
 0x138   :  { %1049 = vmatprep.mubr.bf16.mxu0 %v3526_v52 }
 0x13f   :  { %1050 = vmatmul.mubr.bf16.gmra.mrb[8].mxu0 %v3528_v53  ;;  %v4202_v53 = vld [vmem:[#allocation8 + $0x4] ss:$8 sps:$4 sm:$0xff]  }
 0x140   :  { %1059 = vmatprep.mubr.bf16.mxu0 %v3529_v54  ;;  %v4204_v54 = vld [vmem:[#allocation8] ss:$8 sps:$4 sm:$0xff]   ;;  %1204 = vmatprep.subr.bf16.mxu1 %v4202_v53 }
 0x141   :  { %1205 = vmatpush1.bf16.msra.mxu1 %v4204_v54 }
 0x147   :  { %1060 = vmatmul.mubr.bf16.gmra.mrb[12].mxu0 %v3531_v55  ;;  %v4206_v55 = vld [vmem:[#allocation8 + $0x14] ss:$8 sps:$4 sm:$0xff]  }
 0x148   :  { %1206 = vmatprep.subr.bf16.mxu1 %v4206_v55 }
 0x149   :  { %1207 = vmatpush1.bf16.msra.mxu1 %v4210_v56 }
 0x14a   :  { %1208 = vmatprep.subr.bf16.mxu1 %v4213_v59 }
 0x202   :  { %v1031_v63 = vpop.f32.mrb[0].mxu0 }
 0x203   :  { %v3286_v0 = vadd.f32 %v1031_v63, %v244_v61  ;;  %v1033_v1 = vpop.f32.mrb[1].mxu0 }
 0x204   :  { %v4162_v2 = vadd.f32 %v1033_v1, %v248_v62  ;;  %v1035_v3 = vpop.f32.mrb[2].mxu0  ;;  %v4224_v1 = vld [vmem:[#allocation8 + $0x30] ss:$8 sps:$4 sm:$0xff]  }
 0x205   :  { %3572 = vtanh.f32 %v3286_v0  ;;  %v4164_v4 = vadd.f32 %v1035_v3, %v244_v61  ;;  %v1037_v5 = vpop.f32.mrb[3].mxu0  ;;  %v3189_v33 = vmul.f32 -1.442695, %v3286_v0  ;;  %v4005_v3 = vmov 0  }
 0x206   :  { %v4166_v6 = vadd.f32 %v1037_v5, %v248_v62  ;;  %1236 = vmatprep.mubr.bf16.mxu1 %v4005_v3  ;;  %2685 = vmatprep.mubr.bf16.mxu0 %v4005_v3 }
 0x20a   :  { %v1041_v7 = vpop.f32.mrb[4].mxu0 }
 0x20b   :  { %v4168_v8 = vadd.f32 %v1041_v7, %v244_v61  ;;  %v1043_v9 = vpop.f32.mrb[5].mxu0 }
 0x20c   :  { %v4170_v10 = vadd.f32 %v1043_v9, %v248_v62  ;;  %v1045_v11 = vpop.f32.mrb[6].mxu0 }
 0x20d   :  { %v4172_v12 = vadd.f32 %v1045_v11, %v244_v61  ;;  %v1047_v13 = vpop.f32.mrb[7].mxu0 }
 0x20e   :  { %v4174_v14 = vadd.f32 %v1047_v13, %v248_v62 }
 0x20f   :  { %v3573_v15 = vpop.eup %3572 }
 0x210   :  { %1106 = vrot.lane.b32.xlu0 %v3573_v15, %s4004_s3 }
 0x212   :  { %v1051_v16 = vpop.f32.mrb[8].mxu0 }
 0x213   :  { %v4177_v17 = vadd.f32 %v1051_v16, %v244_v61  ;;  %v1053_v18 = vpop.f32.mrb[9].mxu0 }
 0x214   :  { %v4179_v19 = vadd.f32 %v1053_v18, %v248_v62  ;;  %v1055_v20 = vpop.f32.mrb[10].mxu0 }
 0x215   :  { %v4181_v21 = vadd.f32 %v1055_v20, %v244_v61  ;;  %v1057_v22 = vpop.f32.mrb[11].mxu0 }
 0x216   :  { %v4183_v23 = vadd.f32 %v1057_v22, %v248_v62 }
 0x21a   :  { %v1061_v24 = vpop.f32.mrb[12].mxu0 }
 0x21b   :  { %v4185_v25 = vadd.f32 %v1061_v24, %v244_v61  ;;  %v1063_v26 = vpop.f32.mrb[13].mxu0 }
 0x21c   :  { %v4187_v27 = vadd.f32 %v1063_v26, %v248_v62  ;;  %v1065_v28 = vpop.f32.mrb[14].mxu0 }
 0x21d   :  { %v4189_v29 = vadd.f32 %v1065_v28, %v244_v61  ;;  %v1067_v30 = vpop.f32.mrb[15].mxu0  ;;  %v4216_v61 = vld [vmem:[#allocation8 + $0x20] ss:$8 sps:$4 sm:$0xff]  }
 0x21e   :  { %v3301_v31 = vadd.f32 %v1067_v30, %v248_v62  ;;  %v4219_v62 = vld [vmem:[#allocation8 + $0x34] ss:$8 sps:$4 sm:$0xff]   ;;  %1209 = vmatpush1.bf16.msra.mxu1 %v4216_v61 }
 0x21f   :  { %1210 = vmatprep.subr.bf16.mxu1 %v4219_v62 }
 0x220   :  { %3574 = vtanh.f32 %v3301_v31  ;;  %v3190_v36 = vmul.f32 -1.442695, %v3301_v31 }
 0x221   :  { %3576 = vpow2.f32 %v3189_v33 }
 0x222   :  { %1211 = vmatpush1.bf16.msra.mxu1 %v4224_v1 }
 0x223   :  { %1312 = vmatprep.subr.bf16.mxu1 %v4202_v53 }
 0x22a   :  { %v3575_v32 = vpop.eup %3574 }
 0x22b   :  { %1130 = vrot.lane.b32.xlu0 %v3575_v32, %s4004_s3  ;;  %v3577_v34 = vpop.eup %3576 }
 0x22c   :  { %v1100_v35 = vadd.f32 1.0, %v3577_v34 }
 0x22e   :  { %3578 = vrcp.f32 %v1100_v35 }
 0x22f   :  { %3580 = vpow2.f32 %v3190_v36 }
 0x238   :  { %v3579_v37 = vpop.eup %3578 }
 0x239   :  { %v3581_v40 = vpop.eup %3580  ;;  %v1104_v45 = vmul.f32 0.0, %v3579_v37 }
 0x23a   :  { %v1124_v41 = vadd.f32 1.0, %v3581_v40 }
 0x23c   :  { %3582 = vrcp.f32 %v1124_v41 }
 0x246   :  { %v3583_v42 = vpop.eup %3582 }
 0x247   :  { %v1128_v49 = vmul.f32 0.0, %v3583_v42 }
 0x282   :  { %v1107_v38 = vpop.permute.xlu0 %1106 }
 0x283   :  { %v1109_v39 = vmul.f32 %v3579_v37, %v1107_v38 }
 0x285   :  { %1111 = vrot.lane.b32.xlu1 %v1109_v39, %s4004_s3 }
 0x29d   :  { %v1131_v43 = vpop.permute.xlu0 %1130 }
 0x29e   :  { %v1133_v44 = vmul.f32 %v3583_v42, %v1131_v43 }
 0x2a0   :  { %1135 = vrot.lane.b32.xlu1 %v1133_v44, %s4004_s3 }
 0x2f7   :  { %v1112_v46 = vpop.permute.xlu1 %1111 }
 0x2f8   :  { %v4194_v47 = vadd.f32 %v1112_v46, %v1104_v45 }
 0x2fa   :  { %3584 = vtanh.f32 %v4194_v47 }
 0x304   :  { %v3585_v48 = vpop.eup %3584 }
 0x305   :  { %1117 = vrot.lane.b32.xlu0 %v3585_v48, %s4004_s3 }
 0x312   :  { %v1136_v50 = vpop.permute.xlu1 %1135 }
 0x313   :  { %v4198_v51 = vadd.f32 %v1136_v50, %v1128_v49 }
 0x315   :  { %3586 = vtanh.f32 %v4198_v51 }
 0x31f   :  { %v3587_v52 = vpop.eup %3586 }
 0x320   :  { %1141 = vrot.lane.b32.xlu1 %v3587_v52, %s4004_s3 }
 0x377   :  { %v1118_v63 = vpop.permute.xlu0 %1117 }
 0x378   :  { %v1120_v0 = vmul.f32 %v3579_v37, %v1118_v63 }
 0x37a   :  { %1150 = vrot.lane.b32.xlu0 %v1120_v0, %s4002_s5 }
 0x392   :  { %v1142_v5 = vpop.permute.xlu1 %1141 }
 0x393   :  { %v1144_v7 = vmul.f32 %v3583_v42, %v1142_v5 }
 0x395   :  { %1154 = vrot.lane.b32.xlu1 %v1144_v7, %s4006_s27 }
 0x3ec   :  { %v4231_v9 = vpop.permute.xlu0 %1150 }
 0x407   :  { %v4233_v11 = vpop.permute.xlu1 %1154 }
 0x408   :  { %v1158_v13 = vsel %vm1157_vm0, %v4231_v9, %v4233_v11 }
 0x409   :  { %v1159_v15 = vpack.c.bf16 %v1158_v13, %v1158_v13 }
 0x40b   :  { %3199 = vmatmul.mubr.msk.bf16.vlgmr.msra.gmra.mrb[0].mxu1 %vm1200_vm1, %v1159_v15 }
 0x40c   :  { %1313 = vmatpush1.bf16.msra.mxu1 %v4204_v54  ;;  %1344 = vmatprep.mubr.bf16.mxu1 %v4005_v3 }
 0x40d   :  { %1314 = vmatprep.subr.bf16.mxu1 %v4206_v55 }
 0x410   :  { %1315 = vmatpush1.bf16.msra.mxu1 %v4210_v56 }
 0x411   :  { %1316 = vmatprep.subr.bf16.mxu1 %v4213_v59 }
 0x414   :  { %1317 = vmatpush1.bf16.msra.mxu1 %v4216_v61 }
 0x415   :  { %1318 = vmatprep.subr.bf16.mxu1 %v4219_v62 }
 0x418   :  { %1319 = vmatpush1.bf16.msra.mxu1 %v4224_v1 }
 0x419   :  { %1420 = vmatprep.subr.bf16.mxu1 %v4202_v53 }
 0x4de   :  { %v1238_v16 = vpop.f32.mrb[0].mxu1 }
 0x4df   :  { %v1245_v18 = vadd.f32 %v4164_v4, %v1238_v16  ;;  %v1240_v20 = vpop.f32.mrb[1].mxu1 }
 0x4e0   :  { %v1246_v22 = vadd.f32 %v4187_v27, %v1240_v20  ;;  %v1242_v24 = vpop.f32.mrb[2].mxu1 }
 0x4e1   :  { %3588 = vtanh.f32 %v1245_v18  ;;  %v1243_v26 = vpop.f32.mrb[3].mxu1  ;;  %v3200_v31 = vmul.f32 -1.442695, %v1245_v18 }
 0x4e2   :  { %3590 = vtanh.f32 %v1246_v22  ;;  %v3201_v32 = vmul.f32 -1.442695, %v1246_v22 }
 0x4e3   :  { %3592 = vpow2.f32 %v3200_v31 }
 0x4e4   :  { %3594 = vpow2.f32 %v3201_v32 }
 0x4eb   :  { %v3589_v28 = vpop.eup %3588 }
 0x4ec   :  { %v3591_v30 = vpop.eup %3590  ;;  %1256 = vrot.lane.b32.xlu0 %v3589_v28, %s4004_s3 }
 0x4ed   :  { %1280 = vrot.lane.b32.xlu1 %v3591_v30, %s4004_s3  ;;  %v3593_v33 = vpop.eup %3592 }
 0x4ee   :  { %v3595_v34 = vpop.eup %3594  ;;  %v1250_v4 = vadd.f32 1.0, %v3593_v33 }
 0x4ef   :  { %v1274_v35 = vadd.f32 1.0, %v3595_v34 }
 0x4f0   :  { %3596 = vrcp.f32 %v1250_v4 }
 0x4f1   :  { %3598 = vrcp.f32 %v1274_v35 }
 0x4fa   :  { %v3597_v27 = vpop.eup %3596 }
 0x4fb   :  { %v3599_v37 = vpop.eup %3598  ;;  %v1254_v41 = vmul.f32 %v3597_v27, %v4194_v47 }
 0x4fc   :  { %v1278_v43 = vmul.f32 %v3599_v37, %v4198_v51 }
 0x55e   :  { %v1257_v36 = vpop.permute.xlu0 %1256 }
 0x55f   :  { %v1259_v38 = vmul.f32 %v3597_v27, %v1257_v36  ;;  %v1281_v39 = vpop.permute.xlu1 %1280 }
 0x560   :  { %v1283_v40 = vmul.f32 %v3599_v37, %v1281_v39 }
 0x561   :  { %1261 = vrot.lane.b32.xlu0 %v1259_v38, %s4004_s3 }
 0x562   :  { %1285 = vrot.lane.b32.xlu1 %v1283_v40, %s4004_s3 }
 0x5d3   :  { %v1262_v42 = vpop.permute.xlu0 %1261 }
 0x5d4   :  { %v1264_v44 = vadd.f32 %v1262_v42, %v1254_v41  ;;  %v1286_v45 = vpop.permute.xlu1 %1285 }
 0x5d5   :  { %v1288_v46 = vadd.f32 %v1286_v45, %v1278_v43 }
 0x5d6   :  { %3600 = vtanh.f32 %v1264_v44 }
 0x5d7   :  { %3602 = vtanh.f32 %v1288_v46 }
 0x5e0   :  { %v3601_v48 = vpop.eup %3600 }
 0x5e1   :  { %v3603_v49 = vpop.eup %3602  ;;  %1267 = vrot.lane.b32.xlu0 %v3601_v48, %s4004_s3 }
 0x5e2   :  { %1291 = vrot.lane.b32.xlu1 %v3603_v49, %s4004_s3 }
 0x653   :  { %v1268_v50 = vpop.permute.xlu0 %1267 }
 0x654   :  { %v1292_v52 = vpop.permute.xlu1 %1291  ;;  %v1270_v63 = vmul.f32 %v3597_v27, %v1268_v50 }
 0x655   :  { %v1294_v0 = vmul.f32 %v3599_v37, %v1292_v52 }
 0x656   :  { %1300 = vrot.lane.b32.xlu0 %v1270_v63, %s4002_s5 }
 0x657   :  { %1304 = vrot.lane.b32.xlu1 %v1294_v0, %s4006_s27 }
 0x6c8   :  { %v4260_v47 = vpop.permute.xlu0 %1300 }
 0x6c9   :  { %v4262_v51 = vpop.permute.xlu1 %1304 }
 0x6ca   :  { %v1307_v5 = vsel %vm1157_vm0, %v4260_v47, %v4262_v51 }
 0x6cb   :  { %v1308_v7 = vpack.c.bf16 %v1307_v5, %v1307_v5 }
 0x6cd   :  { %3202 = vmatmul.mubr.msk.bf16.vlgmr.msra.gmra.mrb[4].mxu1 %vm1200_vm1, %v1308_v7 }
 0x6ce   :  { %1421 = vmatpush1.bf16.msra.mxu1 %v4204_v54  ;;  %1452 = vmatprep.mubr.bf16.mxu1 %v4005_v3 }
 0x6cf   :  { %1422 = vmatprep.subr.bf16.mxu1 %v4206_v55 }
 0x6d2   :  { %1423 = vmatpush1.bf16.msra.mxu1 %v4210_v56 }
 0x6d3   :  { %1424 = vmatprep.subr.bf16.mxu1 %v4213_v59 }
 0x6d6   :  { %1425 = vmatpush1.bf16.msra.mxu1 %v4216_v61 }
 0x6d7   :  { %1426 = vmatprep.subr.bf16.mxu1 %v4219_v62 }
 0x6da   :  { %1427 = vmatpush1.bf16.msra.mxu1 %v4224_v1 }
 0x6db   :  { %1526 = vmatprep.subr.bf16.mxu1 %v4202_v53 }
 0x7a0   :  { %v1346_v13 = vpop.f32.mrb[4].mxu1 }
 0x7a1   :  { %v1353_v15 = vadd.f32 %v4168_v8, %v1346_v13  ;;  %v1348_v16 = vpop.f32.mrb[5].mxu1 }
 0x7a2   :  { %v1354_v18 = vadd.f32 %v4183_v23, %v1348_v16  ;;  %v1350_v20 = vpop.f32.mrb[6].mxu1 }
 0x7a3   :  { %3604 = vtanh.f32 %v1353_v15  ;;  %v1351_v22 = vpop.f32.mrb[7].mxu1  ;;  %v3203_v28 = vmul.f32 -1.442695, %v1353_v15 }
 0x7a4   :  { %3606 = vtanh.f32 %v1354_v18  ;;  %v3204_v30 = vmul.f32 -1.442695, %v1354_v18 }
 0x7a5   :  { %3608 = vpow2.f32 %v3203_v28 }
 0x7a6   :  { %3610 = vpow2.f32 %v3204_v30 }
 0x7ad   :  { %v3605_v24 = vpop.eup %3604 }
 0x7ae   :  { %v3607_v26 = vpop.eup %3606  ;;  %1364 = vrot.lane.b32.xlu0 %v3605_v24, %s4004_s3 }
 0x7af   :  { %1388 = vrot.lane.b32.xlu1 %v3607_v26, %s4004_s3  ;;  %v3609_v31 = vpop.eup %3608 }
 0x7b0   :  { %v3611_v32 = vpop.eup %3610  ;;  %v1358_v8 = vadd.f32 1.0, %v3609_v31 }
 0x7b1   :  { %v1382_v33 = vadd.f32 1.0, %v3611_v32 }
 0x7b2   :  { %3612 = vrcp.f32 %v1358_v8 }
 0x7b3   :  { %3614 = vrcp.f32 %v1382_v33 }
 0x7bc   :  { %v3613_v23 = vpop.eup %3612 }
 0x7bd   :  { %v3615_v4 = vpop.eup %3614  ;;  %v1362_v37 = vmul.f32 %v3613_v23, %v1264_v44 }
 0x7be   :  { %v1386_v39 = vmul.f32 %v3615_v4, %v1288_v46 }
 0x820   :  { %v1365_v34 = vpop.permute.xlu0 %1364 }
 0x821   :  { %v1367_v35 = vmul.f32 %v3613_v23, %v1365_v34  ;;  %v1389_v27 = vpop.permute.xlu1 %1388 }
 0x822   :  { %v1391_v36 = vmul.f32 %v3615_v4, %v1389_v27 }
 0x823   :  { %1369 = vrot.lane.b32.xlu0 %v1367_v35, %s4004_s3 }
 0x824   :  { %1393 = vrot.lane.b32.xlu1 %v1391_v36, %s4004_s3 }
 0x895   :  { %v1370_v38 = vpop.permute.xlu0 %1369 }
 0x896   :  { %v1372_v40 = vadd.f32 %v1370_v38, %v1362_v37  ;;  %v1394_v41 = vpop.permute.xlu1 %1393 }
 0x897   :  { %v1396_v42 = vadd.f32 %v1394_v41, %v1386_v39 }
 0x898   :  { %3616 = vtanh.f32 %v1372_v40 }
 0x899   :  { %3618 = vtanh.f32 %v1396_v42 }
 0x8a2   :  { %v3617_v43 = vpop.eup %3616 }
 0x8a3   :  { %v3619_v45 = vpop.eup %3618  ;;  %1375 = vrot.lane.b32.xlu0 %v3617_v43, %s4004_s3 }
 0x8a4   :  { %1399 = vrot.lane.b32.xlu1 %v3619_v45, %s4004_s3 }
 0x915   :  { %v1376_v48 = vpop.permute.xlu0 %1375 }
 0x916   :  { %v1400_v49 = vpop.permute.xlu1 %1399  ;;  %v1378_v50 = vmul.f32 %v3613_v23, %v1376_v48 }
 0x917   :  { %v1402_v52 = vmul.f32 %v3615_v4, %v1400_v49 }
 0x918   :  { %1408 = vrot.lane.b32.xlu0 %v1378_v50, %s4002_s5 }
 0x919   :  { %1412 = vrot.lane.b32.xlu1 %v1402_v52, %s4006_s27 }
 0x98a   :  { %v4287_v44 = vpop.permute.xlu0 %1408 }
 0x98b   :  { %v4289_v46 = vpop.permute.xlu1 %1412 }
 0x98c   :  { %v1415_v63 = vsel %vm1157_vm0, %v4287_v44, %v4289_v46 }
 0x98d   :  { %v1416_v0 = vpack.c.bf16 %v1415_v63, %v1415_v63 }
 0x98f   :  { %3205 = vmatmul.mubr.msk.bf16.vlgmr.msra.gmra.mrb[8].mxu1 %vm1200_vm1, %v1416_v0 }
 0x990   :  { %1527 = vmatpush1.bf16.msra.mxu1 %v4204_v54  ;;  %1558 = vmatprep.mubr.bf16.mxu1 %v4005_v3 }
 0x991   :  { %1528 = vmatprep.subr.bf16.mxu1 %v4206_v55 }
 0x994   :  { %1529 = vmatpush1.bf16.msra.mxu1 %v4210_v56 }
 0x995   :  { %1530 = vmatprep.subr.bf16.mxu1 %v4213_v59 }
 0x998   :  { %1531 = vmatpush1.bf16.msra.mxu1 %v4216_v61 }
 0x999   :  { %1532 = vmatprep.subr.bf16.mxu1 %v4219_v62 }
 0x99c   :  { %1533 = vmatpush1.bf16.msra.mxu1 %v4224_v1 }
 0x99d   :  { %1632 = vmatprep.subr.bf16.mxu1 %v4202_v53 }
 0xa62   :  { %v1454_v5 = vpop.f32.mrb[8].mxu1 }
 0xa63   :  { %v1461_v7 = vadd.f32 %v4172_v12, %v1454_v5  ;;  %v1456_v13 = vpop.f32.mrb[9].mxu1 }
 0xa64   :  { %v1462_v15 = vadd.f32 %v4179_v19, %v1456_v13  ;;  %v1458_v16 = vpop.f32.mrb[10].mxu1 }
 0xa65   :  { %3620 = vtanh.f32 %v1461_v7  ;;  %v1459_v18 = vpop.f32.mrb[11].mxu1  ;;  %v3206_v24 = vmul.f32 -1.442695, %v1461_v7 }
 0xa66   :  { %3622 = vtanh.f32 %v1462_v15  ;;  %v3207_v26 = vmul.f32 -1.442695, %v1462_v15 }
 0xa67   :  { %3624 = vpow2.f32 %v3206_v24 }
 0xa68   :  { %3626 = vpow2.f32 %v3207_v26 }
 0xa6f   :  { %v3621_v20 = vpop.eup %3620 }
 0xa70   :  { %v3623_v22 = vpop.eup %3622  ;;  %1472 = vrot.lane.b32.xlu0 %v3621_v20, %s4004_s3 }
 0xa71   :  { %1496 = vrot.lane.b32.xlu1 %v3623_v22, %s4004_s3  ;;  %v3625_v28 = vpop.eup %3624 }
 0xa72   :  { %v3627_v30 = vpop.eup %3626  ;;  %v1466_v12 = vadd.f32 1.0, %v3625_v28 }
 0xa73   :  { %v1490_v31 = vadd.f32 1.0, %v3627_v30 }
 0xa74   :  { %3628 = vrcp.f32 %v1466_v12 }
 0xa75   :  { %3630 = vrcp.f32 %v1490_v31 }
 0xa7e   :  { %v3629_v19 = vpop.eup %3628 }
 0xa7f   :  { %v3631_v8 = vpop.eup %3630  ;;  %v1470_v4 = vmul.f32 %v3629_v19, %v1372_v40 }
 0xa80   :  { %v1494_v27 = vmul.f32 %v3631_v8, %v1396_v42 }
 0xae2   :  { %v1473_v32 = vpop.permute.xlu0 %1472 }
 0xae3   :  { %v1475_v33 = vmul.f32 %v3629_v19, %v1473_v32  ;;  %v1497_v23 = vpop.permute.xlu1 %1496 }
 0xae4   :  { %v1499_v34 = vmul.f32 %v3631_v8, %v1497_v23 }
 0xae5   :  { %1477 = vrot.lane.b32.xlu0 %v1475_v33, %s4004_s3 }
 0xae6   :  { %1501 = vrot.lane.b32.xlu1 %v1499_v34, %s4004_s3 }
 0xb57   :  { %v1478_v35 = vpop.permute.xlu0 %1477 }
 0xb58   :  { %v1480_v36 = vadd.f32 %v1478_v35, %v1470_v4  ;;  %v1502_v37 = vpop.permute.xlu1 %1501 }
 0xb59   :  { %v1504_v38 = vadd.f32 %v1502_v37, %v1494_v27 }
 0xb5a   :  { %3632 = vtanh.f32 %v1480_v36 }
 0xb5b   :  { %3634 = vtanh.f32 %v1504_v38 }
 0xb64   :  { %v3633_v39 = vpop.eup %3632 }
 0xb65   :  { %v3635_v41 = vpop.eup %3634  ;;  %1483 = vrot.lane.b32.xlu0 %v3633_v39, %s4004_s3 }
 0xb66   :  { %1507 = vrot.lane.b32.xlu1 %v3635_v41, %s4004_s3 }
 0xbd7   :  { %v1484_v43 = vpop.permute.xlu0 %1483 }
 0xbd8   :  { %v1508_v45 = vpop.permute.xlu1 %1507  ;;  %v1486_v48 = vmul.f32 %v3629_v19, %v1484_v43 }
 0xbd9   :  { %v1510_v49 = vmul.f32 %v3631_v8, %v1508_v45 }
 0xbda   :  { %1514 = vrot.lane.b32.xlu0 %v1486_v48, %s4002_s5 }
 0xbdb   :  { %1518 = vrot.lane.b32.xlu1 %v1510_v49, %s4006_s27 }
 0xc4c   :  { %v4314_v40 = vpop.permute.xlu0 %1514 }
 0xc4d   :  { %v4316_v42 = vpop.permute.xlu1 %1518 }
 0xc4e   :  { %v1521_v50 = vsel %vm1157_vm0, %v4314_v40, %v4316_v42 }
 0xc4f   :  { %v1522_v52 = vpack.c.bf16 %v1521_v50, %v1521_v50 }
 0xc51   :  { %3208 = vmatmul.mubr.msk.bf16.vlgmr.msra.gmra.mrb[12].mxu1 %vm1200_vm1, %v1522_v52 }
 0xc52   :  { %1633 = vmatpush1.bf16.msra.mxu1 %v4204_v54  ;;  %1664 = vmatprep.mubr.bf16.mxu1 %v4005_v3 }
 0xc53   :  { %1634 = vmatprep.subr.bf16.mxu1 %v4206_v55 }
 0xc56   :  { %1635 = vmatpush1.bf16.msra.mxu1 %v4210_v56 }
 0xc57   :  { %1636 = vmatprep.subr.bf16.mxu1 %v4213_v59 }
 0xc5a   :  { %1637 = vmatpush1.bf16.msra.mxu1 %v4216_v61 }
 0xc5b   :  { %1638 = vmatprep.subr.bf16.mxu1 %v4219_v62 }
 0xc5e   :  { %1639 = vmatpush1.bf16.msra.mxu1 %v4224_v1 }
 0xc5f   :  { %1738 = vmatprep.subr.bf16.mxu1 %v4202_v53 }
 0xd24   :  { %v1560_v63 = vpop.f32.mrb[12].mxu1 }
 0xd25   :  { %v1567_v0 = vadd.f32 %v4177_v17, %v1560_v63  ;;  %v1562_v5 = vpop.f32.mrb[13].mxu1 }
 0xd26   :  { %v1568_v7 = vadd.f32 %v4174_v14, %v1562_v5  ;;  %v1564_v13 = vpop.f32.mrb[14].mxu1 }
 0xd27   :  { %3636 = vtanh.f32 %v1567_v0  ;;  %v1565_v15 = vpop.f32.mrb[15].mxu1  ;;  %v3209_v20 = vmul.f32 -1.442695, %v1567_v0 }
 0xd28   :  { %3638 = vtanh.f32 %v1568_v7  ;;  %v3210_v22 = vmul.f32 -1.442695, %v1568_v7 }
 0xd29   :  { %3640 = vpow2.f32 %v3209_v20 }
 0xd2a   :  { %3642 = vpow2.f32 %v3210_v22 }
 0xd31   :  { %v3637_v16 = vpop.eup %3636 }
 0xd32   :  { %v3639_v18 = vpop.eup %3638  ;;  %1578 = vrot.lane.b32.xlu0 %v3637_v16, %s4004_s3 }
 0xd33   :  { %1602 = vrot.lane.b32.xlu1 %v3639_v18, %s4004_s3  ;;  %v3641_v24 = vpop.eup %3640 }
 0xd34   :  { %v3643_v26 = vpop.eup %3642  ;;  %v1572_v17 = vadd.f32 1.0, %v3641_v24 }
 0xd35   :  { %v1596_v28 = vadd.f32 1.0, %v3643_v26 }
 0xd36   :  { %3644 = vrcp.f32 %v1572_v17 }
 0xd37   :  { %3646 = vrcp.f32 %v1596_v28 }
 0xd40   :  { %v3645_v14 = vpop.eup %3644 }
 0xd41   :  { %v3647_v12 = vpop.eup %3646  ;;  %v1576_v8 = vmul.f32 %v3645_v14, %v1480_v36 }
 0xd42   :  { %v1600_v23 = vmul.f32 %v3647_v12, %v1504_v38 }
 0xda4   :  { %v1579_v30 = vpop.permute.xlu0 %1578 }
 0xda5   :  { %v1581_v31 = vmul.f32 %v3645_v14, %v1579_v30  ;;  %v1603_v19 = vpop.permute.xlu1 %1602 }
 0xda6   :  { %v1605_v32 = vmul.f32 %v3647_v12, %v1603_v19 }
 0xda7   :  { %1583 = vrot.lane.b32.xlu0 %v1581_v31, %s4004_s3 }
 0xda8   :  { %1607 = vrot.lane.b32.xlu1 %v1605_v32, %s4004_s3 }
 0xe19   :  { %v1584_v33 = vpop.permute.xlu0 %1583 }
 0xe1a   :  { %v1586_v34 = vadd.f32 %v1584_v33, %v1576_v8  ;;  %v1608_v4 = vpop.permute.xlu1 %1607 }
 0xe1b   :  { %v1610_v35 = vadd.f32 %v1608_v4, %v1600_v23 }
 0xe1c   :  { %3648 = vtanh.f32 %v1586_v34 }
 0xe1d   :  { %3650 = vtanh.f32 %v1610_v35 }
 0xe26   :  { %v3649_v27 = vpop.eup %3648 }
 0xe27   :  { %v3651_v37 = vpop.eup %3650  ;;  %1589 = vrot.lane.b32.xlu0 %v3649_v27, %s4004_s3 }
 0xe28   :  { %1613 = vrot.lane.b32.xlu1 %v3651_v37, %s4004_s3 }
 0xe99   :  { %v1590_v39 = vpop.permute.xlu0 %1589 }
 0xe9a   :  { %v1592_v41 = vmul.f32 %v3645_v14, %v1590_v39  ;;  %v1614_v43 = vpop.permute.xlu1 %1613 }
 0xe9b   :  { %v1616_v45 = vmul.f32 %v3647_v12, %v1614_v43 }
 0xe9c   :  { %1620 = vrot.lane.b32.xlu0 %v1592_v41, %s4002_s5 }
 0xe9d   :  { %1624 = vrot.lane.b32.xlu1 %v1616_v45, %s4006_s27 }
 0xf0e   :  { %v4341_v36 = vpop.permute.xlu0 %1620 }
 0xf0f   :  { %v4343_v38 = vpop.permute.xlu1 %1624 }
 0xf10   :  { %v1627_v48 = vsel %vm1157_vm0, %v4341_v36, %v4343_v38 }
 0xf11   :  { %v1628_v49 = vpack.c.bf16 %v1627_v48, %v1627_v48 }
 0xf13   :  { %3211 = vmatmul.mubr.msk.bf16.vlgmr.msra.gmra.mrb[16].mxu1 %vm1200_vm1, %v1628_v49 }
 0xf14   :  { %1739 = vmatpush1.bf16.msra.mxu1 %v4204_v54  ;;  %1770 = vmatprep.mubr.bf16.mxu1 %v4005_v3 }
 0xf15   :  { %1740 = vmatprep.subr.bf16.mxu1 %v4206_v55 }
 0xf18   :  { %1741 = vmatpush1.bf16.msra.mxu1 %v4210_v56 }
 0xf19   :  { %1742 = vmatprep.subr.bf16.mxu1 %v4213_v59 }
 0xf1c   :  { %1743 = vmatpush1.bf16.msra.mxu1 %v4216_v61 }
 0xf1d   :  { %1744 = vmatprep.subr.bf16.mxu1 %v4219_v62 }
 0xf20   :  { %1745 = vmatpush1.bf16.msra.mxu1 %v4224_v1 }
 0xf21   :  { %1844 = vmatprep.subr.bf16.mxu1 %v4202_v53 }
 0xfe6   :  { %v1666_v50 = vpop.f32.mrb[16].mxu1 }
 0xfe7   :  { %v1673_v52 = vadd.f32 %v4181_v21, %v1666_v50  ;;  %v1668_v63 = vpop.f32.mrb[17].mxu1 }
 0xfe8   :  { %v1674_v0 = vadd.f32 %v4170_v10, %v1668_v63  ;;  %v1670_v5 = vpop.f32.mrb[18].mxu1 }
 0xfe9   :  { %3652 = vtanh.f32 %v1673_v52  ;;  %v1671_v7 = vpop.f32.mrb[19].mxu1  ;;  %v3212_v16 = vmul.f32 -1.442695, %v1673_v52 }
 0xfea   :  { %3654 = vtanh.f32 %v1674_v0  ;;  %v3213_v18 = vmul.f32 -1.442695, %v1674_v0 }
 0xfeb   :  { %3656 = vpow2.f32 %v3212_v16 }
 0xfec   :  { %3658 = vpow2.f32 %v3213_v18 }
 0xff3   :  { %v3653_v13 = vpop.eup %3652 }
 0xff4   :  { %v3655_v15 = vpop.eup %3654  ;;  %1684 = vrot.lane.b32.xlu0 %v3653_v13, %s4004_s3 }
 0xff5   :  { %1708 = vrot.lane.b32.xlu1 %v3655_v15, %s4004_s3  ;;  %v3657_v53 = vpop.eup %3656 }
 0xff6   :  { %v3659_v20 = vpop.eup %3658  ;;  %v1678_v21 = vadd.f32 1.0, %v3657_v53 }
 0xff7   :  { %v1702_v22 = vadd.f32 1.0, %v3659_v20 }
 0xff8   :  { %3660 = vrcp.f32 %v1678_v21 }
 0xff9   :  { %3662 = vrcp.f32 %v1702_v22 }
0x1002   :  { %v3661_v10 = vpop.eup %3660 }
0x1003   :  { %v3663_v26 = vpop.eup %3662  ;;  %v1682_v30 = vmul.f32 %v3661_v10, %v1586_v34 }
0x1004   :  { %v1706_v31 = vmul.f32 %v3663_v26, %v1610_v35 }
0x1066   :  { %v1685_v24 = vpop.permute.xlu0 %1684 }
0x1067   :  { %v1687_v17 = vmul.f32 %v3661_v10, %v1685_v24  ;;  %v1709_v28 = vpop.permute.xlu1 %1708 }
0x1068   :  { %v1711_v14 = vmul.f32 %v3663_v26, %v1709_v28 }
0x1069   :  { %1689 = vrot.lane.b32.xlu0 %v1687_v17, %s4004_s3 }
0x106a   :  { %1713 = vrot.lane.b32.xlu1 %v1711_v14, %s4004_s3 }
0x10db   :  { %v1690_v12 = vpop.permute.xlu0 %1689 }
0x10dc   :  { %v1692_v19 = vadd.f32 %v1690_v12, %v1682_v30  ;;  %v1714_v32 = vpop.permute.xlu1 %1713 }
0x10dd   :  { %v1716_v8 = vadd.f32 %v1714_v32, %v1706_v31 }
0x10de   :  { %3664 = vtanh.f32 %v1692_v19 }
0x10df   :  { %3666 = vtanh.f32 %v1716_v8 }
0x10e8   :  { %v3665_v33 = vpop.eup %3664 }
0x10e9   :  { %v3667_v23 = vpop.eup %3666  ;;  %1695 = vrot.lane.b32.xlu0 %v3665_v33, %s4004_s3 }
0x10ea   :  { %1719 = vrot.lane.b32.xlu1 %v3667_v23, %s4004_s3 }
0x115b   :  { %v1696_v4 = vpop.permute.xlu0 %1695 }
0x115c   :  { %v1698_v27 = vmul.f32 %v3661_v10, %v1696_v4  ;;  %v1720_v37 = vpop.permute.xlu1 %1719 }
0x115d   :  { %v1722_v39 = vmul.f32 %v3663_v26, %v1720_v37 }
0x115e   :  { %1726 = vrot.lane.b32.xlu0 %v1698_v27, %s4002_s5 }
0x115f   :  { %1730 = vrot.lane.b32.xlu1 %v1722_v39, %s4006_s27 }
0x11d0   :  { %v4368_v34 = vpop.permute.xlu0 %1726 }
0x11d1   :  { %v4370_v35 = vpop.permute.xlu1 %1730 }
0x11d2   :  { %v1733_v41 = vsel %vm1157_vm0, %v4368_v34, %v4370_v35 }
0x11d3   :  { %v1734_v43 = vpack.c.bf16 %v1733_v41, %v1733_v41 }
0x11d5   :  { %3214 = vmatmul.mubr.msk.bf16.vlgmr.msra.gmra.mrb[20].mxu1 %vm1200_vm1, %v1734_v43 }
0x11d6   :  { %1845 = vmatpush1.bf16.msra.mxu1 %v4204_v54  ;;  %1876 = vmatprep.mubr.bf16.mxu1 %v4005_v3 }
0x11d7   :  { %1846 = vmatprep.subr.bf16.mxu1 %v4206_v55 }
0x11da   :  { %1847 = vmatpush1.bf16.msra.mxu1 %v4210_v56 }
0x11db   :  { %1848 = vmatprep.subr.bf16.mxu1 %v4213_v59 }
0x11de   :  { %1849 = vmatpush1.bf16.msra.mxu1 %v4216_v61 }
0x11df   :  { %1850 = vmatprep.subr.bf16.mxu1 %v4219_v62 }
0x11e2   :  { %1851 = vmatpush1.bf16.msra.mxu1 %v4224_v1 }
0x12a8   :  { %v1772_v45 = vpop.f32.mrb[20].mxu1 }
0x12a9   :  { %v1779_v48 = vadd.f32 %v4185_v25, %v1772_v45  ;;  %v1774_v49 = vpop.f32.mrb[21].mxu1 }
0x12aa   :  { %v1780_v54 = vadd.f32 %v4166_v6, %v1774_v49  ;;  %v1776_v50 = vpop.f32.mrb[22].mxu1 }
0x12ab   :  { %3668 = vtanh.f32 %v1779_v48  ;;  %v1777_v52 = vpop.f32.mrb[23].mxu1  ;;  %v3215_v59 = vmul.f32 -1.442695, %v1779_v48 }
0x12ac   :  { %3670 = vtanh.f32 %v1780_v54  ;;  %v3216_v61 = vmul.f32 -1.442695, %v1780_v54 }
0x12ad   :  { %3672 = vpow2.f32 %v3215_v59 }
0x12ae   :  { %3674 = vpow2.f32 %v3216_v61 }
0x12b5   :  { %v3669_v55 = vpop.eup %3668 }
0x12b6   :  { %v3671_v56 = vpop.eup %3670  ;;  %1790 = vrot.lane.b32.xlu0 %v3669_v55, %s4004_s3 }
0x12b7   :  { %1814 = vrot.lane.b32.xlu1 %v3671_v56, %s4004_s3  ;;  %v3673_v62 = vpop.eup %3672 }
0x12b8   :  { %v3675_v1 = vpop.eup %3674  ;;  %v1784_v25 = vadd.f32 1.0, %v3673_v62 }
0x12b9   :  { %v1808_v63 = vadd.f32 1.0, %v3675_v1 }
0x12ba   :  { %3676 = vrcp.f32 %v1784_v25 }
0x12bb   :  { %3678 = vrcp.f32 %v1808_v63 }
0x12c4   :  { %v3677_v6 = vpop.eup %3676 }
0x12c5   :  { %v3679_v5 = vpop.eup %3678  ;;  %v1788_v16 = vmul.f32 %v3677_v6, %v1692_v19 }
0x12c6   :  { %v1812_v53 = vmul.f32 %v3679_v5, %v1716_v8 }
0x1328   :  { %v1791_v0 = vpop.permute.xlu0 %1790 }
0x1329   :  { %v1793_v7 = vmul.f32 %v3677_v6, %v1791_v0  ;;  %v1815_v13 = vpop.permute.xlu1 %1814  ;;  %v3546_v0 = vld [vmem:[#allocation9 + $0x4] ss:$8 sps:$4 sm:$0xff]  }
0x132a   :  { %v1817_v15 = vmul.f32 %v3679_v5, %v1815_v13  ;;  %2027 = vmatprep.subr.bf16.mxu1 %v3546_v0  ;;  %v3552_v13 = vld [vmem:[#allocation9 + $0x24] ss:$8 sps:$4 sm:$0xff]  }
0x132b   :  { %1795 = vrot.lane.b32.xlu0 %v1793_v7, %s4004_s3  ;;  %v3547_v7 = vld [vmem:[#allocation9 + $0x10] ss:$8 sps:$4 sm:$0xff]  }
0x132c   :  { %1819 = vrot.lane.b32.xlu1 %v1817_v15, %s4004_s3  ;;  %v3550_v15 = vld [vmem:[#allocation9 + $0x20] ss:$8 sps:$4 sm:$0xff]  }
0x139d   :  { %v1796_v18 = vpop.permute.xlu0 %1795 }
0x139e   :  { %v1798_v20 = vadd.f32 %v1796_v18, %v1788_v16  ;;  %v1820_v21 = vpop.permute.xlu1 %1819 }
0x139f   :  { %v1822_v22 = vadd.f32 %v1820_v21, %v1812_v53  ;;  %v3555_v53 = vld [vmem:[#allocation9 + $0x34] ss:$8 sps:$4 sm:$0xff]  }
0x13a0   :  { %3680 = vtanh.f32 %v1798_v20 }
0x13a1   :  { %3682 = vtanh.f32 %v1822_v22 }
0x13aa   :  { %v3681_v10 = vpop.eup %3680 }
0x13ab   :  { %v3683_v24 = vpop.eup %3682  ;;  %1801 = vrot.lane.b32.xlu0 %v3681_v10, %s4004_s3 }
0x13ac   :  { %1825 = vrot.lane.b32.xlu1 %v3683_v24, %s4004_s3 }
0x141d   :  { %v1802_v26 = vpop.permute.xlu0 %1801 }
0x141e   :  { %v1804_v17 = vmul.f32 %v3677_v6, %v1802_v26  ;;  %v1826_v28 = vpop.permute.xlu1 %1825  ;;  %v3544_v6 = vld [vmem:[#allocation9] ss:$8 sps:$4 sm:$0xff]  }
0x141f   :  { %v1828_v14 = vmul.f32 %v3679_v5, %v1826_v28  ;;  %v3549_v5 = vld [vmem:[#allocation9 + $0x14] ss:$8 sps:$4 sm:$0xff]  }
0x1420   :  { %1832 = vrot.lane.b32.xlu0 %v1804_v17, %s4002_s5 }
0x1421   :  { %1836 = vrot.lane.b32.xlu1 %v1828_v14, %s4006_s27 }
0x1492   :  { %v4394_v30 = vpop.permute.xlu0 %1832 }
0x1493   :  { %v4396_v12 = vpop.permute.xlu1 %1836 }
0x1494   :  { %v1839_v31 = vsel %vm1157_vm0, %v4394_v30, %v4396_v12  ;;  %v1944_v17 = vsel %vm1157_vm0, %v4260_v47, %v4396_v12  ;;  %v1947_v47 = vsel %vm1157_vm0, %v4341_v36, %v4316_v42 }
0x1495   :  { %v1840_v19 = vpack.c.bf16 %v1839_v31, %v1839_v31  ;;  %v1945_v31 = vsel %vm1157_vm0, %v4287_v44, %v4370_v35 }
0x1497   :  { %3217 = vmatmul.mubr.msk.bf16.vlgmr.msra.gmra.mrb[24].mxu1 %vm1200_vm1, %v1840_v19  ;;  %v1946_v19 = vsel %vm1157_vm0, %v4314_v40, %v4343_v38  ;;  %v1949_v40 = vsel %vm1157_vm0, %v4394_v30, %v4262_v51 }
0x1498   :  { %2059 = vmatprep.mubr.bf16.mxu1 %v4005_v3  ;;  %2028 = vmatpush1.bf16.msra.mxu1 %v3544_v6 }
0x1499   :  { %2029 = vmatprep.subr.bf16.mxu1 %v3549_v5 }
0x149c   :  { %2030 = vmatpush1.bf16.msra.mxu1 %v3547_v7 }
0x149d   :  { %2031 = vmatprep.subr.bf16.mxu1 %v3552_v13 }
0x14a0   :  { %2032 = vmatpush1.bf16.msra.mxu1 %v3550_v15 }
0x14a1   :  { %2033 = vmatprep.subr.bf16.mxu1 %v3555_v53 }
0x156a   :  { %v1878_v32 = vpop.f32.mrb[24].mxu1 }
0x156b   :  { %v1885_v8 = vadd.f32 %v4189_v29, %v1878_v32  ;;  %v1880_v33 = vpop.f32.mrb[25].mxu1  ;;  %v1952_v32 = vpack.c.bf16 %v1946_v19, %v1945_v31 }
0x156c   :  { %v1886_v23 = vadd.f32 %v4162_v2, %v1880_v33  ;;  %v1882_v4 = vpop.f32.mrb[26].mxu1 }
0x156d   :  { %3684 = vtanh.f32 %v1885_v8  ;;  %v1883_v27 = vpop.f32.mrb[27].mxu1  ;;  %v3218_v41 = vmul.f32 -1.442695, %v1885_v8 }
0x156e   :  { %3686 = vtanh.f32 %v1886_v23  ;;  %v3219_v43 = vmul.f32 -1.442695, %v1886_v23 }
0x156f   :  { %3688 = vpow2.f32 %v3218_v41 }
0x1570   :  { %3690 = vpow2.f32 %v3219_v43 }
0x1577   :  { %v3685_v37 = vpop.eup %3684 }
0x1578   :  { %v3687_v39 = vpop.eup %3686  ;;  %1896 = vrot.lane.b32.xlu1 %v3685_v37, %s4004_s3 }
0x1579   :  { %1920 = vrot.lane.b32.xlu0 %v3687_v39, %s4004_s3  ;;  %v3689_v45 = vpop.eup %3688 }
0x157a   :  { %v3691_v48 = vpop.eup %3690  ;;  %v1890_v29 = vadd.f32 1.0, %v3689_v45 }
0x157b   :  { %v1914_v49 = vadd.f32 1.0, %v3691_v48 }
0x157c   :  { %3692 = vrcp.f32 %v1890_v29 }
0x157d   :  { %3694 = vrcp.f32 %v1914_v49 }
0x1586   :  { %v3693_v2 = vpop.eup %3692 }
0x1587   :  { %v3695_v50 = vpop.eup %3694  ;;  %v1894_v59 = vmul.f32 %v3693_v2, %v1798_v20  ;;  %v3553_v20 = vld [vmem:[#allocation9 + $0x30] ss:$8 sps:$4 sm:$0xff]  }
0x1588   :  { %v1918_v62 = vmul.f32 %v3695_v50, %v1822_v22  ;;  %2034 = vmatpush1.bf16.msra.mxu1 %v3553_v20 }
0x15ea   :  { %v1897_v54 = vpop.permute.xlu1 %1896 }
0x15eb   :  { %v1899_v52 = vmul.f32 %v3693_v2, %v1897_v54  ;;  %v1921_v55 = vpop.permute.xlu0 %1920 }
0x15ec   :  { %v1923_v56 = vmul.f32 %v3695_v50, %v1921_v55 }
0x15ed   :  { %1901 = vrot.lane.b32.xlu1 %v1899_v52, %s4004_s3 }
0x15ee   :  { %1925 = vrot.lane.b32.xlu0 %v1923_v56, %s4004_s3 }
0x165f   :  { %v1902_v61 = vpop.permute.xlu1 %1901 }
0x1660   :  { %v1904_v1 = vadd.f32 %v1902_v61, %v1894_v59  ;;  %v1926_v25 = vpop.permute.xlu0 %1925 }
0x1661   :  { %v1928_v63 = vadd.f32 %v1926_v25, %v1918_v62 }
0x1662   :  { %3696 = vtanh.f32 %v1904_v1 }
0x1663   :  { %3698 = vtanh.f32 %v1928_v63 }
0x166c   :  { %v3697_v16 = vpop.eup %3696 }
0x166d   :  { %v3699_v18 = vpop.eup %3698  ;;  %1907 = vrot.lane.b32.xlu1 %v3697_v16, %s4004_s3 }
0x166e   :  { %1931 = vrot.lane.b32.xlu0 %v3699_v18, %s4004_s3 }
0x16df   :  { %v1908_v21 = vpop.permute.xlu1 %1907 }
0x16e0   :  { %v1910_v22 = vmul.f32 %v3693_v2, %v1908_v21  ;;  %v1932_v10 = vpop.permute.xlu0 %1931 }
0x16e1   :  { %v1934_v24 = vmul.f32 %v3695_v50, %v1932_v10 }
0x16e2   :  { %1936 = vrot.lane.b32.xlu1 %v1910_v22, %s4002_s5 }
0x16e3   :  { %1940 = vrot.lane.b32.xlu0 %v1934_v24, %s4006_s27 }
0x1754   :  { %v1937_v8 = vpop.permute.xlu1 %1936 }
0x1755   :  { %v1941_v26 = vpop.permute.xlu0 %1940  ;;  %v1950_v44 = vsel %vm1157_vm0, %v1937_v8, %v4233_v11  ;;  %v4498_v8 = vld [vmem:[#allocation11 + $0x14] ss:$8 sps:$4 sm:$0xff]  }
0x1756   :  { %v1943_v28 = vsel %vm1157_vm0, %v4231_v9, %v1941_v26  ;;  %v1948_v9 = vsel %vm1157_vm0, %v4368_v34, %v4289_v46  ;;  %v1954_v38 = vpack.c.bf16 %v1950_v44, %v1949_v40  ;;  %v1963_v46 = vld [vmem:[%s4681_s6] sm:$0x3]  ;;  %v4500_v44 = vld [vmem:[#allocation11 + $0x10] ss:$8 sps:$4 sm:$0xff]   ;;  %v4502_v40 = vld [vmem:[#allocation11 + $0x24] ss:$8 sps:$4 sm:$0xff]  }
0x1757   :  { %v1951_v14 = vpack.c.bf16 %v1944_v17, %v1943_v28  ;;  %v1953_v12 = vpack.c.bf16 %v1948_v9, %v1947_v47  ;;  %v1968_v42 = vrot.slane %v1963_v46, %v243_v58  ;;  %v1972_v36 = vrot.slane %v1963_v46, %v247_v60  ;;  %v4489_v9 = vld [vmem:[#allocation11 + $0x4] ss:$8 sps:$4 sm:$0xff]   ;;  %v4491_v47 = vld [vmem:[#allocation11] ss:$8 sps:$4 sm:$0xff]   ;;  %v4511_v46 = vld [vmem:[#allocation11 + $0x34] ss:$8 sps:$4 sm:$0xff]  }
0x1758   :  { %2229 = vmatprep.subr.bf16.mxu1 %v4489_v9  ;;  %2653 = vmatprep.subr.bf16.mxu0 %v4489_v9 }
0x1759   :  { %3228 = vmatmul.mubr.msk.bf16.vlgmr.msra.gmra.mrb[28].mxu1 %vm1200_vm1, %v1951_v14  ;;  %2654 = vmatpush1.bf16.msra.mxu0 %v4491_v47 }
0x175a   :  { %2069 = vmatprep.mubr.bf16.mxu1 %v4005_v3  ;;  %2230 = vmatpush1.bf16.msra.mxu1 %v4491_v47 }
0x175b   :  { %2231 = vmatprep.subr.bf16.mxu1 %v4498_v8  ;;  %2655 = vmatprep.subr.bf16.mxu0 %v4498_v8 }
0x175d   :  { %2656 = vmatpush1.bf16.msra.mxu0 %v4500_v44 }
0x175e   :  { %2232 = vmatpush1.bf16.msra.mxu1 %v4500_v44  ;;  %2657 = vmatprep.subr.bf16.mxu0 %v4502_v40 }
0x175f   :  { %2233 = vmatprep.subr.bf16.mxu1 %v4502_v40 }
0x1761   :  { %3229 = vmatmul.mubr.msk.bf16.gmra.mrb[32].mxu1 %vm1200_vm1, %v1952_v32 }
0x1762   :  { %2079 = vmatprep.mubr.bf16.mxu1 %v4005_v3 }
0x1769   :  { %3230 = vmatmul.mubr.msk.bf16.gmra.mrb[36].mxu1 %vm1200_vm1, %v1953_v12 }
0x176a   :  { %2089 = vmatprep.mubr.bf16.mxu1 %v4005_v3 }
0x1771   :  { %3231 = vmatmul.mubr.msk.bf16.gmra.mrb[40].mxu1 %vm1200_vm1, %v1954_v38  ;;  %v4507_v38 = vld [vmem:[#allocation11 + $0x20] ss:$8 sps:$4 sm:$0xff]  }
0x1772   :  { %2261 = vmatprep.mubr.bf16.mxu1 %v4005_v3  ;;  %2234 = vmatpush1.bf16.msra.mxu1 %v4507_v38 }
0x1773   :  { %2658 = vmatpush1.bf16.msra.mxu0 %v4507_v38  ;;  %2235 = vmatprep.subr.bf16.mxu1 %v4511_v46 }
0x1774   :  { %2659 = vmatprep.subr.bf16.mxu0 %v4511_v46 }
0x182c   :  { %v2061_v11 = vpop.f32.mrb[28].mxu1 }
0x182d   :  { %v2062_v34 = vadd.f32 %v2061_v11, %v1968_v42  ;;  %v2063_v35 = vpop.f32.mrb[29].mxu1 }
0x182e   :  { %v4450_v33 = vadd.f32 %v2063_v35, %v1972_v36  ;;  %v2065_v51 = vpop.f32.mrb[30].mxu1 }
0x182f   :  { %3700 = vtanh.f32 %v2062_v34  ;;  %v4452_v30 = vadd.f32 %v2065_v51, %v1968_v42  ;;  %v2067_v23 = vpop.f32.mrb[31].mxu1  ;;  %v3232_v5 = vmul.f32 -1.442695, %v2062_v34 }
0x1830   :  { %v4454_v4 = vadd.f32 %v2067_v23, %v1972_v36 }
0x1834   :  { %v2071_v27 = vpop.f32.mrb[32].mxu1 }
0x1835   :  { %v4456_v37 = vadd.f32 %v2071_v27, %v1968_v42  ;;  %v2073_v39 = vpop.f32.mrb[33].mxu1 }
0x1836   :  { %v4458_v58 = vadd.f32 %v2073_v39, %v1972_v36  ;;  %v2075_v57 = vpop.f32.mrb[34].mxu1 }
0x1837   :  { %v4460_v60 = vadd.f32 %v2075_v57, %v1968_v42  ;;  %v2077_v41 = vpop.f32.mrb[35].mxu1 }
0x1838   :  { %v4462_v43 = vadd.f32 %v2077_v41, %v1972_v36 }
0x1839   :  { %v3701_v45 = vpop.eup %3700 }
0x183a   :  { %2135 = vrot.lane.b32.xlu0 %v3701_v45, %s4004_s3 }
0x183c   :  { %v2081_v48 = vpop.f32.mrb[36].mxu1 }
0x183d   :  { %v4465_v29 = vadd.f32 %v2081_v48, %v1968_v42  ;;  %v2083_v49 = vpop.f32.mrb[37].mxu1 }
0x183e   :  { %v4467_v2 = vadd.f32 %v2083_v49, %v1972_v36  ;;  %v2085_v54 = vpop.f32.mrb[38].mxu1 }
0x183f   :  { %v4469_v50 = vadd.f32 %v2085_v54, %v1968_v42  ;;  %v2087_v52 = vpop.f32.mrb[39].mxu1 }
0x1840   :  { %v4471_v55 = vadd.f32 %v2087_v52, %v1972_v36 }
0x1844   :  { %v2091_v56 = vpop.f32.mrb[40].mxu1 }
0x1845   :  { %v4473_v59 = vadd.f32 %v2091_v56, %v1968_v42  ;;  %v2093_v61 = vpop.f32.mrb[41].mxu1 }
0x1846   :  { %v4475_v62 = vadd.f32 %v2093_v61, %v1972_v36  ;;  %v2095_v1 = vpop.f32.mrb[42].mxu1 }
0x1847   :  { %v4477_v25 = vadd.f32 %v2095_v1, %v1968_v42  ;;  %v2097_v63 = vpop.f32.mrb[43].mxu1  ;;  %v4515_v42 = vld [vmem:[#allocation11 + $0x30] ss:$8 sps:$4 sm:$0xff]  }
0x1848   :  { %v2098_v6 = vadd.f32 %v2097_v63, %v1972_v36  ;;  %2236 = vmatpush1.bf16.msra.mxu1 %v4515_v42  ;;  %2660 = vmatpush1.bf16.msra.mxu0 %v4515_v42 }
0x1849   :  { %2335 = vmatprep.subr.bf16.mxu1 %v4489_v9  ;;  %2865 = vmatprep.subr.bf16.mxu0 %v4489_v9 }
0x184a   :  { %3702 = vtanh.f32 %v2098_v6  ;;  %v3233_v15 = vmul.f32 -1.442695, %v2098_v6 }
0x184b   :  { %3704 = vpow2.f32 %v3232_v5 }
0x1854   :  { %v3703_v0 = vpop.eup %3702 }
0x1855   :  { %2159 = vrot.lane.b32.xlu1 %v3703_v0, %s4004_s3  ;;  %v3705_v7 = vpop.eup %3704 }
0x1856   :  { %v2129_v13 = vadd.f32 1.0, %v3705_v7 }
0x1858   :  { %3706 = vrcp.f32 %v2129_v13 }
0x1859   :  { %3708 = vpow2.f32 %v3233_v15 }
0x1862   :  { %v3707_v16 = vpop.eup %3706 }
0x1863   :  { %v3709_v20 = vpop.eup %3708  ;;  %v2133_v26 = vmul.f32 0.0, %v3707_v16 }
0x1864   :  { %v2153_v21 = vadd.f32 1.0, %v3709_v20 }
0x1866   :  { %3710 = vrcp.f32 %v2153_v21 }
0x1870   :  { %v3711_v22 = vpop.eup %3710 }
0x1871   :  { %v2157_v31 = vmul.f32 0.0, %v3711_v22 }
0x18ac   :  { %v2136_v18 = vpop.permute.xlu0 %2135 }
0x18ad   :  { %v2138_v53 = vmul.f32 %v3707_v16, %v2136_v18 }
0x18af   :  { %2140 = vrot.lane.b32.xlu0 %v2138_v53, %s4004_s3 }
0x18c7   :  { %v2160_v10 = vpop.permute.xlu1 %2159 }
0x18c8   :  { %v2162_v24 = vmul.f32 %v3711_v22, %v2160_v10 }
0x18ca   :  { %2164 = vrot.lane.b32.xlu1 %v2162_v24, %s4004_s3 }
0x1921   :  { %v2141_v17 = vpop.permute.xlu0 %2140 }
0x1922   :  { %v4482_v28 = vadd.f32 %v2141_v17, %v2133_v26 }
0x1924   :  { %3712 = vtanh.f32 %v4482_v28 }
0x192e   :  { %v3713_v14 = vpop.eup %3712 }
0x192f   :  { %2146 = vrot.lane.b32.xlu0 %v3713_v14, %s4004_s3 }
0x193c   :  { %v2165_v19 = vpop.permute.xlu1 %2164 }
0x193d   :  { %v4486_v32 = vadd.f32 %v2165_v19, %v2157_v31 }
0x193f   :  { %3714 = vtanh.f32 %v4486_v32 }
0x1949   :  { %v3715_v12 = vpop.eup %3714 }
0x194a   :  { %2170 = vrot.lane.b32.xlu1 %v3715_v12, %s4004_s3 }
0x19a1   :  { %v2147_v36 = vpop.permute.xlu0 %2146 }
0x19a2   :  { %v2149_v11 = vmul.f32 %v3707_v16, %v2147_v36 }
0x19a4   :  { %2177 = vrot.lane.b32.xlu0 %v2149_v11, %s4002_s5 }
0x19bc   :  { %v2171_v34 = vpop.permute.xlu1 %2170 }
0x19bd   :  { %v2173_v35 = vmul.f32 %v3711_v22, %v2171_v34 }
0x19bf   :  { %2181 = vrot.lane.b32.xlu1 %v2173_v35, %s4006_s27 }
0x1a16   :  { %v2178_v51 = vpop.permute.xlu0 %2177 }
0x1a31   :  { %v2182_v23 = vpop.permute.xlu1 %2181 }
0x1a32   :  { %v2184_v27 = vsel %vm1157_vm0, %v2178_v51, %v2182_v23 }
0x1a33   :  { %v2185_v39 = vpack.c.bf16 %v2184_v27, %v2184_v27 }
0x1a35   :  { %3242 = vmatmul.mubr.msk.bf16.vlgmr.msra.gmra.mrb[44].mxu1 %vm1200_vm1, %v2185_v39 }
0x1a36   :  { %2336 = vmatpush1.bf16.msra.mxu1 %v4491_v47  ;;  %2367 = vmatprep.mubr.bf16.mxu1 %v4005_v3 }
0x1a37   :  { %2337 = vmatprep.subr.bf16.mxu1 %v4498_v8 }
0x1a3a   :  { %2338 = vmatpush1.bf16.msra.mxu1 %v4500_v44 }
0x1a3b   :  { %2339 = vmatprep.subr.bf16.mxu1 %v4502_v40 }
0x1a3e   :  { %2340 = vmatpush1.bf16.msra.mxu1 %v4507_v38 }
0x1a3f   :  { %2341 = vmatprep.subr.bf16.mxu1 %v4511_v46 }
0x1a42   :  { %2342 = vmatpush1.bf16.msra.mxu1 %v4515_v42 }
0x1a43   :  { %2441 = vmatprep.subr.bf16.mxu1 %v4489_v9 }
0x1b08   :  { %v2263_v57 = vpop.f32.mrb[44].mxu1 }
0x1b09   :  { %v2270_v41 = vadd.f32 %v2263_v57, %v4452_v30  ;;  %v2265_v45 = vpop.f32.mrb[45].mxu1 }
0x1b0a   :  { %v2271_v48 = vadd.f32 %v2265_v45, %v4475_v62  ;;  %v2267_v49 = vpop.f32.mrb[46].mxu1 }
0x1b0b   :  { %3716 = vtanh.f32 %v2270_v41  ;;  %v2268_v54 = vpop.f32.mrb[47].mxu1  ;;  %v3243_v61 = vmul.f32 -1.442695, %v2270_v41 }
0x1b0c   :  { %3718 = vtanh.f32 %v2271_v48  ;;  %v3244_v1 = vmul.f32 -1.442695, %v2271_v48 }
0x1b0d   :  { %3720 = vpow2.f32 %v3243_v61 }
0x1b0e   :  { %3722 = vpow2.f32 %v3244_v1 }
0x1b15   :  { %v3717_v52 = vpop.eup %3716 }
0x1b16   :  { %v3719_v56 = vpop.eup %3718  ;;  %2281 = vrot.lane.b32.xlu0 %v3717_v52, %s4004_s3 }
0x1b17   :  { %2305 = vrot.lane.b32.xlu1 %v3719_v56, %s4004_s3  ;;  %v3721_v63 = vpop.eup %3720 }
0x1b18   :  { %v3723_v6 = vpop.eup %3722  ;;  %v2275_v30 = vadd.f32 1.0, %v3721_v63 }
0x1b19   :  { %v2299_v0 = vadd.f32 1.0, %v3723_v6 }
0x1b1a   :  { %3724 = vrcp.f32 %v2275_v30 }
0x1b1b   :  { %3726 = vrcp.f32 %v2299_v0 }
0x1b24   :  { %v3725_v62 = vpop.eup %3724 }
0x1b25   :  { %v3727_v7 = vpop.eup %3726  ;;  %v2279_v18 = vmul.f32 %v3725_v62, %v4482_v28 }
0x1b26   :  { %v2303_v20 = vmul.f32 %v3727_v7, %v4486_v32 }
0x1b88   :  { %v2282_v5 = vpop.permute.xlu0 %2281 }
0x1b89   :  { %v2284_v13 = vmul.f32 %v3725_v62, %v2282_v5  ;;  %v2306_v15 = vpop.permute.xlu1 %2305 }
0x1b8a   :  { %v2308_v16 = vmul.f32 %v3727_v7, %v2306_v15 }
0x1b8b   :  { %2286 = vrot.lane.b32.xlu0 %v2284_v13, %s4004_s3 }
0x1b8c   :  { %2310 = vrot.lane.b32.xlu1 %v2308_v16, %s4004_s3 }
0x1bfd   :  { %v2287_v53 = vpop.permute.xlu0 %2286 }
0x1bfe   :  { %v2289_v21 = vadd.f32 %v2287_v53, %v2279_v18  ;;  %v2311_v22 = vpop.permute.xlu1 %2310 }
0x1bff   :  { %v2313_v10 = vadd.f32 %v2311_v22, %v2303_v20 }
0x1c00   :  { %3728 = vtanh.f32 %v2289_v21 }
0x1c01   :  { %3730 = vtanh.f32 %v2313_v10 }
0x1c0a   :  { %v3729_v24 = vpop.eup %3728 }
0x1c0b   :  { %v3731_v26 = vpop.eup %3730  ;;  %2292 = vrot.lane.b32.xlu0 %v3729_v24, %s4004_s3 }
0x1c0c   :  { %2316 = vrot.lane.b32.xlu1 %v3731_v26, %s4004_s3 }
0x1c7d   :  { %v2293_v17 = vpop.permute.xlu0 %2292 }
0x1c7e   :  { %v2295_v14 = vmul.f32 %v3725_v62, %v2293_v17  ;;  %v2317_v31 = vpop.permute.xlu1 %2316 }
0x1c7f   :  { %v2319_v19 = vmul.f32 %v3727_v7, %v2317_v31 }
0x1c80   :  { %2323 = vrot.lane.b32.xlu0 %v2295_v14, %s4002_s5 }
0x1c81   :  { %2327 = vrot.lane.b32.xlu1 %v2319_v19, %s4006_s27 }
0x1cf2   :  { %v2324_v28 = vpop.permute.xlu0 %2323 }
0x1cf3   :  { %v2328_v32 = vpop.permute.xlu1 %2327 }
0x1cf4   :  { %v2330_v12 = vsel %vm1157_vm0, %v2324_v28, %v2328_v32 }
0x1cf5   :  { %v2331_v36 = vpack.c.bf16 %v2330_v12, %v2330_v12 }
0x1cf7   :  { %3245 = vmatmul.mubr.msk.bf16.vlgmr.msra.gmra.mrb[48].mxu1 %vm1200_vm1, %v2331_v36 }
0x1cf8   :  { %2442 = vmatpush1.bf16.msra.mxu1 %v4491_v47  ;;  %2473 = vmatprep.mubr.bf16.mxu1 %v4005_v3 }
0x1cf9   :  { %2443 = vmatprep.subr.bf16.mxu1 %v4498_v8 }
0x1cfc   :  { %2444 = vmatpush1.bf16.msra.mxu1 %v4500_v44 }
0x1cfd   :  { %2445 = vmatprep.subr.bf16.mxu1 %v4502_v40 }
0x1d00   :  { %2446 = vmatpush1.bf16.msra.mxu1 %v4507_v38 }
0x1d01   :  { %2447 = vmatprep.subr.bf16.mxu1 %v4511_v46 }
0x1d04   :  { %2448 = vmatpush1.bf16.msra.mxu1 %v4515_v42 }
0x1d05   :  { %2547 = vmatprep.subr.bf16.mxu1 %v4489_v9 }
0x1dca   :  { %v2369_v11 = vpop.f32.mrb[48].mxu1 }
0x1dcb   :  { %v2376_v34 = vadd.f32 %v2369_v11, %v4456_v37  ;;  %v2371_v35 = vpop.f32.mrb[49].mxu1 }
0x1dcc   :  { %v2377_v51 = vadd.f32 %v2371_v35, %v4471_v55  ;;  %v2373_v23 = vpop.f32.mrb[50].mxu1 }
0x1dcd   :  { %3732 = vtanh.f32 %v2376_v34  ;;  %v2374_v27 = vpop.f32.mrb[51].mxu1  ;;  %v3246_v41 = vmul.f32 -1.442695, %v2376_v34 }
0x1dce   :  { %3734 = vtanh.f32 %v2377_v51  ;;  %v3247_v45 = vmul.f32 -1.442695, %v2377_v51 }
0x1dcf   :  { %3736 = vpow2.f32 %v3246_v41 }
0x1dd0   :  { %3738 = vpow2.f32 %v3247_v45 }
0x1dd7   :  { %v3733_v39 = vpop.eup %3732 }
0x1dd8   :  { %v3735_v57 = vpop.eup %3734  ;;  %2387 = vrot.lane.b32.xlu0 %v3733_v39, %s4004_s3 }
0x1dd9   :  { %2411 = vrot.lane.b32.xlu1 %v3735_v57, %s4004_s3  ;;  %v3737_v48 = vpop.eup %3736 }
0x1dda   :  { %v3739_v49 = vpop.eup %3738  ;;  %v2381_v37 = vadd.f32 1.0, %v3737_v48 }
0x1ddb   :  { %v2405_v54 = vadd.f32 1.0, %v3739_v49 }
0x1ddc   :  { %3740 = vrcp.f32 %v2381_v37 }
0x1ddd   :  { %3742 = vrcp.f32 %v2405_v54 }
0x1de6   :  { %v3741_v55 = vpop.eup %3740 }
0x1de7   :  { %v3743_v56 = vpop.eup %3742  ;;  %v2385_v6 = vmul.f32 %v3741_v55, %v2289_v21 }
0x1de8   :  { %v2409_v0 = vmul.f32 %v3743_v56, %v2313_v10 }
0x1e4a   :  { %v2388_v52 = vpop.permute.xlu0 %2387 }
0x1e4b   :  { %v2390_v61 = vmul.f32 %v3741_v55, %v2388_v52  ;;  %v2412_v1 = vpop.permute.xlu1 %2411 }
0x1e4c   :  { %v2414_v63 = vmul.f32 %v3743_v56, %v2412_v1 }
0x1e4d   :  { %2392 = vrot.lane.b32.xlu0 %v2390_v61, %s4004_s3 }
0x1e4e   :  { %2416 = vrot.lane.b32.xlu1 %v2414_v63, %s4004_s3 }
0x1ebf   :  { %v2393_v30 = vpop.permute.xlu0 %2392 }
0x1ec0   :  { %v2395_v62 = vadd.f32 %v2393_v30, %v2385_v6  ;;  %v2417_v5 = vpop.permute.xlu1 %2416 }
0x1ec1   :  { %v2419_v7 = vadd.f32 %v2417_v5, %v2409_v0 }
0x1ec2   :  { %3744 = vtanh.f32 %v2395_v62 }
0x1ec3   :  { %3746 = vtanh.f32 %v2419_v7 }
0x1ecc   :  { %v3745_v13 = vpop.eup %3744 }
0x1ecd   :  { %v3747_v15 = vpop.eup %3746  ;;  %2398 = vrot.lane.b32.xlu0 %v3745_v13, %s4004_s3 }
0x1ece   :  { %2422 = vrot.lane.b32.xlu1 %v3747_v15, %s4004_s3 }
0x1f3f   :  { %v2399_v16 = vpop.permute.xlu0 %2398 }
0x1f40   :  { %v2401_v18 = vmul.f32 %v3741_v55, %v2399_v16  ;;  %v2423_v53 = vpop.permute.xlu1 %2422 }
0x1f41   :  { %v2425_v20 = vmul.f32 %v3743_v56, %v2423_v53 }
0x1f42   :  { %2429 = vrot.lane.b32.xlu0 %v2401_v18, %s4002_s5 }
0x1f43   :  { %2433 = vrot.lane.b32.xlu1 %v2425_v20, %s4006_s27 }
0x1fb4   :  { %v2430_v21 = vpop.permute.xlu0 %2429 }
0x1fb5   :  { %v2434_v22 = vpop.permute.xlu1 %2433 }
0x1fb6   :  { %v2436_v10 = vsel %vm1157_vm0, %v2430_v21, %v2434_v22 }
0x1fb7   :  { %v2437_v24 = vpack.c.bf16 %v2436_v10, %v2436_v10 }
0x1fb9   :  { %3248 = vmatmul.mubr.msk.bf16.vlgmr.msra.gmra.mrb[52].mxu1 %vm1200_vm1, %v2437_v24 }
0x1fba   :  { %2548 = vmatpush1.bf16.msra.mxu1 %v4491_v47  ;;  %2579 = vmatprep.mubr.bf16.mxu1 %v4005_v3 }
0x1fbb   :  { %2549 = vmatprep.subr.bf16.mxu1 %v4498_v8 }
0x1fbe   :  { %2550 = vmatpush1.bf16.msra.mxu1 %v4500_v44 }
0x1fbf   :  { %2551 = vmatprep.subr.bf16.mxu1 %v4502_v40 }
0x1fc2   :  { %2552 = vmatpush1.bf16.msra.mxu1 %v4507_v38 }
0x1fc3   :  { %2553 = vmatprep.subr.bf16.mxu1 %v4511_v46 }
0x1fc6   :  { %2554 = vmatpush1.bf16.msra.mxu1 %v4515_v42 }
0x1fc7   :  { %2759 = vmatprep.subr.bf16.mxu1 %v4489_v9 }
0x208c   :  { %v2475_v26 = vpop.f32.mrb[52].mxu1 }
0x208d   :  { %v2482_v17 = vadd.f32 %v2475_v26, %v4460_v60  ;;  %v2477_v14 = vpop.f32.mrb[53].mxu1 }
0x208e   :  { %v2483_v31 = vadd.f32 %v2477_v14, %v4467_v2  ;;  %v2479_v19 = vpop.f32.mrb[54].mxu1 }
0x208f   :  { %3748 = vtanh.f32 %v2482_v17  ;;  %v2480_v28 = vpop.f32.mrb[55].mxu1  ;;  %v3249_v36 = vmul.f32 -1.442695, %v2482_v17 }
0x2090   :  { %3750 = vtanh.f32 %v2483_v31  ;;  %v3250_v11 = vmul.f32 -1.442695, %v2483_v31 }
0x2091   :  { %3752 = vpow2.f32 %v3249_v36 }
0x2092   :  { %3754 = vpow2.f32 %v3250_v11 }
0x2099   :  { %v3749_v32 = vpop.eup %3748 }
0x209a   :  { %v3751_v12 = vpop.eup %3750  ;;  %2493 = vrot.lane.b32.xlu0 %v3749_v32, %s4004_s3 }
0x209b   :  { %2517 = vrot.lane.b32.xlu1 %v3751_v12, %s4004_s3  ;;  %v3753_v9 = vpop.eup %3752 }
0x209c   :  { %v3755_v34 = vpop.eup %3754  ;;  %v2487_v60 = vadd.f32 1.0, %v3753_v9 }
0x209d   :  { %v2511_v35 = vadd.f32 1.0, %v3755_v34 }
0x209e   :  { %3756 = vrcp.f32 %v2487_v60 }
0x209f   :  { %3758 = vrcp.f32 %v2511_v35 }
0x20a8   :  { %v3757_v2 = vpop.eup %3756 }
0x20a9   :  { %v3759_v23 = vpop.eup %3758  ;;  %v2491_v41 = vmul.f32 %v3757_v2, %v2395_v62 }
0x20aa   :  { %v2515_v48 = vmul.f32 %v3759_v23, %v2419_v7 }
0x210c   :  { %v2494_v51 = vpop.permute.xlu0 %2493 }
0x210d   :  { %v2496_v27 = vmul.f32 %v3757_v2, %v2494_v51  ;;  %v2518_v39 = vpop.permute.xlu1 %2517 }
0x210e   :  { %v2520_v57 = vmul.f32 %v3759_v23, %v2518_v39 }
0x210f   :  { %2498 = vrot.lane.b32.xlu0 %v2496_v27, %s4004_s3 }
0x2110   :  { %2522 = vrot.lane.b32.xlu1 %v2520_v57, %s4004_s3 }
0x2181   :  { %v2499_v45 = vpop.permute.xlu0 %2498 }
0x2182   :  { %v2501_v49 = vadd.f32 %v2499_v45, %v2491_v41  ;;  %v2523_v37 = vpop.permute.xlu1 %2522 }
0x2183   :  { %v2525_v54 = vadd.f32 %v2523_v37, %v2515_v48 }
0x2184   :  { %3760 = vtanh.f32 %v2501_v49 }
0x2185   :  { %3762 = vtanh.f32 %v2525_v54 }
0x218e   :  { %v3761_v55 = vpop.eup %3760 }
0x218f   :  { %v3763_v52 = vpop.eup %3762  ;;  %2504 = vrot.lane.b32.xlu0 %v3761_v55, %s4004_s3 }
0x2190   :  { %2528 = vrot.lane.b32.xlu1 %v3763_v52, %s4004_s3 }
0x2201   :  { %v2505_v56 = vpop.permute.xlu0 %2504 }
0x2202   :  { %v2507_v61 = vmul.f32 %v3757_v2, %v2505_v56  ;;  %v2529_v1 = vpop.permute.xlu1 %2528 }
0x2203   :  { %v2531_v63 = vmul.f32 %v3759_v23, %v2529_v1 }
0x2204   :  { %2535 = vrot.lane.b32.xlu0 %v2507_v61, %s4002_s5 }
0x2205   :  { %2539 = vrot.lane.b32.xlu1 %v2531_v63, %s4006_s27 }
0x2276   :  { %v2536_v6 = vpop.permute.xlu0 %2535 }
0x2277   :  { %v2540_v30 = vpop.permute.xlu1 %2539 }
0x2278   :  { %v2542_v0 = vsel %vm1157_vm0, %v2536_v6, %v2540_v30 }
0x2279   :  { %v2543_v62 = vpack.c.bf16 %v2542_v0, %v2542_v0 }
0x227b   :  { %3251 = vmatmul.mubr.msk.bf16.vlgmr.msra.gmra.mrb[56].mxu1 %vm1200_vm1, %v2543_v62 }
0x227c   :  { %2760 = vmatpush1.bf16.msra.mxu1 %v4491_v47  ;;  %2791 = vmatprep.mubr.bf16.mxu1 %v4005_v3 }
0x227d   :  { %2761 = vmatprep.subr.bf16.mxu1 %v4498_v8 }
0x2280   :  { %2762 = vmatpush1.bf16.msra.mxu1 %v4500_v44 }
0x2281   :  { %2763 = vmatprep.subr.bf16.mxu1 %v4502_v40 }
0x2284   :  { %2764 = vmatpush1.bf16.msra.mxu1 %v4507_v38 }
0x2285   :  { %2765 = vmatprep.subr.bf16.mxu1 %v4511_v46 }
0x2288   :  { %2766 = vmatpush1.bf16.msra.mxu1 %v4515_v42 }
0x234e   :  { %v2581_v5 = vpop.f32.mrb[56].mxu1 }
0x234f   :  { %v2588_v7 = vadd.f32 %v2581_v5, %v4465_v29  ;;  %v2583_v13 = vpop.f32.mrb[57].mxu1 }
0x2350   :  { %v2589_v15 = vadd.f32 %v2583_v13, %v4462_v43  ;;  %v2585_v16 = vpop.f32.mrb[58].mxu1 }
0x2351   :  { %3764 = vtanh.f32 %v2588_v7  ;;  %v2586_v18 = vpop.f32.mrb[59].mxu1  ;;  %v3252_v21 = vmul.f32 -1.442695, %v2588_v7 }
0x2352   :  { %3766 = vtanh.f32 %v2589_v15  ;;  %v3253_v22 = vmul.f32 -1.442695, %v2589_v15 }
0x2353   :  { %3768 = vpow2.f32 %v3252_v21 }
0x2354   :  { %3770 = vpow2.f32 %v3253_v22 }
0x235b   :  { %v3765_v53 = vpop.eup %3764 }
0x235c   :  { %v3767_v20 = vpop.eup %3766  ;;  %2599 = vrot.lane.b32.xlu0 %v3765_v53, %s4004_s3 }
0x235d   :  { %2623 = vrot.lane.b32.xlu1 %v3767_v20, %s4004_s3  ;;  %v3769_v10 = vpop.eup %3768 }
0x235e   :  { %v3771_v24 = vpop.eup %3770  ;;  %v2593_v29 = vadd.f32 1.0, %v3769_v10 }
0x235f   :  { %v2617_v26 = vadd.f32 1.0, %v3771_v24 }
0x2360   :  { %3772 = vrcp.f32 %v2593_v29 }
0x2361   :  { %3774 = vrcp.f32 %v2617_v26 }
0x236a   :  { %v3773_v43 = vpop.eup %3772 }
0x236b   :  { %v3775_v14 = vpop.eup %3774  ;;  %v2597_v32 = vmul.f32 %v3773_v43, %v2501_v49 }
0x236c   :  { %v2621_v36 = vmul.f32 %v3775_v14, %v2525_v54 }
0x23ce   :  { %v2600_v17 = vpop.permute.xlu0 %2599 }
0x23cf   :  { %v2602_v31 = vmul.f32 %v3773_v43, %v2600_v17  ;;  %v2624_v19 = vpop.permute.xlu1 %2623 }
0x23d0   :  { %v2626_v28 = vmul.f32 %v3775_v14, %v2624_v19 }
0x23d1   :  { %2604 = vrot.lane.b32.xlu0 %v2602_v31, %s4004_s3 }
0x23d2   :  { %2628 = vrot.lane.b32.xlu1 %v2626_v28, %s4004_s3 }
0x2443   :  { %v2605_v12 = vpop.permute.xlu0 %2604 }
0x2444   :  { %v2607_v11 = vadd.f32 %v2605_v12, %v2597_v32  ;;  %v2629_v9 = vpop.permute.xlu1 %2628 }
0x2445   :  { %v2631_v34 = vadd.f32 %v2629_v9, %v2621_v36 }
0x2446   :  { %3776 = vtanh.f32 %v2607_v11 }
0x2447   :  { %3778 = vtanh.f32 %v2631_v34 }
0x2450   :  { %v3777_v60 = vpop.eup %3776 }
0x2451   :  { %v3779_v35 = vpop.eup %3778  ;;  %2610 = vrot.lane.b32.xlu0 %v3777_v60, %s4004_s3 }
0x2452   :  { %2634 = vrot.lane.b32.xlu1 %v3779_v35, %s4004_s3 }
0x24c3   :  { %v2611_v2 = vpop.permute.xlu0 %2610 }
0x24c4   :  { %v2613_v51 = vmul.f32 %v3773_v43, %v2611_v2  ;;  %v2635_v23 = vpop.permute.xlu1 %2634 }
0x24c5   :  { %v2637_v27 = vmul.f32 %v3775_v14, %v2635_v23 }
0x24c6   :  { %2641 = vrot.lane.b32.xlu0 %v2613_v51, %s4002_s5 }
0x24c7   :  { %2645 = vrot.lane.b32.xlu1 %v2637_v27, %s4006_s27 }
0x2538   :  { %v2642_v39 = vpop.permute.xlu0 %2641 }
0x2539   :  { %v2646_v57 = vpop.permute.xlu1 %2645 }
0x253a   :  { %v2648_v41 = vsel %vm1157_vm0, %v2642_v39, %v2646_v57 }
0x253b   :  { %v2649_v45 = vpack.c.bf16 %v2648_v41, %v2648_v41 }
0x253d   :  { %3254 = vmatmul.mubr.msk.bf16.vlgmr.msra.gmra.mrb[16].mxu0 %vm1200_vm1, %v2649_v45 }
0x253e   :  { %2866 = vmatpush1.bf16.msra.mxu0 %v4491_v47  ;;  %2897 = vmatprep.mubr.bf16.mxu0 %v4005_v3 }
0x253f   :  { %2867 = vmatprep.subr.bf16.mxu0 %v4498_v8 }
0x2542   :  { %2868 = vmatpush1.bf16.msra.mxu0 %v4500_v44 }
0x2543   :  { %2869 = vmatprep.subr.bf16.mxu0 %v4502_v40 }
0x2546   :  { %2870 = vmatpush1.bf16.msra.mxu0 %v4507_v38 }
0x2547   :  { %2871 = vmatprep.subr.bf16.mxu0 %v4511_v46 }
0x254a   :  { %2872 = vmatpush1.bf16.msra.mxu0 %v4515_v42 }
0x2610   :  { %v2687_v48 = vpop.f32.mrb[16].mxu0 }
0x2611   :  { %v2694_v49 = vadd.f32 %v2687_v48, %v4469_v50  ;;  %v2689_v37 = vpop.f32.mrb[17].mxu0 }
0x2612   :  { %v2695_v47 = vadd.f32 %v2689_v37, %v4458_v58  ;;  %v2691_v54 = vpop.f32.mrb[18].mxu0 }
0x2613   :  { %3780 = vtanh.f32 %v2694_v49  ;;  %v2692_v3 = vpop.f32.mrb[19].mxu0  ;;  %v3255_v40 = vmul.f32 -1.442695, %v2694_v49 }
0x2614   :  { %3782 = vtanh.f32 %v2695_v47  ;;  %v3256_v38 = vmul.f32 -1.442695, %v2695_v47 }
0x2615   :  { %3784 = vpow2.f32 %v3255_v40 }
0x2616   :  { %3786 = vpow2.f32 %v3256_v38 }
0x261d   :  { %v3781_v8 = vpop.eup %3780 }
0x261e   :  { %v3783_v44 = vpop.eup %3782  ;;  %2705 = vrot.lane.b32.xlu0 %v3781_v8, %s4004_s3 }
0x261f   :  { %2729 = vrot.lane.b32.xlu1 %v3783_v44, %s4004_s3  ;;  %v3785_v46 = vpop.eup %3784 }
0x2620   :  { %v3787_v42 = vpop.eup %3786  ;;  %v2699_v50 = vadd.f32 1.0, %v3785_v46 }
0x2621   :  { %v2723_v55 = vadd.f32 1.0, %v3787_v42 }
0x2622   :  { %3788 = vrcp.f32 %v2699_v50 }
0x2623   :  { %3790 = vrcp.f32 %v2723_v55 }
0x262c   :  { %v3789_v58 = vpop.eup %3788 }
0x262d   :  { %v3791_v56 = vpop.eup %3790  ;;  %v2703_v6 = vmul.f32 %v3789_v58, %v2607_v11 }
0x262e   :  { %v2727_v0 = vmul.f32 %v3791_v56, %v2631_v34 }
0x2690   :  { %v2706_v52 = vpop.permute.xlu0 %2705 }
0x2691   :  { %v2708_v61 = vmul.f32 %v3789_v58, %v2706_v52  ;;  %v2730_v1 = vpop.permute.xlu1 %2729 }
0x2692   :  { %v2732_v63 = vmul.f32 %v3791_v56, %v2730_v1 }
0x2693   :  { %2710 = vrot.lane.b32.xlu0 %v2708_v61, %s4004_s3 }
0x2694   :  { %2734 = vrot.lane.b32.xlu1 %v2732_v63, %s4004_s3 }
0x2705   :  { %v2711_v30 = vpop.permute.xlu0 %2710 }
0x2706   :  { %v2713_v62 = vadd.f32 %v2711_v30, %v2703_v6  ;;  %v2735_v5 = vpop.permute.xlu1 %2734 }
0x2707   :  { %v2737_v7 = vadd.f32 %v2735_v5, %v2727_v0 }
0x2708   :  { %3792 = vtanh.f32 %v2713_v62 }
0x2709   :  { %3794 = vtanh.f32 %v2737_v7 }
0x2712   :  { %v3793_v13 = vpop.eup %3792 }
0x2713   :  { %v3795_v15 = vpop.eup %3794  ;;  %2716 = vrot.lane.b32.xlu0 %v3793_v13, %s4004_s3 }
0x2714   :  { %2740 = vrot.lane.b32.xlu1 %v3795_v15, %s4004_s3 }
0x2785   :  { %v2717_v16 = vpop.permute.xlu0 %2716 }
0x2786   :  { %v2719_v18 = vmul.f32 %v3789_v58, %v2717_v16  ;;  %v2741_v53 = vpop.permute.xlu1 %2740 }
0x2787   :  { %v2743_v20 = vmul.f32 %v3791_v56, %v2741_v53 }
0x2788   :  { %2747 = vrot.lane.b32.xlu0 %v2719_v18, %s4002_s5 }
0x2789   :  { %2751 = vrot.lane.b32.xlu1 %v2743_v20, %s4006_s27 }
0x27fa   :  { %v2748_v21 = vpop.permute.xlu0 %2747 }
0x27fb   :  { %v2752_v22 = vpop.permute.xlu1 %2751 }
0x27fc   :  { %v2754_v10 = vsel %vm1157_vm0, %v2748_v21, %v2752_v22 }
0x27fd   :  { %v2755_v24 = vpack.c.bf16 %v2754_v10, %v2754_v10  ;;  %v3568_v10 = vld [vmem:[#allocation12] sm:$0xff]  }
0x27ff   :  { %3257 = vmatmul.mubr.msk.bf16.vlgmr.msra.gmra.mrb[60].mxu1 %vm1200_vm1, %v2755_v24  ;;  %v4007_v24 = vmov 0.0  }
0x2800   :  { %3274 = vmatprep.subr.bf16.mxu1 %v4007_v24  ;;  %3282 = vmatprep.mubr.msk.bf16.mxu1 %vm4008_vm2, %v4007_v24 }
0x2801   :  { %3275 = vmatpush3.bf16.msra.mxu1 %v3568_v10 }
0x2802   :  { %3276 = vmatprep.subr.bf16.mxu1 %v4007_v24 }
0x28d2   :  { %v2793_v29 = vpop.f32.mrb[60].mxu1 }
0x28d3   :  { %v2800_v26 = vadd.f32 %v2793_v29, %v4473_v59  ;;  %v2795_v43 = vpop.f32.mrb[61].mxu1  ;;  %v3569_v29 = vld [vmem:[#allocation12 + $0x8] sm:$0xff]  }
0x28d4   :  { %v2801_v17 = vadd.f32 %v2795_v43, %v4454_v4  ;;  %v2797_v14 = vpop.f32.mrb[62].mxu1  ;;  %3277 = vmatpush3.bf16.msra.mxu1 %v3569_v29 }
0x28d5   :  { %3796 = vtanh.f32 %v2800_v26  ;;  %v2798_v31 = vpop.f32.mrb[63].mxu1  ;;  %v3258_v32 = vmul.f32 -1.442695, %v2800_v26  ;;  %v3570_v26 = vld [vmem:[#allocation12 + $0x10] sm:$0xff]   ;;  %3278 = vmatprep.subr.bf16.mxu1 %v4007_v24  ;;  %v3571_v14 = vld [vmem:[#allocation12 + $0x18] sm:$0xff]  }
0x28d6   :  { %3798 = vtanh.f32 %v2801_v17  ;;  %v3259_v12 = vmul.f32 -1.442695, %v2801_v17 }
0x28d7   :  { %3800 = vpow2.f32 %v3258_v32 }
0x28d8   :  { %3802 = vpow2.f32 %v3259_v12  ;;  %3279 = vmatpush3.bf16.msra.mxu1 %v3570_v26 }
0x28d9   :  { %3280 = vmatprep.subr.bf16.mxu1 %v4007_v24 }
0x28dc   :  { %3281 = vmatpush3.bf16.msra.mxu1 %v3571_v14 }
0x28df   :  { %v3797_v19 = vpop.eup %3796 }
0x28e0   :  { %v3799_v28 = vpop.eup %3798  ;;  %2811 = vrot.lane.b32.xlu0 %v3797_v19, %s4004_s3 }
0x28e1   :  { %2835 = vrot.lane.b32.xlu1 %v3799_v28, %s4004_s3  ;;  %v3801_v36 = vpop.eup %3800 }
0x28e2   :  { %v3803_v11 = vpop.eup %3802  ;;  %v2805_v59 = vadd.f32 1.0, %v3801_v36  ;;  %v2965_v36 = vld [vmem:[%s4684_s9] sm:$0xff]  ;;  %s3960_s9 = scalar_lea.vmem %s3058_s15, 128 }
0x28e3   :  { %v2829_v9 = vadd.f32 1.0, %v3803_v11  ;;  %p3961_p6 = scmp.ne.s32.totalorder %s3058_s15, %s3960_s9  ;;  %p3966_p8 = scmp.lt.s32.totalorder %s3960_s9, %s3960_s9 }
0x28e4   :  { %3804 = vrcp.f32 %v2805_v59 }
0x28e5   :  { %3806 = vrcp.f32 %v2829_v9  ;;  %p3967_p9 = por %p3966_p8, %p3965_p7 }
0x28e7   :  { %p3968_p10 = pnand %p3967_p9, %p3961_p6 }
0x28ee   :  { %v3805_v4 = vpop.eup %3804 }
0x28ef   :  { %v3807_v60 = vpop.eup %3806  ;;  %v2809_v23 = vmul.f32 %v3805_v4, %v2713_v62 }
0x28f0   :  { %v2833_v39 = vmul.f32 %v3807_v60, %v2737_v7 }
0x2952   :  { %v2812_v34 = vpop.permute.xlu0 %2811 }
0x2953   :  { %v2814_v35 = vmul.f32 %v3805_v4, %v2812_v34  ;;  %v2836_v2 = vpop.permute.xlu1 %2835  ;;  %v3263_v34 = vld [vmem:[%s4683_s8] ss:$0 sm:$0xff] }
0x2954   :  { %v2838_v51 = vmul.f32 %v3807_v60, %v2836_v2 }
0x2955   :  { %2816 = vrot.lane.b32.xlu0 %v2814_v35, %s4004_s3 }
0x2956   :  { %2840 = vrot.lane.b32.xlu1 %v2838_v51, %s4004_s3 }
0x29c7   :  { %v2817_v27 = vpop.permute.xlu0 %2816 }
0x29c8   :  { %v2819_v57 = vadd.f32 %v2817_v27, %v2809_v23  ;;  %v2841_v41 = vpop.permute.xlu1 %2840 }
0x29c9   :  { %v2843_v45 = vadd.f32 %v2841_v41, %v2833_v39 }
0x29ca   :  { %3808 = vtanh.f32 %v2819_v57 }
0x29cb   :  { %3810 = vtanh.f32 %v2843_v45 }
0x29d4   :  { %v3809_v48 = vpop.eup %3808 }
0x29d5   :  { %v3811_v49 = vpop.eup %3810  ;;  %2822 = vrot.lane.b32.xlu0 %v3809_v48, %s4004_s3 }
0x29d6   :  { %2846 = vrot.lane.b32.xlu1 %v3811_v49, %s4004_s3 }
0x2a47   :  { %v2823_v37 = vpop.permute.xlu0 %2822 }
0x2a48   :  { %v2825_v47 = vmul.f32 %v3805_v4, %v2823_v37  ;;  %v2847_v54 = vpop.permute.xlu1 %2846 }
0x2a49   :  { %v2849_v3 = vmul.f32 %v3807_v60, %v2847_v54 }
0x2a4a   :  { %2853 = vrot.lane.b32.xlu0 %v2825_v47, %s4002_s5 }
0x2a4b   :  { %2857 = vrot.lane.b32.xlu1 %v2849_v3, %s4006_s27 }
0x2abc   :  { %v2854_v8 = vpop.permute.xlu0 %2853 }
0x2abd   :  { %v2858_v44 = vpop.permute.xlu1 %2857 }
0x2abe   :  { %v2860_v40 = vsel %vm1157_vm0, %v2854_v8, %v2858_v44 }
0x2abf   :  { %v2861_v38 = vpack.c.bf16 %v2860_v40, %v2860_v40 }
0x2ac1   :  { %3260 = vmatmul.mubr.msk.bf16.vlgmr.msra.gmra.mrb[20].mxu0 %vm1200_vm1, %v2861_v38 }
0x2b94   :  { %v2899_v46 = vpop.f32.mrb[20].mxu0 }
0x2b95   :  { %v2906_v42 = vadd.f32 %v2899_v46, %v4477_v25  ;;  %v2901_v50 = vpop.f32.mrb[21].mxu0 }
0x2b96   :  { %v2907_v55 = vadd.f32 %v2901_v50, %v4450_v33  ;;  %v2903_v58 = vpop.f32.mrb[22].mxu0 }
0x2b97   :  { %3812 = vtanh.f32 %v2906_v42  ;;  %v2904_v52 = vpop.f32.mrb[23].mxu0  ;;  %v3261_v1 = vmul.f32 -1.442695, %v2906_v42 }
0x2b98   :  { %3814 = vtanh.f32 %v2907_v55  ;;  %v3262_v63 = vmul.f32 -1.442695, %v2907_v55 }
0x2b99   :  { %3816 = vpow2.f32 %v3261_v1 }
0x2b9a   :  { %3818 = vpow2.f32 %v3262_v63 }
0x2ba1   :  { %v3813_v56 = vpop.eup %3812 }
0x2ba2   :  { %v3815_v61 = vpop.eup %3814  ;;  %2917 = vrot.lane.b32.xlu0 %v3813_v56, %s4004_s3 }
0x2ba3   :  { %2941 = vrot.lane.b32.xlu1 %v3815_v61, %s4004_s3  ;;  %v3817_v6 = vpop.eup %3816 }
0x2ba4   :  { %v3819_v30 = vpop.eup %3818  ;;  %v2911_v25 = vadd.f32 1.0, %v3817_v6 }
0x2ba5   :  { %v2935_v0 = vadd.f32 1.0, %v3819_v30 }
0x2ba6   :  { %3820 = vrcp.f32 %v2911_v25 }
0x2ba7   :  { %3822 = vrcp.f32 %v2935_v0 }
0x2bb0   :  { %v3821_v33 = vpop.eup %3820 }
0x2bb1   :  { %v3823_v5 = vpop.eup %3822  ;;  %v2915_v16 = vmul.f32 %v3821_v33, %v2819_v57 }
0x2bb2   :  { %v2939_v53 = vmul.f32 %v3823_v5, %v2843_v45 }
0x2c14   :  { %v2918_v62 = vpop.permute.xlu0 %2917 }
0x2c15   :  { %v2920_v7 = vmul.f32 %v3821_v33, %v2918_v62  ;;  %v2942_v13 = vpop.permute.xlu1 %2941 }
0x2c16   :  { %v2944_v15 = vmul.f32 %v3823_v5, %v2942_v13 }
0x2c17   :  { %2922 = vrot.lane.b32.xlu0 %v2920_v7, %s4004_s3 }
0x2c18   :  { %2946 = vrot.lane.b32.xlu1 %v2944_v15, %s4004_s3 }
0x2c89   :  { %v2923_v18 = vpop.permute.xlu0 %2922 }
0x2c8a   :  { %v2925_v20 = vadd.f32 %v2923_v18, %v2915_v16  ;;  %v2947_v21 = vpop.permute.xlu1 %2946 }
0x2c8b   :  { %v2949_v22 = vadd.f32 %v2947_v21, %v2939_v53 }
0x2c8c   :  { %3824 = vtanh.f32 %v2925_v20 }
0x2c8d   :  { %3826 = vtanh.f32 %v2949_v22 }
0x2c96   :  { %v3825_v43 = vpop.eup %3824 }
0x2c97   :  { %v3827_v17 = vpop.eup %3826  ;;  %2928 = vrot.lane.b32.xlu0 %v3825_v43, %s4004_s3 }
0x2c98   :  { %2952 = vrot.lane.b32.xlu1 %v3827_v17, %s4004_s3 }
0x2d09   :  { %v2929_v31 = vpop.permute.xlu0 %2928 }
0x2d0a   :  { %v2931_v19 = vmul.f32 %v3821_v33, %v2929_v31  ;;  %v2953_v28 = vpop.permute.xlu1 %2952 }
0x2d0b   :  { %v2955_v32 = vmul.f32 %v3823_v5, %v2953_v28 }
0x2d0c   :  { %2957 = vrot.lane.b32.xlu0 %v2931_v19, %s4002_s5 }
0x2d0d   :  { %2961 = vrot.lane.b32.xlu1 %v2955_v32, %s4006_s27 }
0x2d7e   :  { %v2958_v12 = vpop.permute.xlu0 %2957 }
0x2d7f   :  { %v2962_v11 = vpop.permute.xlu1 %2961 }
0x2d80   :  { %v2964_v59 = vsel %vm1157_vm0, %v2958_v12, %v2962_v11 }
0x2d81   :  { %v2966_v9 = vmul.f32 %v2965_v36, %v2964_v59 }
0x2d83   :  { %v2967_v4 = vpack.c.bf16 %v2966_v9, %v2966_v9 }
0x2d85   :  { %3283 = vmatmul.mubr.msk.bf16.vlgmr.msra.gmra.mrb[64].mxu1 %vm1200_vm1, %v2967_v4 }
0x2e58   :  { %v3044_v60 = vpop.f32.mrb[64].mxu1 }
0x2e59   :  { %v3045_v35 = vadd.f32 %v3263_v34, %v3044_v60  ;;  %v3284_v2 = vpop.f32.mrb[65].mxu1 }
0x2e5a   :  { %v3047_v51 = vpop.f32.mrb[66].mxu1 }
0x2e5b   :  { %3050 = vst [vmem:[#allocation14] sm:$0xff] %v3045_v35  ;;  %v3285_v23 = vpop.f32.mrb[67].mxu1 }
0x2e5c   :  { %3971 = shalt.err (!%p3968_p10)
}
0x2e5d   :  { %s3972_s8 = scalar_lea.hbm %s4685_s10, 128 }
0x2e5e   :  { %p3973_p11 = scmp.ne.s32.totalorder %s4685_s10, %s3972_s8  ;;  %p3976_p12 = scmp.lt.u32.totalorder %s3972_s8, %s4685_s10 }
0x2e60   :  { %p3978_p13 = pnand %p3976_p12, %p3973_p11 }
0x2e62   :  { %3981 = shalt.err (!%p3978_p13)
}
0x2e63   :  { %3060 = dma.vmem_to_hbm [thread:$0]  %s3058_s15, 128, %s4685_s10, [#allocation5]  }
0x2e64   :  { %3990 = dma.done.wait [#allocation5], 128  }
0x2e65   :  { %3991 = vsyncadd [#allocation5], 4294967168 }
0x2e66   :  { %3064 = vsyncpa [#allocation4], 1 }
0x2e67   :  { %3065 = vsyncpa [#allocation7], 1 }
0x2e68   :  { %3066 = vsyncpa [#allocation10], 1 }
0x2e69   :  { %3067 = vsyncpa [#allocation13], 1 }
0x2e6a   :  { %3068 = vsyncpa [#allocation5], 1 }

</bundles_post_ra>
